<compile_context>
chip_gen: v7x
topology: tpu7x:2x2x1
jax: 0.10.0
libtpu: 0.0.40
codegen_flags: <defaults>
</compile_context>

<pallas_src>
import numpy as np
import jax
import jax.numpy as jnp
from jax.experimental import pallas as pl
from jax.experimental.pallas import tpu as pltpu

LANES = 128


# ---------------------------------------------------------------------------
# Fused forward kernel factory: all conv layers + final linear for B samples.
# ---------------------------------------------------------------------------
def _make_fused_kernel(geom, block_b):
    """geom: list of (H_in, H_out, stride) per conv layer (square images)."""
    n_conv = len(geom)
    B = block_b

    def kernel(*refs):
        x_ref = refs[0]                               # (B, H0, C0*W0)
        w_refs = refs[1:1 + 2 * n_conv]               # (G_l, bias_row_l) per layer
        wlin_ref = refs[1 + 2 * n_conv]               # (H_f*128, 128)
        outb_ref = refs[2 + 2 * n_conv]               # (1, 128)
        out_ref = refs[3 + 2 * n_conv]                # (B, 128)
        scratch = refs[4 + 2 * n_conv:]
        pad_refs = scratch[:n_conv]                   # (B*(H_in+2), 128) each
        op_refs = scratch[n_conv:2 * n_conv]          # (B*H_out, 3*128) each
        act_ref = scratch[2 * n_conv]                 # (B*H_f, 128)
        lin_ref = scratch[2 * n_conv + 1]             # (B, H_f*128)

        # --- scratch init ----------------------------------------------------
        # Layer 0's padded buffer is zeroed fully (the raw image only fills
        # C*W < 128 lanes).  For every other layer only the per-sample border
        # rows need zeros: the interior rows (all 128 lanes) are rewritten every
        # grid step.  Runs EVERY step -> megacore-safe (scratch is per-core).
        pad_refs[0][...] = jnp.zeros_like(pad_refs[0])
        zrow1 = jnp.zeros((1, LANES), jnp.float32)    # hoisted (no re-broadcast)
        zrow2 = jnp.zeros((2, LANES), jnp.float32)
        for l in range(1, n_conv):
            hp = geom[l][0] + 2
            pad = pad_refs[l]
            pad[0:1, :] = zrow1
            for b in range(B - 1):                    # bottom pad of b + top pad of b+1
                r = b * hp + hp - 1
                pad[r:r + 2, :] = zrow2
            pad[B * hp - 1:B * hp, :] = zrow1

        # --- place the B input images into layer 0's padded buffer ----------
        h0 = geom[0][0]
        hp0 = h0 + 2
        cw0 = x_ref.shape[2]
        for b in range(B):
            pad_refs[0][b * hp0 + 1:b * hp0 + 1 + h0, :cw0] = x_ref[b]

        # --- conv stack: ONE (B*OH, 3*128) @ (3*128, 128) GEMM per layer -----
        act = None
        for l in range(n_conv):
            h_in, h_out, s = geom[l]
            hp = h_in + 2
            pad, op = pad_refs[l], op_refs[l]
            g_ref, b_ref = w_refs[2 * l], w_refs[2 * l + 1]

            # previous layer's activations -> interior rows of this layer's
            # padded buffer (pad rows stay zero; padded lanes are already zero
            # because G's extra output columns are zero and bias is zero there).
            if l > 0:
                for b in range(B):
                    pad[b * hp + 1:b * hp + 1 + h_in, :] = \
                        act[b * h_in:(b + 1) * h_in, :]

            # im2row assembly: the 3 vertically shifted row blocks (strided for
            # stride-2 layers) laid side by side at 128-lane-aligned K offsets.
            # No S-selection matmuls, no per-kh partial products.
            for b in range(B):
                for kh in range(3):
                    if s == 1:
                        rows = pad[b * hp + kh:b * hp + kh + h_out, :]
                    else:
                        rows = pad[pl.ds(b * hp + kh, h_out, stride=s), :]
                    op[b * h_out:(b + 1) * h_out, kh * LANES:(kh + 1) * LANES] = rows

            z = jnp.dot(op[...], g_ref[...], preferred_element_type=jnp.float32)
            act = jnp.maximum(z + b_ref[...], 0.0)    # bias + ReLU

        # --- final linear: ONE (B, H_f*128) @ (H_f*128, 128) GEMM ------------
        h_f = geom[-1][1]
        act_ref[...] = act                            # (B*H_f, 128)
        for h in range(h_f):                          # regroup rows -> lane blocks
            lin_ref[:, h * LANES:(h + 1) * LANES] = \
                act_ref[pl.ds(h, B, stride=h_f), :]
        out_ref[...] = (jnp.dot(lin_ref[...], wlin_ref[...],
                                preferred_element_type=jnp.float32)
                        + outb_ref[...])

    return kernel


# ---------------------------------------------------------------------------
# One-time weight re-packing (init time, numpy)
# ---------------------------------------------------------------------------
def _pack_conv_gemm(w, b, stride, h_in):
    """Conv2d(k=3, pad=1, stride) -> fused-K GEMM operands.

    G has K = 3*128 (one 128-lane block per vertical tap kh; horizontal taps +
    horizontal stride folded in as a banded matrix) and N = 128 (co*OW + wo,
    zero-padded), so each conv layer is a single MXU matmul.
    """
    w = np.asarray(w, np.float32)
    b = np.asarray(b, np.float32)
    cout, cin = w.shape[:2]
    h_out = (h_in - 1) // stride + 1
    assert cin * h_in <= LANES and cout * h_out <= LANES
    G = np.zeros((3 * LANES, LANES), np.float32)
    for kh in range(3):
        for kw in range(3):
            for wo in range(h_out):
                wi = stride * wo + kw - 1
                if 0 <= wi < h_in:
                    G[kh * LANES + wi:kh * LANES + wi + cin * h_in:h_in,
                      wo:wo + cout * h_out:h_out] = w[:, :, kh, kw].T
    brow = np.zeros((1, LANES), np.float32)
    brow[0, :cout * h_out] = np.repeat(b, h_out)
    return G, brow, h_out


def init_cnn_params(key, in_channels=1, output_dims=10, hidden_dims=16,
                    hidden_layers=5, input_hw=28):
    """Random init matching the PyTorch module + kernel-ready packed operands."""
    assert hidden_layers >= 3
    specs = []
    in_dims = in_channels
    for _ in range(3):                       # 3 stride-2 downsampling convs
        specs.append((in_dims, in_dims * 2, 2))
        in_dims *= 2
    for _ in range(hidden_layers - 3):       # remaining stride-1 convs
        specs.append((in_dims, hidden_dims, 1))
        in_dims = hidden_dims

    convs = []
    for cin, cout, s in specs:
        key, kw_, kb_ = jax.random.split(key, 3)
        bound = 1.0 / float(np.sqrt(cin * 9))
        w = jax.random.uniform(kw_, (cout, cin, 3, 3), jnp.float32, -bound, bound)
        bb = jax.random.uniform(kb_, (cout,), jnp.float32, -bound, bound)
        convs.append((w, bb, s))

    # ---- re-pack everything once into the fused-kernel operand layout ------
    packed, geom = [], []
    h = input_hw                             # 28 -> 14 -> 7 -> 4 -> 4 -> 4
    for w, bb, s in convs:
        G, brow, h_out = _pack_conv_gemm(np.asarray(w), np.asarray(bb), s, h)
        geom.append((h, h_out, s))
        packed += [jnp.asarray(G), jnp.asarray(brow)]
        h = h_out

    c_last = convs[-1][0].shape[0]
    feature_dims = c_last * h * h            # == self.feature_dims for 28x28 input
    key, kw_, kb_ = jax.random.split(key, 3)
    bound = 1.0 / float(np.sqrt(feature_dims))
    out_w = jax.random.uniform(kw_, (output_dims, feature_dims), jnp.float32,
                               -bound, bound)
    out_b = jax.random.uniform(kb_, (output_dims,), jnp.float32, -bound, bound)

    # Linear re-packed for the kernel's (row=h, lane=c*W+w) activation layout and
    # flattened so the whole head is one (B, H_f*128) @ (H_f*128, 128) dot.
    # PyTorch flatten of (N,C,H,W) orders features as c*H*W + h*W + w.
    assert c_last * h <= LANES and output_dims <= LANES
    wlin = np.zeros((h * LANES, LANES), np.float32)
    ow = np.asarray(out_w, np.float32).reshape(output_dims, c_last, h, h)
    ow = np.transpose(ow, (2, 1, 3, 0))      # (h, c, w, o)
    for hh in range(h):
        wlin[hh * LANES:hh * LANES + c_last * h, :output_dims] = (
            ow[hh].reshape(c_last * h, output_dims))
    outb_row = np.zeros((1, LANES), np.float32)
    outb_row[0, :output_dims] = np.asarray(out_b, np.float32)
    packed += [jnp.asarray(wlin), jnp.asarray(outb_row)]

    raw = {"convs": convs, "out_w": out_w, "out_b": out_b}
    return raw, packed, geom


# ---------------------------------------------------------------------------
# Forward pass (single fused pallas_call, B samples per grid step)
# ---------------------------------------------------------------------------
def cnn_forward(packed, geom, x_nchw, *, block_b=8, output_dims=10):
    """x_nchw: (N, C, H, W) float32 -> logits (N, output_dims)."""
    N, C, H, W = x_nchw.shape
    x_nchw = x_nchw.astype(jnp.float32)
    # Fold NCHW -> (N, H, C*W) into the input path: pure reshape for C == 1.
    if C == 1:
        x = x_nchw.reshape(N, H, W)
    else:
        x = jnp.transpose(x_nchw, (0, 2, 1, 3)).reshape(N, H, C * W)

    # Pad the batch to a multiple of the per-step block.
    n_pad = (-N) % block_b
    if n_pad:
        x = jnp.concatenate([x, jnp.zeros((n_pad, H, C * W), x.dtype)], axis=0)
    n_total = N + n_pad
    grid = (n_total // block_b,)

    in_specs = [pl.BlockSpec((block_b, H, C * W), lambda i: (i, 0, 0))]
    for arr in packed:                        # packed weights: full resident blocks
        in_specs.append(pl.BlockSpec(arr.shape, lambda i: (0, 0)))
    out_specs = pl.BlockSpec((block_b, LANES), lambda i: (i, 0))

    scratch = []
    for h_in, _, _ in geom:                   # padded activations, lane-dense (128)
        scratch.append(pltpu.VMEM((block_b * (h_in + 2), LANES), jnp.float32))
    for _, h_out, _ in geom:                  # im2row operands, fused K = 3*128
        scratch.append(pltpu.VMEM((block_b * h_out, 3 * LANES), jnp.float32))
    h_f = geom[-1][1]
    scratch.append(pltpu.VMEM((block_b * h_f, LANES), jnp.float32))   # last conv act
    scratch.append(pltpu.VMEM((block_b, h_f * LANES), jnp.float32))   # linear operand

    out = pl.pallas_call(
        _make_fused_kernel(geom, block_b),
        out_shape=jax.ShapeDtypeStruct((n_total, LANES), jnp.float32),
        grid=grid,
        in_specs=in_specs,
        out_specs=out_specs,
        scratch_shapes=scratch,
        compiler_params=pltpu.CompilerParams(
            dimension_semantics=("parallel",)),   # sample blocks shard over v7x's 2 TCs
    )(x, *packed)
    return out[:N, :output_dims]


# ---------------------------------------------------------------------------
# Pure-JAX reference (same math, XLA conv) for a correctness check
# ---------------------------------------------------------------------------
def cnn_reference(raw, x_nchw):
    x = x_nchw
    for w, b, s in raw["convs"]:
        x = jax.lax.conv_general_dilated(
            x, w, window_strides=(s, s), padding=((1, 1), (1, 1)),
            dimension_numbers=("NCHW", "OIHW", "NCHW"))
        x = jnp.maximum(x + b[None, :, None, None], 0.0)
    x = x.reshape(x.shape[0], -1)
    return x @ raw["out_w"].T + raw["out_b"][None, :]


if __name__ == "__main__":
    key = jax.random.PRNGKey(0)
    kparam, kdata = jax.random.split(key)
    raw, packed, geom = init_cnn_params(kparam)

    # MNIST-shaped input: batch=16, 1 channel, 28x28 (NCHW); block_b=8 -> grid=(2,)
    x = jax.random.normal(kdata, (16, 1, 28, 28), jnp.float32)

    logits = cnn_forward(packed, geom, x, block_b=8)
    jax.block_until_ready(logits)
    assert logits.shape == (16, 10)

    ref = cnn_reference(raw, x)
    err = float(jnp.max(jnp.abs(logits - ref)))
    assert err < 1e-3, f"mismatch vs reference: {err}"
    print("KERNEL_OK")
    # TODO(synk): classify()'s nn.Softmax(dim=output_dims) is not part of forward()
    # (and dim=10 is out of range for a 2-D tensor in PyTorch), so it is omitted.
</pallas_src>

<mosaic_0001>
module attributes {stable_mosaic.version = 11 : i64} {
  func.func @kernel(%arg0: i32, %arg1: memref<8x28x28xf32, #tpu.memory_space<vmem>>, %arg2: memref<384x128xf32, #tpu.memory_space<vmem>>, %arg3: memref<1x128xf32, #tpu.memory_space<vmem>>, %arg4: memref<384x128xf32, #tpu.memory_space<vmem>>, %arg5: memref<1x128xf32, #tpu.memory_space<vmem>>, %arg6: memref<384x128xf32, #tpu.memory_space<vmem>>, %arg7: memref<1x128xf32, #tpu.memory_space<vmem>>, %arg8: memref<384x128xf32, #tpu.memory_space<vmem>>, %arg9: memref<1x128xf32, #tpu.memory_space<vmem>>, %arg10: memref<384x128xf32, #tpu.memory_space<vmem>>, %arg11: memref<1x128xf32, #tpu.memory_space<vmem>>, %arg12: memref<512x128xf32, #tpu.memory_space<vmem>>, %arg13: memref<1x128xf32, #tpu.memory_space<vmem>>, %arg14: memref<8x128xf32, #tpu.memory_space<vmem>>, %arg15: memref<240x128xf32, #tpu.memory_space<vmem>>, %arg16: memref<128x128xf32, #tpu.memory_space<vmem>>, %arg17: memref<72x128xf32, #tpu.memory_space<vmem>>, %arg18: memref<48x128xf32, #tpu.memory_space<vmem>>, %arg19: memref<48x128xf32, #tpu.memory_space<vmem>>, %arg20: memref<112x384xf32, #tpu.memory_space<vmem>>, %arg21: memref<56x384xf32, #tpu.memory_space<vmem>>, %arg22: memref<32x384xf32, #tpu.memory_space<vmem>>, %arg23: memref<32x384xf32, #tpu.memory_space<vmem>>, %arg24: memref<32x384xf32, #tpu.memory_space<vmem>>, %arg25: memref<32x128xf32, #tpu.memory_space<vmem>>, %arg26: memref<8x512xf32, #tpu.memory_space<vmem>>) attributes {dimension_semantics = [#tpu.dimension_semantics<parallel>], iteration_bounds = array<i64: 2>, scalar_prefetch = 0 : i64, scratch_operands = 12 : i64, tpu.core_type = #tpu.core_type<tc>, window_params = [{transform_indices = @transform_0, window_bounds = array<i64: 8, 28, 28>}, {pipeline_mode = #tpu.pipeline_mode<synchronous>, transform_indices = @transform_1, window_bounds = array<i64: 384, 128>}, {pipeline_mode = #tpu.pipeline_mode<synchronous>, transform_indices = @transform_2, window_bounds = array<i64: 1, 128>}, {pipeline_mode = #tpu.pipeline_mode<synchronous>, transform_indices = @transform_3, window_bounds = array<i64: 384, 128>}, {pipeline_mode = #tpu.pipeline_mode<synchronous>, transform_indices = @transform_4, window_bounds = array<i64: 1, 128>}, {pipeline_mode = #tpu.pipeline_mode<synchronous>, transform_indices = @transform_5, window_bounds = array<i64: 384, 128>}, {pipeline_mode = #tpu.pipeline_mode<synchronous>, transform_indices = @transform_6, window_bounds = array<i64: 1, 128>}, {pipeline_mode = #tpu.pipeline_mode<synchronous>, transform_indices = @transform_7, window_bounds = array<i64: 384, 128>}, {pipeline_mode = #tpu.pipeline_mode<synchronous>, transform_indices = @transform_8, window_bounds = array<i64: 1, 128>}, {pipeline_mode = #tpu.pipeline_mode<synchronous>, transform_indices = @transform_9, window_bounds = array<i64: 384, 128>}, {pipeline_mode = #tpu.pipeline_mode<synchronous>, transform_indices = @transform_10, window_bounds = array<i64: 1, 128>}, {pipeline_mode = #tpu.pipeline_mode<synchronous>, transform_indices = @transform_11, window_bounds = array<i64: 512, 128>}, {pipeline_mode = #tpu.pipeline_mode<synchronous>, transform_indices = @transform_12, window_bounds = array<i64: 1, 128>}, {transform_indices = @transform_13, window_bounds = array<i64: 8, 128>}]} {
    %cst = arith.constant 0.000000e+00 : f32
    %0 = vector.broadcast %cst : f32 to vector<240x128xf32>
    %c0 = arith.constant 0 : index
    %c0_0 = arith.constant 0 : index
    %1 = vector.load %arg15[%c0, %c0_0] : memref<240x128xf32, #tpu.memory_space<vmem>>, vector<240x128xf32>
    tpu.vector_store %arg15[%c0, %c0_0], %0 {strides = array<i32>} : memref<240x128xf32, #tpu.memory_space<vmem>>, vector<240x128xf32>,
    %cst_1 = arith.constant 0.000000e+00 : f32
    %2 = vector.broadcast %cst_1 : f32 to vector<1x128xf32>
    %cst_2 = arith.constant 0.000000e+00 : f32
    %3 = vector.broadcast %cst_2 : f32 to vector<2x128xf32>
    %c0_3 = arith.constant 0 : index
    %c0_4 = arith.constant 0 : index
    %4 = vector.load %arg16[%c0_3, %c0_4] : memref<128x128xf32, #tpu.memory_space<vmem>>, vector<1x128xf32>
    tpu.vector_store %arg16[%c0_3, %c0_4], %2 {strides = array<i32>} : memref<128x128xf32, #tpu.memory_space<vmem>>, vector<1x128xf32>,
    %c15 = arith.constant 15 : index
    %c0_5 = arith.constant 0 : index
    %5 = vector.load %arg16[%c15, %c0_5] : memref<128x128xf32, #tpu.memory_space<vmem>>, vector<2x128xf32>
    tpu.vector_store %arg16[%c15, %c0_5], %3 {strides = array<i32>} : memref<128x128xf32, #tpu.memory_space<vmem>>, vector<2x128xf32>,
    %c31 = arith.constant 31 : index
    %c0_6 = arith.constant 0 : index
    %6 = vector.load %arg16[%c31, %c0_6] : memref<128x128xf32, #tpu.memory_space<vmem>>, vector<2x128xf32>
    tpu.vector_store %arg16[%c31, %c0_6], %3 {strides = array<i32>} : memref<128x128xf32, #tpu.memory_space<vmem>>, vector<2x128xf32>,
    %c47 = arith.constant 47 : index
    %c0_7 = arith.constant 0 : index
    %7 = vector.load %arg16[%c47, %c0_7] : memref<128x128xf32, #tpu.memory_space<vmem>>, vector<2x128xf32>
    tpu.vector_store %arg16[%c47, %c0_7], %3 {strides = array<i32>} : memref<128x128xf32, #tpu.memory_space<vmem>>, vector<2x128xf32>,
    %c63 = arith.constant 63 : index
    %c0_8 = arith.constant 0 : index
    %8 = vector.load %arg16[%c63, %c0_8] : memref<128x128xf32, #tpu.memory_space<vmem>>, vector<2x128xf32>
    tpu.vector_store %arg16[%c63, %c0_8], %3 {strides = array<i32>} : memref<128x128xf32, #tpu.memory_space<vmem>>, vector<2x128xf32>,
    %c79 = arith.constant 79 : index
    %c0_9 = arith.constant 0 : index
    %9 = vector.load %arg16[%c79, %c0_9] : memref<128x128xf32, #tpu.memory_space<vmem>>, vector<2x128xf32>
    tpu.vector_store %arg16[%c79, %c0_9], %3 {strides = array<i32>} : memref<128x128xf32, #tpu.memory_space<vmem>>, vector<2x128xf32>,
    %c95 = arith.constant 95 : index
    %c0_10 = arith.constant 0 : index
    %10 = vector.load %arg16[%c95, %c0_10] : memref<128x128xf32, #tpu.memory_space<vmem>>, vector<2x128xf32>
    tpu.vector_store %arg16[%c95, %c0_10], %3 {strides = array<i32>} : memref<128x128xf32, #tpu.memory_space<vmem>>, vector<2x128xf32>,
    %c111 = arith.constant 111 : index
    %c0_11 = arith.constant 0 : index
    %11 = vector.load %arg16[%c111, %c0_11] : memref<128x128xf32, #tpu.memory_space<vmem>>, vector<2x128xf32>
    tpu.vector_store %arg16[%c111, %c0_11], %3 {strides = array<i32>} : memref<128x128xf32, #tpu.memory_space<vmem>>, vector<2x128xf32>,
    %c127 = arith.constant 127 : index
    %c0_12 = arith.constant 0 : index
    %12 = vector.load %arg16[%c127, %c0_12] : memref<128x128xf32, #tpu.memory_space<vmem>>, vector<1x128xf32>
    tpu.vector_store %arg16[%c127, %c0_12], %2 {strides = array<i32>} : memref<128x128xf32, #tpu.memory_space<vmem>>, vector<1x128xf32>,
    %c0_13 = arith.constant 0 : index
    %c0_14 = arith.constant 0 : index
    %13 = vector.load %arg17[%c0_13, %c0_14] : memref<72x128xf32, #tpu.memory_space<vmem>>, vector<1x128xf32>
    tpu.vector_store %arg17[%c0_13, %c0_14], %2 {strides = array<i32>} : memref<72x128xf32, #tpu.memory_space<vmem>>, vector<1x128xf32>,
    %c8 = arith.constant 8 : index
    %c0_15 = arith.constant 0 : index
    %14 = vector.load %arg17[%c8, %c0_15] : memref<72x128xf32, #tpu.memory_space<vmem>>, vector<2x128xf32>
    tpu.vector_store %arg17[%c8, %c0_15], %3 {strides = array<i32>} : memref<72x128xf32, #tpu.memory_space<vmem>>, vector<2x128xf32>,
    %c17 = arith.constant 17 : index
    %c0_16 = arith.constant 0 : index
    %15 = vector.load %arg17[%c17, %c0_16] : memref<72x128xf32, #tpu.memory_space<vmem>>, vector<2x128xf32>
    tpu.vector_store %arg17[%c17, %c0_16], %3 {strides = array<i32>} : memref<72x128xf32, #tpu.memory_space<vmem>>, vector<2x128xf32>,
    %c26 = arith.constant 26 : index
    %c0_17 = arith.constant 0 : index
    %16 = vector.load %arg17[%c26, %c0_17] : memref<72x128xf32, #tpu.memory_space<vmem>>, vector<2x128xf32>
    tpu.vector_store %arg17[%c26, %c0_17], %3 {strides = array<i32>} : memref<72x128xf32, #tpu.memory_space<vmem>>, vector<2x128xf32>,
    %c35 = arith.constant 35 : index
    %c0_18 = arith.constant 0 : index
    %17 = vector.load %arg17[%c35, %c0_18] : memref<72x128xf32, #tpu.memory_space<vmem>>, vector<2x128xf32>
    tpu.vector_store %arg17[%c35, %c0_18], %3 {strides = array<i32>} : memref<72x128xf32, #tpu.memory_space<vmem>>, vector<2x128xf32>,
    %c44 = arith.constant 44 : index
    %c0_19 = arith.constant 0 : index
    %18 = vector.load %arg17[%c44, %c0_19] : memref<72x128xf32, #tpu.memory_space<vmem>>, vector<2x128xf32>
    tpu.vector_store %arg17[%c44, %c0_19], %3 {strides = array<i32>} : memref<72x128xf32, #tpu.memory_space<vmem>>, vector<2x128xf32>,
    %c53 = arith.constant 53 : index
    %c0_20 = arith.constant 0 : index
    %19 = vector.load %arg17[%c53, %c0_20] : memref<72x128xf32, #tpu.memory_space<vmem>>, vector<2x128xf32>
    tpu.vector_store %arg17[%c53, %c0_20], %3 {strides = array<i32>} : memref<72x128xf32, #tpu.memory_space<vmem>>, vector<2x128xf32>,
    %c62 = arith.constant 62 : index
    %c0_21 = arith.constant 0 : index
    %20 = vector.load %arg17[%c62, %c0_21] : memref<72x128xf32, #tpu.memory_space<vmem>>, vector<2x128xf32>
    tpu.vector_store %arg17[%c62, %c0_21], %3 {strides = array<i32>} : memref<72x128xf32, #tpu.memory_space<vmem>>, vector<2x128xf32>,
    %c71 = arith.constant 71 : index
    %c0_22 = arith.constant 0 : index
    %21 = vector.load %arg17[%c71, %c0_22] : memref<72x128xf32, #tpu.memory_space<vmem>>, vector<1x128xf32>
    tpu.vector_store %arg17[%c71, %c0_22], %2 {strides = array<i32>} : memref<72x128xf32, #tpu.memory_space<vmem>>, vector<1x128xf32>,
    %c0_23 = arith.constant 0 : index
    %c0_24 = arith.constant 0 : index
    %22 = vector.load %arg18[%c0_23, %c0_24] : memref<48x128xf32, #tpu.memory_space<vmem>>, vector<1x128xf32>
    tpu.vector_store %arg18[%c0_23, %c0_24], %2 {strides = array<i32>} : memref<48x128xf32, #tpu.memory_space<vmem>>, vector<1x128xf32>,
    %c5 = arith.constant 5 : index
    %c0_25 = arith.constant 0 : index
    %23 = vector.load %arg18[%c5, %c0_25] : memref<48x128xf32, #tpu.memory_space<vmem>>, vector<2x128xf32>
    tpu.vector_store %arg18[%c5, %c0_25], %3 {strides = array<i32>} : memref<48x128xf32, #tpu.memory_space<vmem>>, vector<2x128xf32>,
    %c11 = arith.constant 11 : index
    %c0_26 = arith.constant 0 : index
    %24 = vector.load %arg18[%c11, %c0_26] : memref<48x128xf32, #tpu.memory_space<vmem>>, vector<2x128xf32>
    tpu.vector_store %arg18[%c11, %c0_26], %3 {strides = array<i32>} : memref<48x128xf32, #tpu.memory_space<vmem>>, vector<2x128xf32>,
    %c17_27 = arith.constant 17 : index
    %c0_28 = arith.constant 0 : index
    %25 = vector.load %arg18[%c17_27, %c0_28] : memref<48x128xf32, #tpu.memory_space<vmem>>, vector<2x128xf32>
    tpu.vector_store %arg18[%c17_27, %c0_28], %3 {strides = array<i32>} : memref<48x128xf32, #tpu.memory_space<vmem>>, vector<2x128xf32>,
    %c23 = arith.constant 23 : index
    %c0_29 = arith.constant 0 : index
    %26 = vector.load %arg18[%c23, %c0_29] : memref<48x128xf32, #tpu.memory_space<vmem>>, vector<2x128xf32>
    tpu.vector_store %arg18[%c23, %c0_29], %3 {strides = array<i32>} : memref<48x128xf32, #tpu.memory_space<vmem>>, vector<2x128xf32>,
    %c29 = arith.constant 29 : index
    %c0_30 = arith.constant 0 : index
    %27 = vector.load %arg18[%c29, %c0_30] : memref<48x128xf32, #tpu.memory_space<vmem>>, vector<2x128xf32>
    tpu.vector_store %arg18[%c29, %c0_30], %3 {strides = array<i32>} : memref<48x128xf32, #tpu.memory_space<vmem>>, vector<2x128xf32>,
    %c35_31 = arith.constant 35 : index
    %c0_32 = arith.constant 0 : index
    %28 = vector.load %arg18[%c35_31, %c0_32] : memref<48x128xf32, #tpu.memory_space<vmem>>, vector<2x128xf32>
    tpu.vector_store %arg18[%c35_31, %c0_32], %3 {strides = array<i32>} : memref<48x128xf32, #tpu.memory_space<vmem>>, vector<2x128xf32>,
    %c41 = arith.constant 41 : index
    %c0_33 = arith.constant 0 : index
    %29 = vector.load %arg18[%c41, %c0_33] : memref<48x128xf32, #tpu.memory_space<vmem>>, vector<2x128xf32>
    tpu.vector_store %arg18[%c41, %c0_33], %3 {strides = array<i32>} : memref<48x128xf32, #tpu.memory_space<vmem>>, vector<2x128xf32>,
    %c47_34 = arith.constant 47 : index
    %c0_35 = arith.constant 0 : index
    %30 = vector.load %arg18[%c47_34, %c0_35] : memref<48x128xf32, #tpu.memory_space<vmem>>, vector<1x128xf32>
    tpu.vector_store %arg18[%c47_34, %c0_35], %2 {strides = array<i32>} : memref<48x128xf32, #tpu.memory_space<vmem>>, vector<1x128xf32>,
    %c0_36 = arith.constant 0 : index
    %c0_37 = arith.constant 0 : index
    %31 = vector.load %arg19[%c0_36, %c0_37] : memref<48x128xf32, #tpu.memory_space<vmem>>, vector<1x128xf32>
    tpu.vector_store %arg19[%c0_36, %c0_37], %2 {strides = array<i32>} : memref<48x128xf32, #tpu.memory_space<vmem>>, vector<1x128xf32>,
    %c5_38 = arith.constant 5 : index
    %c0_39 = arith.constant 0 : index
    %32 = vector.load %arg19[%c5_38, %c0_39] : memref<48x128xf32, #tpu.memory_space<vmem>>, vector<2x128xf32>
    tpu.vector_store %arg19[%c5_38, %c0_39], %3 {strides = array<i32>} : memref<48x128xf32, #tpu.memory_space<vmem>>, vector<2x128xf32>,
    %c11_40 = arith.constant 11 : index
    %c0_41 = arith.constant 0 : index
    %33 = vector.load %arg19[%c11_40, %c0_41] : memref<48x128xf32, #tpu.memory_space<vmem>>, vector<2x128xf32>
    tpu.vector_store %arg19[%c11_40, %c0_41], %3 {strides = array<i32>} : memref<48x128xf32, #tpu.memory_space<vmem>>, vector<2x128xf32>,
    %c17_42 = arith.constant 17 : index
    %c0_43 = arith.constant 0 : index
    %34 = vector.load %arg19[%c17_42, %c0_43] : memref<48x128xf32, #tpu.memory_space<vmem>>, vector<2x128xf32>
    tpu.vector_store %arg19[%c17_42, %c0_43], %3 {strides = array<i32>} : memref<48x128xf32, #tpu.memory_space<vmem>>, vector<2x128xf32>,
    %c23_44 = arith.constant 23 : index
    %c0_45 = arith.constant 0 : index
    %35 = vector.load %arg19[%c23_44, %c0_45] : memref<48x128xf32, #tpu.memory_space<vmem>>, vector<2x128xf32>
    tpu.vector_store %arg19[%c23_44, %c0_45], %3 {strides = array<i32>} : memref<48x128xf32, #tpu.memory_space<vmem>>, vector<2x128xf32>,
    %c29_46 = arith.constant 29 : index
    %c0_47 = arith.constant 0 : index
    %36 = vector.load %arg19[%c29_46, %c0_47] : memref<48x128xf32, #tpu.memory_space<vmem>>, vector<2x128xf32>
    tpu.vector_store %arg19[%c29_46, %c0_47], %3 {strides = array<i32>} : memref<48x128xf32, #tpu.memory_space<vmem>>, vector<2x128xf32>,
    %c35_48 = arith.constant 35 : index
    %c0_49 = arith.constant 0 : index
    %37 = vector.load %arg19[%c35_48, %c0_49] : memref<48x128xf32, #tpu.memory_space<vmem>>, vector<2x128xf32>
    tpu.vector_store %arg19[%c35_48, %c0_49], %3 {strides = array<i32>} : memref<48x128xf32, #tpu.memory_space<vmem>>, vector<2x128xf32>,
    %c41_50 = arith.constant 41 : index
    %c0_51 = arith.constant 0 : index
    %38 = vector.load %arg19[%c41_50, %c0_51] : memref<48x128xf32, #tpu.memory_space<vmem>>, vector<2x128xf32>
    tpu.vector_store %arg19[%c41_50, %c0_51], %3 {strides = array<i32>} : memref<48x128xf32, #tpu.memory_space<vmem>>, vector<2x128xf32>,
    %c47_52 = arith.constant 47 : index
    %c0_53 = arith.constant 0 : index
    %39 = vector.load %arg19[%c47_52, %c0_53] : memref<48x128xf32, #tpu.memory_space<vmem>>, vector<1x128xf32>
    tpu.vector_store %arg19[%c47_52, %c0_53], %2 {strides = array<i32>} : memref<48x128xf32, #tpu.memory_space<vmem>>, vector<1x128xf32>,
    %c0_54 = arith.constant 0 : index
    %c0_55 = arith.constant 0 : index
    %c0_56 = arith.constant 0 : index
    %40 = vector.load %arg1[%c0_54, %c0_55, %c0_56] : memref<8x28x28xf32, #tpu.memory_space<vmem>>, vector<1x28x28xf32>
    %41 = vector.shape_cast %40 : vector<1x28x28xf32> to vector<28x28xf32>
    %c1 = arith.constant 1 : index
    %c0_57 = arith.constant 0 : index
    %42 = vector.load %arg15[%c1, %c0_57] : memref<240x128xf32, #tpu.memory_space<vmem>>, vector<28x28xf32>
    tpu.vector_store %arg15[%c1, %c0_57], %41 {strides = array<i32>} : memref<240x128xf32, #tpu.memory_space<vmem>>, vector<28x28xf32>,
    %c1_58 = arith.constant 1 : index
    %c0_59 = arith.constant 0 : index
    %c0_60 = arith.constant 0 : index
    %43 = vector.load %arg1[%c1_58, %c0_59, %c0_60] : memref<8x28x28xf32, #tpu.memory_space<vmem>>, vector<1x28x28xf32>
    %44 = vector.shape_cast %43 : vector<1x28x28xf32> to vector<28x28xf32>
    %c31_61 = arith.constant 31 : index
    %c0_62 = arith.constant 0 : index
    %45 = vector.load %arg15[%c31_61, %c0_62] : memref<240x128xf32, #tpu.memory_space<vmem>>, vector<28x28xf32>
    tpu.vector_store %arg15[%c31_61, %c0_62], %44 {strides = array<i32>} : memref<240x128xf32, #tpu.memory_space<vmem>>, vector<28x28xf32>,
    %c2 = arith.constant 2 : index
    %c0_63 = arith.constant 0 : index
    %c0_64 = arith.constant 0 : index
    %46 = vector.load %arg1[%c2, %c0_63, %c0_64] : memref<8x28x28xf32, #tpu.memory_space<vmem>>, vector<1x28x28xf32>
    %47 = vector.shape_cast %46 : vector<1x28x28xf32> to vector<28x28xf32>
    %c61 = arith.constant 61 : index
    %c0_65 = arith.constant 0 : index
    %48 = vector.load %arg15[%c61, %c0_65] : memref<240x128xf32, #tpu.memory_space<vmem>>, vector<28x28xf32>
    tpu.vector_store %arg15[%c61, %c0_65], %47 {strides = array<i32>} : memref<240x128xf32, #tpu.memory_space<vmem>>, vector<28x28xf32>,
    %c3 = arith.constant 3 : index
    %c0_66 = arith.constant 0 : index
    %c0_67 = arith.constant 0 : index
    %49 = vector.load %arg1[%c3, %c0_66, %c0_67] : memref<8x28x28xf32, #tpu.memory_space<vmem>>, vector<1x28x28xf32>
    %50 = vector.shape_cast %49 : vector<1x28x28xf32> to vector<28x28xf32>
    %c91 = arith.constant 91 : index
    %c0_68 = arith.constant 0 : index
    %51 = vector.load %arg15[%c91, %c0_68] : memref<240x128xf32, #tpu.memory_space<vmem>>, vector<28x28xf32>
    tpu.vector_store %arg15[%c91, %c0_68], %50 {strides = array<i32>} : memref<240x128xf32, #tpu.memory_space<vmem>>, vector<28x28xf32>,
    %c4 = arith.constant 4 : index
    %c0_69 = arith.constant 0 : index
    %c0_70 = arith.constant 0 : index
    %52 = vector.load %arg1[%c4, %c0_69, %c0_70] : memref<8x28x28xf32, #tpu.memory_space<vmem>>, vector<1x28x28xf32>
    %53 = vector.shape_cast %52 : vector<1x28x28xf32> to vector<28x28xf32>
    %c121 = arith.constant 121 : index
    %c0_71 = arith.constant 0 : index
    %54 = vector.load %arg15[%c121, %c0_71] : memref<240x128xf32, #tpu.memory_space<vmem>>, vector<28x28xf32>
    tpu.vector_store %arg15[%c121, %c0_71], %53 {strides = array<i32>} : memref<240x128xf32, #tpu.memory_space<vmem>>, vector<28x28xf32>,
    %c5_72 = arith.constant 5 : index
    %c0_73 = arith.constant 0 : index
    %c0_74 = arith.constant 0 : index
    %55 = vector.load %arg1[%c5_72, %c0_73, %c0_74] : memref<8x28x28xf32, #tpu.memory_space<vmem>>, vector<1x28x28xf32>
    %56 = vector.shape_cast %55 : vector<1x28x28xf32> to vector<28x28xf32>
    %c151 = arith.constant 151 : index
    %c0_75 = arith.constant 0 : index
    %57 = vector.load %arg15[%c151, %c0_75] : memref<240x128xf32, #tpu.memory_space<vmem>>, vector<28x28xf32>
    tpu.vector_store %arg15[%c151, %c0_75], %56 {strides = array<i32>} : memref<240x128xf32, #tpu.memory_space<vmem>>, vector<28x28xf32>,
    %c6 = arith.constant 6 : index
    %c0_76 = arith.constant 0 : index
    %c0_77 = arith.constant 0 : index
    %58 = vector.load %arg1[%c6, %c0_76, %c0_77] : memref<8x28x28xf32, #tpu.memory_space<vmem>>, vector<1x28x28xf32>
    %59 = vector.shape_cast %58 : vector<1x28x28xf32> to vector<28x28xf32>
    %c181 = arith.constant 181 : index
    %c0_78 = arith.constant 0 : index
    %60 = vector.load %arg15[%c181, %c0_78] : memref<240x128xf32, #tpu.memory_space<vmem>>, vector<28x28xf32>
    tpu.vector_store %arg15[%c181, %c0_78], %59 {strides = array<i32>} : memref<240x128xf32, #tpu.memory_space<vmem>>, vector<28x28xf32>,
    %c7 = arith.constant 7 : index
    %c0_79 = arith.constant 0 : index
    %c0_80 = arith.constant 0 : index
    %61 = vector.load %arg1[%c7, %c0_79, %c0_80] : memref<8x28x28xf32, #tpu.memory_space<vmem>>, vector<1x28x28xf32>
    %62 = vector.shape_cast %61 : vector<1x28x28xf32> to vector<28x28xf32>
    %c211 = arith.constant 211 : index
    %c0_81 = arith.constant 0 : index
    %63 = vector.load %arg15[%c211, %c0_81] : memref<240x128xf32, #tpu.memory_space<vmem>>, vector<28x28xf32>
    tpu.vector_store %arg15[%c211, %c0_81], %62 {strides = array<i32>} : memref<240x128xf32, #tpu.memory_space<vmem>>, vector<28x28xf32>,
    %c0_82 = arith.constant 0 : index
    %c0_83 = arith.constant 0 : index
    %64 = tpu.strided_load %arg15[%c0_82, %c0_83] {strides = array<i32: 2, 1>} : memref<240x128xf32, #tpu.memory_space<vmem>>, vector<14x128xf32>
    %c0_84 = arith.constant 0 : index
    %c0_85 = arith.constant 0 : index
    %65 = vector.load %arg20[%c0_84, %c0_85] : memref<112x384xf32, #tpu.memory_space<vmem>>, vector<14x128xf32>
    tpu.vector_store %arg20[%c0_84, %c0_85], %64 {strides = array<i32>} : memref<112x384xf32, #tpu.memory_space<vmem>>, vector<14x128xf32>,
    %c1_86 = arith.constant 1 : index
    %c0_87 = arith.constant 0 : index
    %66 = tpu.strided_load %arg15[%c1_86, %c0_87] {strides = array<i32: 2, 1>} : memref<240x128xf32, #tpu.memory_space<vmem>>, vector<14x128xf32>
    %c0_88 = arith.constant 0 : index
    %c128 = arith.constant 128 : index
    %67 = vector.load %arg20[%c0_88, %c128] : memref<112x384xf32, #tpu.memory_space<vmem>>, vector<14x128xf32>
    tpu.vector_store %arg20[%c0_88, %c128], %66 {strides = array<i32>} : memref<112x384xf32, #tpu.memory_space<vmem>>, vector<14x128xf32>,
    %c2_89 = arith.constant 2 : index
    %c0_90 = arith.constant 0 : index
    %68 = tpu.strided_load %arg15[%c2_89, %c0_90] {strides = array<i32: 2, 1>} : memref<240x128xf32, #tpu.memory_space<vmem>>, vector<14x128xf32>
    %c0_91 = arith.constant 0 : index
    %c256 = arith.constant 256 : index
    %69 = vector.load %arg20[%c0_91, %c256] : memref<112x384xf32, #tpu.memory_space<vmem>>, vector<14x128xf32>
    tpu.vector_store %arg20[%c0_91, %c256], %68 {strides = array<i32>} : memref<112x384xf32, #tpu.memory_space<vmem>>, vector<14x128xf32>,
    %c30 = arith.constant 30 : index
    %c0_92 = arith.constant 0 : index
    %70 = tpu.strided_load %arg15[%c30, %c0_92] {strides = array<i32: 2, 1>} : memref<240x128xf32, #tpu.memory_space<vmem>>, vector<14x128xf32>
    %c14 = arith.constant 14 : index
    %c0_93 = arith.constant 0 : index
    %71 = vector.load %arg20[%c14, %c0_93] : memref<112x384xf32, #tpu.memory_space<vmem>>, vector<14x128xf32>
    tpu.vector_store %arg20[%c14, %c0_93], %70 {strides = array<i32>} : memref<112x384xf32, #tpu.memory_space<vmem>>, vector<14x128xf32>,
    %c31_94 = arith.constant 31 : index
    %c0_95 = arith.constant 0 : index
    %72 = tpu.strided_load %arg15[%c31_94, %c0_95] {strides = array<i32: 2, 1>} : memref<240x128xf32, #tpu.memory_space<vmem>>, vector<14x128xf32>
    %c14_96 = arith.constant 14 : index
    %c128_97 = arith.constant 128 : index
    %73 = vector.load %arg20[%c14_96, %c128_97] : memref<112x384xf32, #tpu.memory_space<vmem>>, vector<14x128xf32>
    tpu.vector_store %arg20[%c14_96, %c128_97], %72 {strides = array<i32>} : memref<112x384xf32, #tpu.memory_space<vmem>>, vector<14x128xf32>,
    %c32 = arith.constant 32 : index
    %c0_98 = arith.constant 0 : index
    %74 = tpu.strided_load %arg15[%c32, %c0_98] {strides = array<i32: 2, 1>} : memref<240x128xf32, #tpu.memory_space<vmem>>, vector<14x128xf32>
    %c14_99 = arith.constant 14 : index
    %c256_100 = arith.constant 256 : index
    %75 = vector.load %arg20[%c14_99, %c256_100] : memref<112x384xf32, #tpu.memory_space<vmem>>, vector<14x128xf32>
    tpu.vector_store %arg20[%c14_99, %c256_100], %74 {strides = array<i32>} : memref<112x384xf32, #tpu.memory_space<vmem>>, vector<14x128xf32>,
    %c60 = arith.constant 60 : index
    %c0_101 = arith.constant 0 : index
    %76 = tpu.strided_load %arg15[%c60, %c0_101] {strides = array<i32: 2, 1>} : memref<240x128xf32, #tpu.memory_space<vmem>>, vector<14x128xf32>
    %c28 = arith.constant 28 : index
    %c0_102 = arith.constant 0 : index
    %77 = vector.load %arg20[%c28, %c0_102] : memref<112x384xf32, #tpu.memory_space<vmem>>, vector<14x128xf32>
    tpu.vector_store %arg20[%c28, %c0_102], %76 {strides = array<i32>} : memref<112x384xf32, #tpu.memory_space<vmem>>, vector<14x128xf32>,
    %c61_103 = arith.constant 61 : index
    %c0_104 = arith.constant 0 : index
    %78 = tpu.strided_load %arg15[%c61_103, %c0_104] {strides = array<i32: 2, 1>} : memref<240x128xf32, #tpu.memory_space<vmem>>, vector<14x128xf32>
    %c28_105 = arith.constant 28 : index
    %c128_106 = arith.constant 128 : index
    %79 = vector.load %arg20[%c28_105, %c128_106] : memref<112x384xf32, #tpu.memory_space<vmem>>, vector<14x128xf32>
    tpu.vector_store %arg20[%c28_105, %c128_106], %78 {strides = array<i32>} : memref<112x384xf32, #tpu.memory_space<vmem>>, vector<14x128xf32>,
    %c62_107 = arith.constant 62 : index
    %c0_108 = arith.constant 0 : index
    %80 = tpu.strided_load %arg15[%c62_107, %c0_108] {strides = array<i32: 2, 1>} : memref<240x128xf32, #tpu.memory_space<vmem>>, vector<14x128xf32>
    %c28_109 = arith.constant 28 : index
    %c256_110 = arith.constant 256 : index
    %81 = vector.load %arg20[%c28_109, %c256_110] : memref<112x384xf32, #tpu.memory_space<vmem>>, vector<14x128xf32>
    tpu.vector_store %arg20[%c28_109, %c256_110], %80 {strides = array<i32>} : memref<112x384xf32, #tpu.memory_space<vmem>>, vector<14x128xf32>,
    %c90 = arith.constant 90 : index
    %c0_111 = arith.constant 0 : index
    %82 = tpu.strided_load %arg15[%c90, %c0_111] {strides = array<i32: 2, 1>} : memref<240x128xf32, #tpu.memory_space<vmem>>, vector<14x128xf32>
    %c42 = arith.constant 42 : index
    %c0_112 = arith.constant 0 : index
    %83 = vector.load %arg20[%c42, %c0_112] : memref<112x384xf32, #tpu.memory_space<vmem>>, vector<14x128xf32>
    tpu.vector_store %arg20[%c42, %c0_112], %82 {strides = array<i32>} : memref<112x384xf32, #tpu.memory_space<vmem>>, vector<14x128xf32>,
    %c91_113 = arith.constant 91 : index
    %c0_114 = arith.constant 0 : index
    %84 = tpu.strided_load %arg15[%c91_113, %c0_114] {strides = array<i32: 2, 1>} : memref<240x128xf32, #tpu.memory_space<vmem>>, vector<14x128xf32>
    %c42_115 = arith.constant 42 : index
    %c128_116 = arith.constant 128 : index
    %85 = vector.load %arg20[%c42_115, %c128_116] : memref<112x384xf32, #tpu.memory_space<vmem>>, vector<14x128xf32>
    tpu.vector_store %arg20[%c42_115, %c128_116], %84 {strides = array<i32>} : memref<112x384xf32, #tpu.memory_space<vmem>>, vector<14x128xf32>,
    %c92 = arith.constant 92 : index
    %c0_117 = arith.constant 0 : index
    %86 = tpu.strided_load %arg15[%c92, %c0_117] {strides = array<i32: 2, 1>} : memref<240x128xf32, #tpu.memory_space<vmem>>, vector<14x128xf32>
    %c42_118 = arith.constant 42 : index
    %c256_119 = arith.constant 256 : index
    %87 = vector.load %arg20[%c42_118, %c256_119] : memref<112x384xf32, #tpu.memory_space<vmem>>, vector<14x128xf32>
    tpu.vector_store %arg20[%c42_118, %c256_119], %86 {strides = array<i32>} : memref<112x384xf32, #tpu.memory_space<vmem>>, vector<14x128xf32>,
    %c120 = arith.constant 120 : index
    %c0_120 = arith.constant 0 : index
    %88 = tpu.strided_load %arg15[%c120, %c0_120] {strides = array<i32: 2, 1>} : memref<240x128xf32, #tpu.memory_space<vmem>>, vector<14x128xf32>
    %c56 = arith.constant 56 : index
    %c0_121 = arith.constant 0 : index
    %89 = vector.load %arg20[%c56, %c0_121] : memref<112x384xf32, #tpu.memory_space<vmem>>, vector<14x128xf32>
    tpu.vector_store %arg20[%c56, %c0_121], %88 {strides = array<i32>} : memref<112x384xf32, #tpu.memory_space<vmem>>, vector<14x128xf32>,
    %c121_122 = arith.constant 121 : index
    %c0_123 = arith.constant 0 : index
    %90 = tpu.strided_load %arg15[%c121_122, %c0_123] {strides = array<i32: 2, 1>} : memref<240x128xf32, #tpu.memory_space<vmem>>, vector<14x128xf32>
    %c56_124 = arith.constant 56 : index
    %c128_125 = arith.constant 128 : index
    %91 = vector.load %arg20[%c56_124, %c128_125] : memref<112x384xf32, #tpu.memory_space<vmem>>, vector<14x128xf32>
    tpu.vector_store %arg20[%c56_124, %c128_125], %90 {strides = array<i32>} : memref<112x384xf32, #tpu.memory_space<vmem>>, vector<14x128xf32>,
    %c122 = arith.constant 122 : index
    %c0_126 = arith.constant 0 : index
    %92 = tpu.strided_load %arg15[%c122, %c0_126] {strides = array<i32: 2, 1>} : memref<240x128xf32, #tpu.memory_space<vmem>>, vector<14x128xf32>
    %c56_127 = arith.constant 56 : index
    %c256_128 = arith.constant 256 : index
    %93 = vector.load %arg20[%c56_127, %c256_128] : memref<112x384xf32, #tpu.memory_space<vmem>>, vector<14x128xf32>
    tpu.vector_store %arg20[%c56_127, %c256_128], %92 {strides = array<i32>} : memref<112x384xf32, #tpu.memory_space<vmem>>, vector<14x128xf32>,
    %c150 = arith.constant 150 : index
    %c0_129 = arith.constant 0 : index
    %94 = tpu.strided_load %arg15[%c150, %c0_129] {strides = array<i32: 2, 1>} : memref<240x128xf32, #tpu.memory_space<vmem>>, vector<14x128xf32>
    %c70 = arith.constant 70 : index
    %c0_130 = arith.constant 0 : index
    %95 = vector.load %arg20[%c70, %c0_130] : memref<112x384xf32, #tpu.memory_space<vmem>>, vector<14x128xf32>
    tpu.vector_store %arg20[%c70, %c0_130], %94 {strides = array<i32>} : memref<112x384xf32, #tpu.memory_space<vmem>>, vector<14x128xf32>,
    %c151_131 = arith.constant 151 : index
    %c0_132 = arith.constant 0 : index
    %96 = tpu.strided_load %arg15[%c151_131, %c0_132] {strides = array<i32: 2, 1>} : memref<240x128xf32, #tpu.memory_space<vmem>>, vector<14x128xf32>
    %c70_133 = arith.constant 70 : index
    %c128_134 = arith.constant 128 : index
    %97 = vector.load %arg20[%c70_133, %c128_134] : memref<112x384xf32, #tpu.memory_space<vmem>>, vector<14x128xf32>
    tpu.vector_store %arg20[%c70_133, %c128_134], %96 {strides = array<i32>} : memref<112x384xf32, #tpu.memory_space<vmem>>, vector<14x128xf32>,
    %c152 = arith.constant 152 : index
    %c0_135 = arith.constant 0 : index
    %98 = tpu.strided_load %arg15[%c152, %c0_135] {strides = array<i32: 2, 1>} : memref<240x128xf32, #tpu.memory_space<vmem>>, vector<14x128xf32>
    %c70_136 = arith.constant 70 : index
    %c256_137 = arith.constant 256 : index
    %99 = vector.load %arg20[%c70_136, %c256_137] : memref<112x384xf32, #tpu.memory_space<vmem>>, vector<14x128xf32>
    tpu.vector_store %arg20[%c70_136, %c256_137], %98 {strides = array<i32>} : memref<112x384xf32, #tpu.memory_space<vmem>>, vector<14x128xf32>,
    %c180 = arith.constant 180 : index
    %c0_138 = arith.constant 0 : index
    %100 = tpu.strided_load %arg15[%c180, %c0_138] {strides = array<i32: 2, 1>} : memref<240x128xf32, #tpu.memory_space<vmem>>, vector<14x128xf32>
    %c84 = arith.constant 84 : index
    %c0_139 = arith.constant 0 : index
    %101 = vector.load %arg20[%c84, %c0_139] : memref<112x384xf32, #tpu.memory_space<vmem>>, vector<14x128xf32>
    tpu.vector_store %arg20[%c84, %c0_139], %100 {strides = array<i32>} : memref<112x384xf32, #tpu.memory_space<vmem>>, vector<14x128xf32>,
    %c181_140 = arith.constant 181 : index
    %c0_141 = arith.constant 0 : index
    %102 = tpu.strided_load %arg15[%c181_140, %c0_141] {strides = array<i32: 2, 1>} : memref<240x128xf32, #tpu.memory_space<vmem>>, vector<14x128xf32>
    %c84_142 = arith.constant 84 : index
    %c128_143 = arith.constant 128 : index
    %103 = vector.load %arg20[%c84_142, %c128_143] : memref<112x384xf32, #tpu.memory_space<vmem>>, vector<14x128xf32>
    tpu.vector_store %arg20[%c84_142, %c128_143], %102 {strides = array<i32>} : memref<112x384xf32, #tpu.memory_space<vmem>>, vector<14x128xf32>,
    %c182 = arith.constant 182 : index
    %c0_144 = arith.constant 0 : index
    %104 = tpu.strided_load %arg15[%c182, %c0_144] {strides = array<i32: 2, 1>} : memref<240x128xf32, #tpu.memory_space<vmem>>, vector<14x128xf32>
    %c84_145 = arith.constant 84 : index
    %c256_146 = arith.constant 256 : index
    %105 = vector.load %arg20[%c84_145, %c256_146] : memref<112x384xf32, #tpu.memory_space<vmem>>, vector<14x128xf32>
    tpu.vector_store %arg20[%c84_145, %c256_146], %104 {strides = array<i32>} : memref<112x384xf32, #tpu.memory_space<vmem>>, vector<14x128xf32>,
    %c210 = arith.constant 210 : index
    %c0_147 = arith.constant 0 : index
    %106 = tpu.strided_load %arg15[%c210, %c0_147] {strides = array<i32: 2, 1>} : memref<240x128xf32, #tpu.memory_space<vmem>>, vector<14x128xf32>
    %c98 = arith.constant 98 : index
    %c0_148 = arith.constant 0 : index
    %107 = vector.load %arg20[%c98, %c0_148] : memref<112x384xf32, #tpu.memory_space<vmem>>, vector<14x128xf32>
    tpu.vector_store %arg20[%c98, %c0_148], %106 {strides = array<i32>} : memref<112x384xf32, #tpu.memory_space<vmem>>, vector<14x128xf32>,
    %c211_149 = arith.constant 211 : index
    %c0_150 = arith.constant 0 : index
    %108 = tpu.strided_load %arg15[%c211_149, %c0_150] {strides = array<i32: 2, 1>} : memref<240x128xf32, #tpu.memory_space<vmem>>, vector<14x128xf32>
    %c98_151 = arith.constant 98 : index
    %c128_152 = arith.constant 128 : index
    %109 = vector.load %arg20[%c98_151, %c128_152] : memref<112x384xf32, #tpu.memory_space<vmem>>, vector<14x128xf32>
    tpu.vector_store %arg20[%c98_151, %c128_152], %108 {strides = array<i32>} : memref<112x384xf32, #tpu.memory_space<vmem>>, vector<14x128xf32>,
    %c212 = arith.constant 212 : index
    %c0_153 = arith.constant 0 : index
    %110 = tpu.strided_load %arg15[%c212, %c0_153] {strides = array<i32: 2, 1>} : memref<240x128xf32, #tpu.memory_space<vmem>>, vector<14x128xf32>
    %c98_154 = arith.constant 98 : index
    %c256_155 = arith.constant 256 : index
    %111 = vector.load %arg20[%c98_154, %c256_155] : memref<112x384xf32, #tpu.memory_space<vmem>>, vector<14x128xf32>
    tpu.vector_store %arg20[%c98_154, %c256_155], %110 {strides = array<i32>} : memref<112x384xf32, #tpu.memory_space<vmem>>, vector<14x128xf32>,
    %c0_156 = arith.constant 0 : index
    %c0_157 = arith.constant 0 : index
    %112 = vector.load %arg20[%c0_156, %c0_157] : memref<112x384xf32, #tpu.memory_space<vmem>>, vector<112x384xf32>
    %c0_158 = arith.constant 0 : index
    %c0_159 = arith.constant 0 : index
    %113 = vector.load %arg2[%c0_158, %c0_159] : memref<384x128xf32, #tpu.memory_space<vmem>>, vector<384x128xf32>
    %cst_160 = arith.constant dense<0.000000e+00> : vector<112x128xf32>
    %114 = tpu.matmul %112, %113, %cst_160 {dimension_numbers = #tpu.dot_dimension_numbers<[1], [0], [0], [1], [0, 0, 1, 1], [], []>} : vector<112x384xf32>, vector<384x128xf32>, vector<112x128xf32> -> vector<112x128xf32>
    %c0_161 = arith.constant 0 : index
    %c0_162 = arith.constant 0 : index
    %115 = vector.load %arg3[%c0_161, %c0_162] : memref<1x128xf32, #tpu.memory_space<vmem>>, vector<1x128xf32>
    %116 = vector.broadcast %115 : vector<1x128xf32> to vector<112x128xf32>
    %117 = arith.addf %114, %116 : vector<112x128xf32>
    %cst_163 = arith.constant 0.000000e+00 : f32
    %118 = vector.broadcast %cst_163 : f32 to vector<112x128xf32>
    %119 = arith.maximumf %117, %118 : vector<112x128xf32>
    %120 = vector.extract_strided_slice %119 {offsets = [0, 0], sizes = [14, 128], strides = [1, 1]} : vector<112x128xf32> to vector<14x128xf32>
    %c1_164 = arith.constant 1 : index
    %c0_165 = arith.constant 0 : index
    %121 = vector.load %arg16[%c1_164, %c0_165] : memref<128x128xf32, #tpu.memory_space<vmem>>, vector<14x128xf32>
    tpu.vector_store %arg16[%c1_164, %c0_165], %120 {strides = array<i32>} : memref<128x128xf32, #tpu.memory_space<vmem>>, vector<14x128xf32>,
    %122 = vector.extract_strided_slice %119 {offsets = [14, 0], sizes = [14, 128], strides = [1, 1]} : vector<112x128xf32> to vector<14x128xf32>
    %c17_166 = arith.constant 17 : index
    %c0_167 = arith.constant 0 : index
    %123 = vector.load %arg16[%c17_166, %c0_167] : memref<128x128xf32, #tpu.memory_space<vmem>>, vector<14x128xf32>
    tpu.vector_store %arg16[%c17_166, %c0_167], %122 {strides = array<i32>} : memref<128x128xf32, #tpu.memory_space<vmem>>, vector<14x128xf32>,
    %124 = vector.extract_strided_slice %119 {offsets = [28, 0], sizes = [14, 128], strides = [1, 1]} : vector<112x128xf32> to vector<14x128xf32>
    %c33 = arith.constant 33 : index
    %c0_168 = arith.constant 0 : index
    %125 = vector.load %arg16[%c33, %c0_168] : memref<128x128xf32, #tpu.memory_space<vmem>>, vector<14x128xf32>
    tpu.vector_store %arg16[%c33, %c0_168], %124 {strides = array<i32>} : memref<128x128xf32, #tpu.memory_space<vmem>>, vector<14x128xf32>,
    %126 = vector.extract_strided_slice %119 {offsets = [42, 0], sizes = [14, 128], strides = [1, 1]} : vector<112x128xf32> to vector<14x128xf32>
    %c49 = arith.constant 49 : index
    %c0_169 = arith.constant 0 : index
    %127 = vector.load %arg16[%c49, %c0_169] : memref<128x128xf32, #tpu.memory_space<vmem>>, vector<14x128xf32>
    tpu.vector_store %arg16[%c49, %c0_169], %126 {strides = array<i32>} : memref<128x128xf32, #tpu.memory_space<vmem>>, vector<14x128xf32>,
    %128 = vector.extract_strided_slice %119 {offsets = [56, 0], sizes = [14, 128], strides = [1, 1]} : vector<112x128xf32> to vector<14x128xf32>
    %c65 = arith.constant 65 : index
    %c0_170 = arith.constant 0 : index
    %129 = vector.load %arg16[%c65, %c0_170] : memref<128x128xf32, #tpu.memory_space<vmem>>, vector<14x128xf32>
    tpu.vector_store %arg16[%c65, %c0_170], %128 {strides = array<i32>} : memref<128x128xf32, #tpu.memory_space<vmem>>, vector<14x128xf32>,
    %130 = vector.extract_strided_slice %119 {offsets = [70, 0], sizes = [14, 128], strides = [1, 1]} : vector<112x128xf32> to vector<14x128xf32>
    %c81 = arith.constant 81 : index
    %c0_171 = arith.constant 0 : index
    %131 = vector.load %arg16[%c81, %c0_171] : memref<128x128xf32, #tpu.memory_space<vmem>>, vector<14x128xf32>
    tpu.vector_store %arg16[%c81, %c0_171], %130 {strides = array<i32>} : memref<128x128xf32, #tpu.memory_space<vmem>>, vector<14x128xf32>,
    %132 = vector.extract_strided_slice %119 {offsets = [84, 0], sizes = [14, 128], strides = [1, 1]} : vector<112x128xf32> to vector<14x128xf32>
    %c97 = arith.constant 97 : index
    %c0_172 = arith.constant 0 : index
    %133 = vector.load %arg16[%c97, %c0_172] : memref<128x128xf32, #tpu.memory_space<vmem>>, vector<14x128xf32>
    tpu.vector_store %arg16[%c97, %c0_172], %132 {strides = array<i32>} : memref<128x128xf32, #tpu.memory_space<vmem>>, vector<14x128xf32>,
    %134 = vector.extract_strided_slice %119 {offsets = [98, 0], sizes = [14, 128], strides = [1, 1]} : vector<112x128xf32> to vector<14x128xf32>
    %c113 = arith.constant 113 : index
    %c0_173 = arith.constant 0 : index
    %135 = vector.load %arg16[%c113, %c0_173] : memref<128x128xf32, #tpu.memory_space<vmem>>, vector<14x128xf32>
    tpu.vector_store %arg16[%c113, %c0_173], %134 {strides = array<i32>} : memref<128x128xf32, #tpu.memory_space<vmem>>, vector<14x128xf32>,
    %c0_174 = arith.constant 0 : index
    %c0_175 = arith.constant 0 : index
    %136 = tpu.strided_load %arg16[%c0_174, %c0_175] {strides = array<i32: 2, 1>} : memref<128x128xf32, #tpu.memory_space<vmem>>, vector<7x128xf32>
    %c0_176 = arith.constant 0 : index
    %c0_177 = arith.constant 0 : index
    %137 = vector.load %arg21[%c0_176, %c0_177] : memref<56x384xf32, #tpu.memory_space<vmem>>, vector<7x128xf32>
    tpu.vector_store %arg21[%c0_176, %c0_177], %136 {strides = array<i32>} : memref<56x384xf32, #tpu.memory_space<vmem>>, vector<7x128xf32>,
    %c1_178 = arith.constant 1 : index
    %c0_179 = arith.constant 0 : index
    %138 = tpu.strided_load %arg16[%c1_178, %c0_179] {strides = array<i32: 2, 1>} : memref<128x128xf32, #tpu.memory_space<vmem>>, vector<7x128xf32>
    %c0_180 = arith.constant 0 : index
    %c128_181 = arith.constant 128 : index
    %139 = vector.load %arg21[%c0_180, %c128_181] : memref<56x384xf32, #tpu.memory_space<vmem>>, vector<7x128xf32>
    tpu.vector_store %arg21[%c0_180, %c128_181], %138 {strides = array<i32>} : memref<56x384xf32, #tpu.memory_space<vmem>>, vector<7x128xf32>,
    %c2_182 = arith.constant 2 : index
    %c0_183 = arith.constant 0 : index
    %140 = tpu.strided_load %arg16[%c2_182, %c0_183] {strides = array<i32: 2, 1>} : memref<128x128xf32, #tpu.memory_space<vmem>>, vector<7x128xf32>
    %c0_184 = arith.constant 0 : index
    %c256_185 = arith.constant 256 : index
    %141 = vector.load %arg21[%c0_184, %c256_185] : memref<56x384xf32, #tpu.memory_space<vmem>>, vector<7x128xf32>
    tpu.vector_store %arg21[%c0_184, %c256_185], %140 {strides = array<i32>} : memref<56x384xf32, #tpu.memory_space<vmem>>, vector<7x128xf32>,
    %c16 = arith.constant 16 : index
    %c0_186 = arith.constant 0 : index
    %142 = tpu.strided_load %arg16[%c16, %c0_186] {strides = array<i32: 2, 1>} : memref<128x128xf32, #tpu.memory_space<vmem>>, vector<7x128xf32>
    %c7_187 = arith.constant 7 : index
    %c0_188 = arith.constant 0 : index
    %143 = vector.load %arg21[%c7_187, %c0_188] : memref<56x384xf32, #tpu.memory_space<vmem>>, vector<7x128xf32>
    tpu.vector_store %arg21[%c7_187, %c0_188], %142 {strides = array<i32>} : memref<56x384xf32, #tpu.memory_space<vmem>>, vector<7x128xf32>,
    %c17_189 = arith.constant 17 : index
    %c0_190 = arith.constant 0 : index
    %144 = tpu.strided_load %arg16[%c17_189, %c0_190] {strides = array<i32: 2, 1>} : memref<128x128xf32, #tpu.memory_space<vmem>>, vector<7x128xf32>
    %c7_191 = arith.constant 7 : index
    %c128_192 = arith.constant 128 : index
    %145 = vector.load %arg21[%c7_191, %c128_192] : memref<56x384xf32, #tpu.memory_space<vmem>>, vector<7x128xf32>
    tpu.vector_store %arg21[%c7_191, %c128_192], %144 {strides = array<i32>} : memref<56x384xf32, #tpu.memory_space<vmem>>, vector<7x128xf32>,
    %c18 = arith.constant 18 : index
    %c0_193 = arith.constant 0 : index
    %146 = tpu.strided_load %arg16[%c18, %c0_193] {strides = array<i32: 2, 1>} : memref<128x128xf32, #tpu.memory_space<vmem>>, vector<7x128xf32>
    %c7_194 = arith.constant 7 : index
    %c256_195 = arith.constant 256 : index
    %147 = vector.load %arg21[%c7_194, %c256_195] : memref<56x384xf32, #tpu.memory_space<vmem>>, vector<7x128xf32>
    tpu.vector_store %arg21[%c7_194, %c256_195], %146 {strides = array<i32>} : memref<56x384xf32, #tpu.memory_space<vmem>>, vector<7x128xf32>,
    %c32_196 = arith.constant 32 : index
    %c0_197 = arith.constant 0 : index
    %148 = tpu.strided_load %arg16[%c32_196, %c0_197] {strides = array<i32: 2, 1>} : memref<128x128xf32, #tpu.memory_space<vmem>>, vector<7x128xf32>
    %c14_198 = arith.constant 14 : index
    %c0_199 = arith.constant 0 : index
    %149 = vector.load %arg21[%c14_198, %c0_199] : memref<56x384xf32, #tpu.memory_space<vmem>>, vector<7x128xf32>
    tpu.vector_store %arg21[%c14_198, %c0_199], %148 {strides = array<i32>} : memref<56x384xf32, #tpu.memory_space<vmem>>, vector<7x128xf32>,
    %c33_200 = arith.constant 33 : index
    %c0_201 = arith.constant 0 : index
    %150 = tpu.strided_load %arg16[%c33_200, %c0_201] {strides = array<i32: 2, 1>} : memref<128x128xf32, #tpu.memory_space<vmem>>, vector<7x128xf32>
    %c14_202 = arith.constant 14 : index
    %c128_203 = arith.constant 128 : index
    %151 = vector.load %arg21[%c14_202, %c128_203] : memref<56x384xf32, #tpu.memory_space<vmem>>, vector<7x128xf32>
    tpu.vector_store %arg21[%c14_202, %c128_203], %150 {strides = array<i32>} : memref<56x384xf32, #tpu.memory_space<vmem>>, vector<7x128xf32>,
    %c34 = arith.constant 34 : index
    %c0_204 = arith.constant 0 : index
    %152 = tpu.strided_load %arg16[%c34, %c0_204] {strides = array<i32: 2, 1>} : memref<128x128xf32, #tpu.memory_space<vmem>>, vector<7x128xf32>
    %c14_205 = arith.constant 14 : index
    %c256_206 = arith.constant 256 : index
    %153 = vector.load %arg21[%c14_205, %c256_206] : memref<56x384xf32, #tpu.memory_space<vmem>>, vector<7x128xf32>
    tpu.vector_store %arg21[%c14_205, %c256_206], %152 {strides = array<i32>} : memref<56x384xf32, #tpu.memory_space<vmem>>, vector<7x128xf32>,
    %c48 = arith.constant 48 : index
    %c0_207 = arith.constant 0 : index
    %154 = tpu.strided_load %arg16[%c48, %c0_207] {strides = array<i32: 2, 1>} : memref<128x128xf32, #tpu.memory_space<vmem>>, vector<7x128xf32>
    %c21 = arith.constant 21 : index
    %c0_208 = arith.constant 0 : index
    %155 = vector.load %arg21[%c21, %c0_208] : memref<56x384xf32, #tpu.memory_space<vmem>>, vector<7x128xf32>
    tpu.vector_store %arg21[%c21, %c0_208], %154 {strides = array<i32>} : memref<56x384xf32, #tpu.memory_space<vmem>>, vector<7x128xf32>,
    %c49_209 = arith.constant 49 : index
    %c0_210 = arith.constant 0 : index
    %156 = tpu.strided_load %arg16[%c49_209, %c0_210] {strides = array<i32: 2, 1>} : memref<128x128xf32, #tpu.memory_space<vmem>>, vector<7x128xf32>
    %c21_211 = arith.constant 21 : index
    %c128_212 = arith.constant 128 : index
    %157 = vector.load %arg21[%c21_211, %c128_212] : memref<56x384xf32, #tpu.memory_space<vmem>>, vector<7x128xf32>
    tpu.vector_store %arg21[%c21_211, %c128_212], %156 {strides = array<i32>} : memref<56x384xf32, #tpu.memory_space<vmem>>, vector<7x128xf32>,
    %c50 = arith.constant 50 : index
    %c0_213 = arith.constant 0 : index
    %158 = tpu.strided_load %arg16[%c50, %c0_213] {strides = array<i32: 2, 1>} : memref<128x128xf32, #tpu.memory_space<vmem>>, vector<7x128xf32>
    %c21_214 = arith.constant 21 : index
    %c256_215 = arith.constant 256 : index
    %159 = vector.load %arg21[%c21_214, %c256_215] : memref<56x384xf32, #tpu.memory_space<vmem>>, vector<7x128xf32>
    tpu.vector_store %arg21[%c21_214, %c256_215], %158 {strides = array<i32>} : memref<56x384xf32, #tpu.memory_space<vmem>>, vector<7x128xf32>,
    %c64 = arith.constant 64 : index
    %c0_216 = arith.constant 0 : index
    %160 = tpu.strided_load %arg16[%c64, %c0_216] {strides = array<i32: 2, 1>} : memref<128x128xf32, #tpu.memory_space<vmem>>, vector<7x128xf32>
    %c28_217 = arith.constant 28 : index
    %c0_218 = arith.constant 0 : index
    %161 = vector.load %arg21[%c28_217, %c0_218] : memref<56x384xf32, #tpu.memory_space<vmem>>, vector<7x128xf32>
    tpu.vector_store %arg21[%c28_217, %c0_218], %160 {strides = array<i32>} : memref<56x384xf32, #tpu.memory_space<vmem>>, vector<7x128xf32>,
    %c65_219 = arith.constant 65 : index
    %c0_220 = arith.constant 0 : index
    %162 = tpu.strided_load %arg16[%c65_219, %c0_220] {strides = array<i32: 2, 1>} : memref<128x128xf32, #tpu.memory_space<vmem>>, vector<7x128xf32>
    %c28_221 = arith.constant 28 : index
    %c128_222 = arith.constant 128 : index
    %163 = vector.load %arg21[%c28_221, %c128_222] : memref<56x384xf32, #tpu.memory_space<vmem>>, vector<7x128xf32>
    tpu.vector_store %arg21[%c28_221, %c128_222], %162 {strides = array<i32>} : memref<56x384xf32, #tpu.memory_space<vmem>>, vector<7x128xf32>,
    %c66 = arith.constant 66 : index
    %c0_223 = arith.constant 0 : index
    %164 = tpu.strided_load %arg16[%c66, %c0_223] {strides = array<i32: 2, 1>} : memref<128x128xf32, #tpu.memory_space<vmem>>, vector<7x128xf32>
    %c28_224 = arith.constant 28 : index
    %c256_225 = arith.constant 256 : index
    %165 = vector.load %arg21[%c28_224, %c256_225] : memref<56x384xf32, #tpu.memory_space<vmem>>, vector<7x128xf32>
    tpu.vector_store %arg21[%c28_224, %c256_225], %164 {strides = array<i32>} : memref<56x384xf32, #tpu.memory_space<vmem>>, vector<7x128xf32>,
    %c80 = arith.constant 80 : index
    %c0_226 = arith.constant 0 : index
    %166 = tpu.strided_load %arg16[%c80, %c0_226] {strides = array<i32: 2, 1>} : memref<128x128xf32, #tpu.memory_space<vmem>>, vector<7x128xf32>
    %c35_227 = arith.constant 35 : index
    %c0_228 = arith.constant 0 : index
    %167 = vector.load %arg21[%c35_227, %c0_228] : memref<56x384xf32, #tpu.memory_space<vmem>>, vector<7x128xf32>
    tpu.vector_store %arg21[%c35_227, %c0_228], %166 {strides = array<i32>} : memref<56x384xf32, #tpu.memory_space<vmem>>, vector<7x128xf32>,
    %c81_229 = arith.constant 81 : index
    %c0_230 = arith.constant 0 : index
    %168 = tpu.strided_load %arg16[%c81_229, %c0_230] {strides = array<i32: 2, 1>} : memref<128x128xf32, #tpu.memory_space<vmem>>, vector<7x128xf32>
    %c35_231 = arith.constant 35 : index
    %c128_232 = arith.constant 128 : index
    %169 = vector.load %arg21[%c35_231, %c128_232] : memref<56x384xf32, #tpu.memory_space<vmem>>, vector<7x128xf32>
    tpu.vector_store %arg21[%c35_231, %c128_232], %168 {strides = array<i32>} : memref<56x384xf32, #tpu.memory_space<vmem>>, vector<7x128xf32>,
    %c82 = arith.constant 82 : index
    %c0_233 = arith.constant 0 : index
    %170 = tpu.strided_load %arg16[%c82, %c0_233] {strides = array<i32: 2, 1>} : memref<128x128xf32, #tpu.memory_space<vmem>>, vector<7x128xf32>
    %c35_234 = arith.constant 35 : index
    %c256_235 = arith.constant 256 : index
    %171 = vector.load %arg21[%c35_234, %c256_235] : memref<56x384xf32, #tpu.memory_space<vmem>>, vector<7x128xf32>
    tpu.vector_store %arg21[%c35_234, %c256_235], %170 {strides = array<i32>} : memref<56x384xf32, #tpu.memory_space<vmem>>, vector<7x128xf32>,
    %c96 = arith.constant 96 : index
    %c0_236 = arith.constant 0 : index
    %172 = tpu.strided_load %arg16[%c96, %c0_236] {strides = array<i32: 2, 1>} : memref<128x128xf32, #tpu.memory_space<vmem>>, vector<7x128xf32>
    %c42_237 = arith.constant 42 : index
    %c0_238 = arith.constant 0 : index
    %173 = vector.load %arg21[%c42_237, %c0_238] : memref<56x384xf32, #tpu.memory_space<vmem>>, vector<7x128xf32>
    tpu.vector_store %arg21[%c42_237, %c0_238], %172 {strides = array<i32>} : memref<56x384xf32, #tpu.memory_space<vmem>>, vector<7x128xf32>,
    %c97_239 = arith.constant 97 : index
    %c0_240 = arith.constant 0 : index
    %174 = tpu.strided_load %arg16[%c97_239, %c0_240] {strides = array<i32: 2, 1>} : memref<128x128xf32, #tpu.memory_space<vmem>>, vector<7x128xf32>
    %c42_241 = arith.constant 42 : index
    %c128_242 = arith.constant 128 : index
    %175 = vector.load %arg21[%c42_241, %c128_242] : memref<56x384xf32, #tpu.memory_space<vmem>>, vector<7x128xf32>
    tpu.vector_store %arg21[%c42_241, %c128_242], %174 {strides = array<i32>} : memref<56x384xf32, #tpu.memory_space<vmem>>, vector<7x128xf32>,
    %c98_243 = arith.constant 98 : index
    %c0_244 = arith.constant 0 : index
    %176 = tpu.strided_load %arg16[%c98_243, %c0_244] {strides = array<i32: 2, 1>} : memref<128x128xf32, #tpu.memory_space<vmem>>, vector<7x128xf32>
    %c42_245 = arith.constant 42 : index
    %c256_246 = arith.constant 256 : index
    %177 = vector.load %arg21[%c42_245, %c256_246] : memref<56x384xf32, #tpu.memory_space<vmem>>, vector<7x128xf32>
    tpu.vector_store %arg21[%c42_245, %c256_246], %176 {strides = array<i32>} : memref<56x384xf32, #tpu.memory_space<vmem>>, vector<7x128xf32>,
    %c112 = arith.constant 112 : index
    %c0_247 = arith.constant 0 : index
    %178 = tpu.strided_load %arg16[%c112, %c0_247] {strides = array<i32: 2, 1>} : memref<128x128xf32, #tpu.memory_space<vmem>>, vector<7x128xf32>
    %c49_248 = arith.constant 49 : index
    %c0_249 = arith.constant 0 : index
    %179 = vector.load %arg21[%c49_248, %c0_249] : memref<56x384xf32, #tpu.memory_space<vmem>>, vector<7x128xf32>
    tpu.vector_store %arg21[%c49_248, %c0_249], %178 {strides = array<i32>} : memref<56x384xf32, #tpu.memory_space<vmem>>, vector<7x128xf32>,
    %c113_250 = arith.constant 113 : index
    %c0_251 = arith.constant 0 : index
    %180 = tpu.strided_load %arg16[%c113_250, %c0_251] {strides = array<i32: 2, 1>} : memref<128x128xf32, #tpu.memory_space<vmem>>, vector<7x128xf32>
    %c49_252 = arith.constant 49 : index
    %c128_253 = arith.constant 128 : index
    %181 = vector.load %arg21[%c49_252, %c128_253] : memref<56x384xf32, #tpu.memory_space<vmem>>, vector<7x128xf32>
    tpu.vector_store %arg21[%c49_252, %c128_253], %180 {strides = array<i32>} : memref<56x384xf32, #tpu.memory_space<vmem>>, vector<7x128xf32>,
    %c114 = arith.constant 114 : index
    %c0_254 = arith.constant 0 : index
    %182 = tpu.strided_load %arg16[%c114, %c0_254] {strides = array<i32: 2, 1>} : memref<128x128xf32, #tpu.memory_space<vmem>>, vector<7x128xf32>
    %c49_255 = arith.constant 49 : index
    %c256_256 = arith.constant 256 : index
    %183 = vector.load %arg21[%c49_255, %c256_256] : memref<56x384xf32, #tpu.memory_space<vmem>>, vector<7x128xf32>
    tpu.vector_store %arg21[%c49_255, %c256_256], %182 {strides = array<i32>} : memref<56x384xf32, #tpu.memory_space<vmem>>, vector<7x128xf32>,
    %c0_257 = arith.constant 0 : index
    %c0_258 = arith.constant 0 : index
    %184 = vector.load %arg21[%c0_257, %c0_258] : memref<56x384xf32, #tpu.memory_space<vmem>>, vector<56x384xf32>
    %c0_259 = arith.constant 0 : index
    %c0_260 = arith.constant 0 : index
    %185 = vector.load %arg4[%c0_259, %c0_260] : memref<384x128xf32, #tpu.memory_space<vmem>>, vector<384x128xf32>
    %cst_261 = arith.constant dense<0.000000e+00> : vector<56x128xf32>
    %186 = tpu.matmul %184, %185, %cst_261 {dimension_numbers = #tpu.dot_dimension_numbers<[1], [0], [0], [1], [0, 0, 1, 1], [], []>} : vector<56x384xf32>, vector<384x128xf32>, vector<56x128xf32> -> vector<56x128xf32>
    %c0_262 = arith.constant 0 : index
    %c0_263 = arith.constant 0 : index
    %187 = vector.load %arg5[%c0_262, %c0_263] : memref<1x128xf32, #tpu.memory_space<vmem>>, vector<1x128xf32>
    %188 = vector.broadcast %187 : vector<1x128xf32> to vector<56x128xf32>
    %189 = arith.addf %186, %188 : vector<56x128xf32>
    %cst_264 = arith.constant 0.000000e+00 : f32
    %190 = vector.broadcast %cst_264 : f32 to vector<56x128xf32>
    %191 = arith.maximumf %189, %190 : vector<56x128xf32>
    %192 = vector.extract_strided_slice %191 {offsets = [0, 0], sizes = [7, 128], strides = [1, 1]} : vector<56x128xf32> to vector<7x128xf32>
    %c1_265 = arith.constant 1 : index
    %c0_266 = arith.constant 0 : index
    %193 = vector.load %arg17[%c1_265, %c0_266] : memref<72x128xf32, #tpu.memory_space<vmem>>, vector<7x128xf32>
    tpu.vector_store %arg17[%c1_265, %c0_266], %192 {strides = array<i32>} : memref<72x128xf32, #tpu.memory_space<vmem>>, vector<7x128xf32>,
    %194 = vector.extract_strided_slice %191 {offsets = [7, 0], sizes = [7, 128], strides = [1, 1]} : vector<56x128xf32> to vector<7x128xf32>
    %c10 = arith.constant 10 : index
    %c0_267 = arith.constant 0 : index
    %195 = vector.load %arg17[%c10, %c0_267] : memref<72x128xf32, #tpu.memory_space<vmem>>, vector<7x128xf32>
    tpu.vector_store %arg17[%c10, %c0_267], %194 {strides = array<i32>} : memref<72x128xf32, #tpu.memory_space<vmem>>, vector<7x128xf32>,
    %196 = vector.extract_strided_slice %191 {offsets = [14, 0], sizes = [7, 128], strides = [1, 1]} : vector<56x128xf32> to vector<7x128xf32>
    %c19 = arith.constant 19 : index
    %c0_268 = arith.constant 0 : index
    %197 = vector.load %arg17[%c19, %c0_268] : memref<72x128xf32, #tpu.memory_space<vmem>>, vector<7x128xf32>
    tpu.vector_store %arg17[%c19, %c0_268], %196 {strides = array<i32>} : memref<72x128xf32, #tpu.memory_space<vmem>>, vector<7x128xf32>,
    %198 = vector.extract_strided_slice %191 {offsets = [21, 0], sizes = [7, 128], strides = [1, 1]} : vector<56x128xf32> to vector<7x128xf32>
    %c28_269 = arith.constant 28 : index
    %c0_270 = arith.constant 0 : index
    %199 = vector.load %arg17[%c28_269, %c0_270] : memref<72x128xf32, #tpu.memory_space<vmem>>, vector<7x128xf32>
    tpu.vector_store %arg17[%c28_269, %c0_270], %198 {strides = array<i32>} : memref<72x128xf32, #tpu.memory_space<vmem>>, vector<7x128xf32>,
    %200 = vector.extract_strided_slice %191 {offsets = [28, 0], sizes = [7, 128], strides = [1, 1]} : vector<56x128xf32> to vector<7x128xf32>
    %c37 = arith.constant 37 : index
    %c0_271 = arith.constant 0 : index
    %201 = vector.load %arg17[%c37, %c0_271] : memref<72x128xf32, #tpu.memory_space<vmem>>, vector<7x128xf32>
    tpu.vector_store %arg17[%c37, %c0_271], %200 {strides = array<i32>} : memref<72x128xf32, #tpu.memory_space<vmem>>, vector<7x128xf32>,
    %202 = vector.extract_strided_slice %191 {offsets = [35, 0], sizes = [7, 128], strides = [1, 1]} : vector<56x128xf32> to vector<7x128xf32>
    %c46 = arith.constant 46 : index
    %c0_272 = arith.constant 0 : index
    %203 = vector.load %arg17[%c46, %c0_272] : memref<72x128xf32, #tpu.memory_space<vmem>>, vector<7x128xf32>
    tpu.vector_store %arg17[%c46, %c0_272], %202 {strides = array<i32>} : memref<72x128xf32, #tpu.memory_space<vmem>>, vector<7x128xf32>,
    %204 = vector.extract_strided_slice %191 {offsets = [42, 0], sizes = [7, 128], strides = [1, 1]} : vector<56x128xf32> to vector<7x128xf32>
    %c55 = arith.constant 55 : index
    %c0_273 = arith.constant 0 : index
    %205 = vector.load %arg17[%c55, %c0_273] : memref<72x128xf32, #tpu.memory_space<vmem>>, vector<7x128xf32>
    tpu.vector_store %arg17[%c55, %c0_273], %204 {strides = array<i32>} : memref<72x128xf32, #tpu.memory_space<vmem>>, vector<7x128xf32>,
    %206 = vector.extract_strided_slice %191 {offsets = [49, 0], sizes = [7, 128], strides = [1, 1]} : vector<56x128xf32> to vector<7x128xf32>
    %c64_274 = arith.constant 64 : index
    %c0_275 = arith.constant 0 : index
    %207 = vector.load %arg17[%c64_274, %c0_275] : memref<72x128xf32, #tpu.memory_space<vmem>>, vector<7x128xf32>
    tpu.vector_store %arg17[%c64_274, %c0_275], %206 {strides = array<i32>} : memref<72x128xf32, #tpu.memory_space<vmem>>, vector<7x128xf32>,
    %c0_276 = arith.constant 0 : index
    %c0_277 = arith.constant 0 : index
    %208 = tpu.strided_load %arg17[%c0_276, %c0_277] {strides = array<i32: 2, 1>} : memref<72x128xf32, #tpu.memory_space<vmem>>, vector<4x128xf32>
    %c0_278 = arith.constant 0 : index
    %c0_279 = arith.constant 0 : index
    %209 = vector.load %arg22[%c0_278, %c0_279] : memref<32x384xf32, #tpu.memory_space<vmem>>, vector<4x128xf32>
    tpu.vector_store %arg22[%c0_278, %c0_279], %208 {strides = array<i32>} : memref<32x384xf32, #tpu.memory_space<vmem>>, vector<4x128xf32>,
    %c1_280 = arith.constant 1 : index
    %c0_281 = arith.constant 0 : index
    %210 = tpu.strided_load %arg17[%c1_280, %c0_281] {strides = array<i32: 2, 1>} : memref<72x128xf32, #tpu.memory_space<vmem>>, vector<4x128xf32>
    %c0_282 = arith.constant 0 : index
    %c128_283 = arith.constant 128 : index
    %211 = vector.load %arg22[%c0_282, %c128_283] : memref<32x384xf32, #tpu.memory_space<vmem>>, vector<4x128xf32>
    tpu.vector_store %arg22[%c0_282, %c128_283], %210 {strides = array<i32>} : memref<32x384xf32, #tpu.memory_space<vmem>>, vector<4x128xf32>,
    %c2_284 = arith.constant 2 : index
    %c0_285 = arith.constant 0 : index
    %212 = tpu.strided_load %arg17[%c2_284, %c0_285] {strides = array<i32: 2, 1>} : memref<72x128xf32, #tpu.memory_space<vmem>>, vector<4x128xf32>
    %c0_286 = arith.constant 0 : index
    %c256_287 = arith.constant 256 : index
    %213 = vector.load %arg22[%c0_286, %c256_287] : memref<32x384xf32, #tpu.memory_space<vmem>>, vector<4x128xf32>
    tpu.vector_store %arg22[%c0_286, %c256_287], %212 {strides = array<i32>} : memref<32x384xf32, #tpu.memory_space<vmem>>, vector<4x128xf32>,
    %c9 = arith.constant 9 : index
    %c0_288 = arith.constant 0 : index
    %214 = tpu.strided_load %arg17[%c9, %c0_288] {strides = array<i32: 2, 1>} : memref<72x128xf32, #tpu.memory_space<vmem>>, vector<4x128xf32>
    %c4_289 = arith.constant 4 : index
    %c0_290 = arith.constant 0 : index
    %215 = vector.load %arg22[%c4_289, %c0_290] : memref<32x384xf32, #tpu.memory_space<vmem>>, vector<4x128xf32>
    tpu.vector_store %arg22[%c4_289, %c0_290], %214 {strides = array<i32>} : memref<32x384xf32, #tpu.memory_space<vmem>>, vector<4x128xf32>,
    %c10_291 = arith.constant 10 : index
    %c0_292 = arith.constant 0 : index
    %216 = tpu.strided_load %arg17[%c10_291, %c0_292] {strides = array<i32: 2, 1>} : memref<72x128xf32, #tpu.memory_space<vmem>>, vector<4x128xf32>
    %c4_293 = arith.constant 4 : index
    %c128_294 = arith.constant 128 : index
    %217 = vector.load %arg22[%c4_293, %c128_294] : memref<32x384xf32, #tpu.memory_space<vmem>>, vector<4x128xf32>
    tpu.vector_store %arg22[%c4_293, %c128_294], %216 {strides = array<i32>} : memref<32x384xf32, #tpu.memory_space<vmem>>, vector<4x128xf32>,
    %c11_295 = arith.constant 11 : index
    %c0_296 = arith.constant 0 : index
    %218 = tpu.strided_load %arg17[%c11_295, %c0_296] {strides = array<i32: 2, 1>} : memref<72x128xf32, #tpu.memory_space<vmem>>, vector<4x128xf32>
    %c4_297 = arith.constant 4 : index
    %c256_298 = arith.constant 256 : index
    %219 = vector.load %arg22[%c4_297, %c256_298] : memref<32x384xf32, #tpu.memory_space<vmem>>, vector<4x128xf32>
    tpu.vector_store %arg22[%c4_297, %c256_298], %218 {strides = array<i32>} : memref<32x384xf32, #tpu.memory_space<vmem>>, vector<4x128xf32>,
    %c18_299 = arith.constant 18 : index
    %c0_300 = arith.constant 0 : index
    %220 = tpu.strided_load %arg17[%c18_299, %c0_300] {strides = array<i32: 2, 1>} : memref<72x128xf32, #tpu.memory_space<vmem>>, vector<4x128xf32>
    %c8_301 = arith.constant 8 : index
    %c0_302 = arith.constant 0 : index
    %221 = vector.load %arg22[%c8_301, %c0_302] : memref<32x384xf32, #tpu.memory_space<vmem>>, vector<4x128xf32>
    tpu.vector_store %arg22[%c8_301, %c0_302], %220 {strides = array<i32>} : memref<32x384xf32, #tpu.memory_space<vmem>>, vector<4x128xf32>,
    %c19_303 = arith.constant 19 : index
    %c0_304 = arith.constant 0 : index
    %222 = tpu.strided_load %arg17[%c19_303, %c0_304] {strides = array<i32: 2, 1>} : memref<72x128xf32, #tpu.memory_space<vmem>>, vector<4x128xf32>
    %c8_305 = arith.constant 8 : index
    %c128_306 = arith.constant 128 : index
    %223 = vector.load %arg22[%c8_305, %c128_306] : memref<32x384xf32, #tpu.memory_space<vmem>>, vector<4x128xf32>
    tpu.vector_store %arg22[%c8_305, %c128_306], %222 {strides = array<i32>} : memref<32x384xf32, #tpu.memory_space<vmem>>, vector<4x128xf32>,
    %c20 = arith.constant 20 : index
    %c0_307 = arith.constant 0 : index
    %224 = tpu.strided_load %arg17[%c20, %c0_307] {strides = array<i32: 2, 1>} : memref<72x128xf32, #tpu.memory_space<vmem>>, vector<4x128xf32>
    %c8_308 = arith.constant 8 : index
    %c256_309 = arith.constant 256 : index
    %225 = vector.load %arg22[%c8_308, %c256_309] : memref<32x384xf32, #tpu.memory_space<vmem>>, vector<4x128xf32>
    tpu.vector_store %arg22[%c8_308, %c256_309], %224 {strides = array<i32>} : memref<32x384xf32, #tpu.memory_space<vmem>>, vector<4x128xf32>,
    %c27 = arith.constant 27 : index
    %c0_310 = arith.constant 0 : index
    %226 = tpu.strided_load %arg17[%c27, %c0_310] {strides = array<i32: 2, 1>} : memref<72x128xf32, #tpu.memory_space<vmem>>, vector<4x128xf32>
    %c12 = arith.constant 12 : index
    %c0_311 = arith.constant 0 : index
    %227 = vector.load %arg22[%c12, %c0_311] : memref<32x384xf32, #tpu.memory_space<vmem>>, vector<4x128xf32>
    tpu.vector_store %arg22[%c12, %c0_311], %226 {strides = array<i32>} : memref<32x384xf32, #tpu.memory_space<vmem>>, vector<4x128xf32>,
    %c28_312 = arith.constant 28 : index
    %c0_313 = arith.constant 0 : index
    %228 = tpu.strided_load %arg17[%c28_312, %c0_313] {strides = array<i32: 2, 1>} : memref<72x128xf32, #tpu.memory_space<vmem>>, vector<4x128xf32>
    %c12_314 = arith.constant 12 : index
    %c128_315 = arith.constant 128 : index
    %229 = vector.load %arg22[%c12_314, %c128_315] : memref<32x384xf32, #tpu.memory_space<vmem>>, vector<4x128xf32>
    tpu.vector_store %arg22[%c12_314, %c128_315], %228 {strides = array<i32>} : memref<32x384xf32, #tpu.memory_space<vmem>>, vector<4x128xf32>,
    %c29_316 = arith.constant 29 : index
    %c0_317 = arith.constant 0 : index
    %230 = tpu.strided_load %arg17[%c29_316, %c0_317] {strides = array<i32: 2, 1>} : memref<72x128xf32, #tpu.memory_space<vmem>>, vector<4x128xf32>
    %c12_318 = arith.constant 12 : index
    %c256_319 = arith.constant 256 : index
    %231 = vector.load %arg22[%c12_318, %c256_319] : memref<32x384xf32, #tpu.memory_space<vmem>>, vector<4x128xf32>
    tpu.vector_store %arg22[%c12_318, %c256_319], %230 {strides = array<i32>} : memref<32x384xf32, #tpu.memory_space<vmem>>, vector<4x128xf32>,
    %c36 = arith.constant 36 : index
    %c0_320 = arith.constant 0 : index
    %232 = tpu.strided_load %arg17[%c36, %c0_320] {strides = array<i32: 2, 1>} : memref<72x128xf32, #tpu.memory_space<vmem>>, vector<4x128xf32>
    %c16_321 = arith.constant 16 : index
    %c0_322 = arith.constant 0 : index
    %233 = vector.load %arg22[%c16_321, %c0_322] : memref<32x384xf32, #tpu.memory_space<vmem>>, vector<4x128xf32>
    tpu.vector_store %arg22[%c16_321, %c0_322], %232 {strides = array<i32>} : memref<32x384xf32, #tpu.memory_space<vmem>>, vector<4x128xf32>,
    %c37_323 = arith.constant 37 : index
    %c0_324 = arith.constant 0 : index
    %234 = tpu.strided_load %arg17[%c37_323, %c0_324] {strides = array<i32: 2, 1>} : memref<72x128xf32, #tpu.memory_space<vmem>>, vector<4x128xf32>
    %c16_325 = arith.constant 16 : index
    %c128_326 = arith.constant 128 : index
    %235 = vector.load %arg22[%c16_325, %c128_326] : memref<32x384xf32, #tpu.memory_space<vmem>>, vector<4x128xf32>
    tpu.vector_store %arg22[%c16_325, %c128_326], %234 {strides = array<i32>} : memref<32x384xf32, #tpu.memory_space<vmem>>, vector<4x128xf32>,
    %c38 = arith.constant 38 : index
    %c0_327 = arith.constant 0 : index
    %236 = tpu.strided_load %arg17[%c38, %c0_327] {strides = array<i32: 2, 1>} : memref<72x128xf32, #tpu.memory_space<vmem>>, vector<4x128xf32>
    %c16_328 = arith.constant 16 : index
    %c256_329 = arith.constant 256 : index
    %237 = vector.load %arg22[%c16_328, %c256_329] : memref<32x384xf32, #tpu.memory_space<vmem>>, vector<4x128xf32>
    tpu.vector_store %arg22[%c16_328, %c256_329], %236 {strides = array<i32>} : memref<32x384xf32, #tpu.memory_space<vmem>>, vector<4x128xf32>,
    %c45 = arith.constant 45 : index
    %c0_330 = arith.constant 0 : index
    %238 = tpu.strided_load %arg17[%c45, %c0_330] {strides = array<i32: 2, 1>} : memref<72x128xf32, #tpu.memory_space<vmem>>, vector<4x128xf32>
    %c20_331 = arith.constant 20 : index
    %c0_332 = arith.constant 0 : index
    %239 = vector.load %arg22[%c20_331, %c0_332] : memref<32x384xf32, #tpu.memory_space<vmem>>, vector<4x128xf32>
    tpu.vector_store %arg22[%c20_331, %c0_332], %238 {strides = array<i32>} : memref<32x384xf32, #tpu.memory_space<vmem>>, vector<4x128xf32>,
    %c46_333 = arith.constant 46 : index
    %c0_334 = arith.constant 0 : index
    %240 = tpu.strided_load %arg17[%c46_333, %c0_334] {strides = array<i32: 2, 1>} : memref<72x128xf32, #tpu.memory_space<vmem>>, vector<4x128xf32>
    %c20_335 = arith.constant 20 : index
    %c128_336 = arith.constant 128 : index
    %241 = vector.load %arg22[%c20_335, %c128_336] : memref<32x384xf32, #tpu.memory_space<vmem>>, vector<4x128xf32>
    tpu.vector_store %arg22[%c20_335, %c128_336], %240 {strides = array<i32>} : memref<32x384xf32, #tpu.memory_space<vmem>>, vector<4x128xf32>,
    %c47_337 = arith.constant 47 : index
    %c0_338 = arith.constant 0 : index
    %242 = tpu.strided_load %arg17[%c47_337, %c0_338] {strides = array<i32: 2, 1>} : memref<72x128xf32, #tpu.memory_space<vmem>>, vector<4x128xf32>
    %c20_339 = arith.constant 20 : index
    %c256_340 = arith.constant 256 : index
    %243 = vector.load %arg22[%c20_339, %c256_340] : memref<32x384xf32, #tpu.memory_space<vmem>>, vector<4x128xf32>
    tpu.vector_store %arg22[%c20_339, %c256_340], %242 {strides = array<i32>} : memref<32x384xf32, #tpu.memory_space<vmem>>, vector<4x128xf32>,
    %c54 = arith.constant 54 : index
    %c0_341 = arith.constant 0 : index
    %244 = tpu.strided_load %arg17[%c54, %c0_341] {strides = array<i32: 2, 1>} : memref<72x128xf32, #tpu.memory_space<vmem>>, vector<4x128xf32>
    %c24 = arith.constant 24 : index
    %c0_342 = arith.constant 0 : index
    %245 = vector.load %arg22[%c24, %c0_342] : memref<32x384xf32, #tpu.memory_space<vmem>>, vector<4x128xf32>
    tpu.vector_store %arg22[%c24, %c0_342], %244 {strides = array<i32>} : memref<32x384xf32, #tpu.memory_space<vmem>>, vector<4x128xf32>,
    %c55_343 = arith.constant 55 : index
    %c0_344 = arith.constant 0 : index
    %246 = tpu.strided_load %arg17[%c55_343, %c0_344] {strides = array<i32: 2, 1>} : memref<72x128xf32, #tpu.memory_space<vmem>>, vector<4x128xf32>
    %c24_345 = arith.constant 24 : index
    %c128_346 = arith.constant 128 : index
    %247 = vector.load %arg22[%c24_345, %c128_346] : memref<32x384xf32, #tpu.memory_space<vmem>>, vector<4x128xf32>
    tpu.vector_store %arg22[%c24_345, %c128_346], %246 {strides = array<i32>} : memref<32x384xf32, #tpu.memory_space<vmem>>, vector<4x128xf32>,
    %c56_347 = arith.constant 56 : index
    %c0_348 = arith.constant 0 : index
    %248 = tpu.strided_load %arg17[%c56_347, %c0_348] {strides = array<i32: 2, 1>} : memref<72x128xf32, #tpu.memory_space<vmem>>, vector<4x128xf32>
    %c24_349 = arith.constant 24 : index
    %c256_350 = arith.constant 256 : index
    %249 = vector.load %arg22[%c24_349, %c256_350] : memref<32x384xf32, #tpu.memory_space<vmem>>, vector<4x128xf32>
    tpu.vector_store %arg22[%c24_349, %c256_350], %248 {strides = array<i32>} : memref<32x384xf32, #tpu.memory_space<vmem>>, vector<4x128xf32>,
    %c63_351 = arith.constant 63 : index
    %c0_352 = arith.constant 0 : index
    %250 = tpu.strided_load %arg17[%c63_351, %c0_352] {strides = array<i32: 2, 1>} : memref<72x128xf32, #tpu.memory_space<vmem>>, vector<4x128xf32>
    %c28_353 = arith.constant 28 : index
    %c0_354 = arith.constant 0 : index
    %251 = vector.load %arg22[%c28_353, %c0_354] : memref<32x384xf32, #tpu.memory_space<vmem>>, vector<4x128xf32>
    tpu.vector_store %arg22[%c28_353, %c0_354], %250 {strides = array<i32>} : memref<32x384xf32, #tpu.memory_space<vmem>>, vector<4x128xf32>,
    %c64_355 = arith.constant 64 : index
    %c0_356 = arith.constant 0 : index
    %252 = tpu.strided_load %arg17[%c64_355, %c0_356] {strides = array<i32: 2, 1>} : memref<72x128xf32, #tpu.memory_space<vmem>>, vector<4x128xf32>
    %c28_357 = arith.constant 28 : index
    %c128_358 = arith.constant 128 : index
    %253 = vector.load %arg22[%c28_357, %c128_358] : memref<32x384xf32, #tpu.memory_space<vmem>>, vector<4x128xf32>
    tpu.vector_store %arg22[%c28_357, %c128_358], %252 {strides = array<i32>} : memref<32x384xf32, #tpu.memory_space<vmem>>, vector<4x128xf32>,
    %c65_359 = arith.constant 65 : index
    %c0_360 = arith.constant 0 : index
    %254 = tpu.strided_load %arg17[%c65_359, %c0_360] {strides = array<i32: 2, 1>} : memref<72x128xf32, #tpu.memory_space<vmem>>, vector<4x128xf32>
    %c28_361 = arith.constant 28 : index
    %c256_362 = arith.constant 256 : index
    %255 = vector.load %arg22[%c28_361, %c256_362] : memref<32x384xf32, #tpu.memory_space<vmem>>, vector<4x128xf32>
    tpu.vector_store %arg22[%c28_361, %c256_362], %254 {strides = array<i32>} : memref<32x384xf32, #tpu.memory_space<vmem>>, vector<4x128xf32>,
    %c0_363 = arith.constant 0 : index
    %c0_364 = arith.constant 0 : index
    %256 = vector.load %arg22[%c0_363, %c0_364] : memref<32x384xf32, #tpu.memory_space<vmem>>, vector<32x384xf32>
    %c0_365 = arith.constant 0 : index
    %c0_366 = arith.constant 0 : index
    %257 = vector.load %arg6[%c0_365, %c0_366] : memref<384x128xf32, #tpu.memory_space<vmem>>, vector<384x128xf32>
    %cst_367 = arith.constant dense<0.000000e+00> : vector<32x128xf32>
    %258 = tpu.matmul %256, %257, %cst_367 {dimension_numbers = #tpu.dot_dimension_numbers<[1], [0], [0], [1], [0, 0, 1, 1], [], []>} : vector<32x384xf32>, vector<384x128xf32>, vector<32x128xf32> -> vector<32x128xf32>
    %c0_368 = arith.constant 0 : index
    %c0_369 = arith.constant 0 : index
    %259 = vector.load %arg7[%c0_368, %c0_369] : memref<1x128xf32, #tpu.memory_space<vmem>>, vector<1x128xf32>
    %260 = vector.broadcast %259 : vector<1x128xf32> to vector<32x128xf32>
    %261 = arith.addf %258, %260 : vector<32x128xf32>
    %cst_370 = arith.constant 0.000000e+00 : f32
    %262 = vector.broadcast %cst_370 : f32 to vector<32x128xf32>
    %263 = arith.maximumf %261, %262 : vector<32x128xf32>
    %264 = vector.extract_strided_slice %263 {offsets = [0, 0], sizes = [4, 128], strides = [1, 1]} : vector<32x128xf32> to vector<4x128xf32>
    %c1_371 = arith.constant 1 : index
    %c0_372 = arith.constant 0 : index
    %265 = vector.load %arg18[%c1_371, %c0_372] : memref<48x128xf32, #tpu.memory_space<vmem>>, vector<4x128xf32>
    tpu.vector_store %arg18[%c1_371, %c0_372], %264 {strides = array<i32>} : memref<48x128xf32, #tpu.memory_space<vmem>>, vector<4x128xf32>,
    %266 = vector.extract_strided_slice %263 {offsets = [4, 0], sizes = [4, 128], strides = [1, 1]} : vector<32x128xf32> to vector<4x128xf32>
    %c7_373 = arith.constant 7 : index
    %c0_374 = arith.constant 0 : index
    %267 = vector.load %arg18[%c7_373, %c0_374] : memref<48x128xf32, #tpu.memory_space<vmem>>, vector<4x128xf32>
    tpu.vector_store %arg18[%c7_373, %c0_374], %266 {strides = array<i32>} : memref<48x128xf32, #tpu.memory_space<vmem>>, vector<4x128xf32>,
    %268 = vector.extract_strided_slice %263 {offsets = [8, 0], sizes = [4, 128], strides = [1, 1]} : vector<32x128xf32> to vector<4x128xf32>
    %c13 = arith.constant 13 : index
    %c0_375 = arith.constant 0 : index
    %269 = vector.load %arg18[%c13, %c0_375] : memref<48x128xf32, #tpu.memory_space<vmem>>, vector<4x128xf32>
    tpu.vector_store %arg18[%c13, %c0_375], %268 {strides = array<i32>} : memref<48x128xf32, #tpu.memory_space<vmem>>, vector<4x128xf32>,
    %270 = vector.extract_strided_slice %263 {offsets = [12, 0], sizes = [4, 128], strides = [1, 1]} : vector<32x128xf32> to vector<4x128xf32>
    %c19_376 = arith.constant 19 : index
    %c0_377 = arith.constant 0 : index
    %271 = vector.load %arg18[%c19_376, %c0_377] : memref<48x128xf32, #tpu.memory_space<vmem>>, vector<4x128xf32>
    tpu.vector_store %arg18[%c19_376, %c0_377], %270 {strides = array<i32>} : memref<48x128xf32, #tpu.memory_space<vmem>>, vector<4x128xf32>,
    %272 = vector.extract_strided_slice %263 {offsets = [16, 0], sizes = [4, 128], strides = [1, 1]} : vector<32x128xf32> to vector<4x128xf32>
    %c25 = arith.constant 25 : index
    %c0_378 = arith.constant 0 : index
    %273 = vector.load %arg18[%c25, %c0_378] : memref<48x128xf32, #tpu.memory_space<vmem>>, vector<4x128xf32>
    tpu.vector_store %arg18[%c25, %c0_378], %272 {strides = array<i32>} : memref<48x128xf32, #tpu.memory_space<vmem>>, vector<4x128xf32>,
    %274 = vector.extract_strided_slice %263 {offsets = [20, 0], sizes = [4, 128], strides = [1, 1]} : vector<32x128xf32> to vector<4x128xf32>
    %c31_379 = arith.constant 31 : index
    %c0_380 = arith.constant 0 : index
    %275 = vector.load %arg18[%c31_379, %c0_380] : memref<48x128xf32, #tpu.memory_space<vmem>>, vector<4x128xf32>
    tpu.vector_store %arg18[%c31_379, %c0_380], %274 {strides = array<i32>} : memref<48x128xf32, #tpu.memory_space<vmem>>, vector<4x128xf32>,
    %276 = vector.extract_strided_slice %263 {offsets = [24, 0], sizes = [4, 128], strides = [1, 1]} : vector<32x128xf32> to vector<4x128xf32>
    %c37_381 = arith.constant 37 : index
    %c0_382 = arith.constant 0 : index
    %277 = vector.load %arg18[%c37_381, %c0_382] : memref<48x128xf32, #tpu.memory_space<vmem>>, vector<4x128xf32>
    tpu.vector_store %arg18[%c37_381, %c0_382], %276 {strides = array<i32>} : memref<48x128xf32, #tpu.memory_space<vmem>>, vector<4x128xf32>,
    %278 = vector.extract_strided_slice %263 {offsets = [28, 0], sizes = [4, 128], strides = [1, 1]} : vector<32x128xf32> to vector<4x128xf32>
    %c43 = arith.constant 43 : index
    %c0_383 = arith.constant 0 : index
    %279 = vector.load %arg18[%c43, %c0_383] : memref<48x128xf32, #tpu.memory_space<vmem>>, vector<4x128xf32>
    tpu.vector_store %arg18[%c43, %c0_383], %278 {strides = array<i32>} : memref<48x128xf32, #tpu.memory_space<vmem>>, vector<4x128xf32>,
    %c0_384 = arith.constant 0 : index
    %c0_385 = arith.constant 0 : index
    %280 = vector.load %arg18[%c0_384, %c0_385] : memref<48x128xf32, #tpu.memory_space<vmem>>, vector<4x128xf32>
    %c0_386 = arith.constant 0 : index
    %c0_387 = arith.constant 0 : index
    %281 = vector.load %arg23[%c0_386, %c0_387] : memref<32x384xf32, #tpu.memory_space<vmem>>, vector<4x128xf32>
    tpu.vector_store %arg23[%c0_386, %c0_387], %280 {strides = array<i32>} : memref<32x384xf32, #tpu.memory_space<vmem>>, vector<4x128xf32>,
    %c1_388 = arith.constant 1 : index
    %c0_389 = arith.constant 0 : index
    %282 = vector.load %arg18[%c1_388, %c0_389] : memref<48x128xf32, #tpu.memory_space<vmem>>, vector<4x128xf32>
    %c0_390 = arith.constant 0 : index
    %c128_391 = arith.constant 128 : index
    %283 = vector.load %arg23[%c0_390, %c128_391] : memref<32x384xf32, #tpu.memory_space<vmem>>, vector<4x128xf32>
    tpu.vector_store %arg23[%c0_390, %c128_391], %282 {strides = array<i32>} : memref<32x384xf32, #tpu.memory_space<vmem>>, vector<4x128xf32>,
    %c2_392 = arith.constant 2 : index
    %c0_393 = arith.constant 0 : index
    %284 = vector.load %arg18[%c2_392, %c0_393] : memref<48x128xf32, #tpu.memory_space<vmem>>, vector<4x128xf32>
    %c0_394 = arith.constant 0 : index
    %c256_395 = arith.constant 256 : index
    %285 = vector.load %arg23[%c0_394, %c256_395] : memref<32x384xf32, #tpu.memory_space<vmem>>, vector<4x128xf32>
    tpu.vector_store %arg23[%c0_394, %c256_395], %284 {strides = array<i32>} : memref<32x384xf32, #tpu.memory_space<vmem>>, vector<4x128xf32>,
    %c6_396 = arith.constant 6 : index
    %c0_397 = arith.constant 0 : index
    %286 = vector.load %arg18[%c6_396, %c0_397] : memref<48x128xf32, #tpu.memory_space<vmem>>, vector<4x128xf32>
    %c4_398 = arith.constant 4 : index
    %c0_399 = arith.constant 0 : index
    %287 = vector.load %arg23[%c4_398, %c0_399] : memref<32x384xf32, #tpu.memory_space<vmem>>, vector<4x128xf32>
    tpu.vector_store %arg23[%c4_398, %c0_399], %286 {strides = array<i32>} : memref<32x384xf32, #tpu.memory_space<vmem>>, vector<4x128xf32>,
    %c7_400 = arith.constant 7 : index
    %c0_401 = arith.constant 0 : index
    %288 = vector.load %arg18[%c7_400, %c0_401] : memref<48x128xf32, #tpu.memory_space<vmem>>, vector<4x128xf32>
    %c4_402 = arith.constant 4 : index
    %c128_403 = arith.constant 128 : index
    %289 = vector.load %arg23[%c4_402, %c128_403] : memref<32x384xf32, #tpu.memory_space<vmem>>, vector<4x128xf32>
    tpu.vector_store %arg23[%c4_402, %c128_403], %288 {strides = array<i32>} : memref<32x384xf32, #tpu.memory_space<vmem>>, vector<4x128xf32>,
    %c8_404 = arith.constant 8 : index
    %c0_405 = arith.constant 0 : index
    %290 = vector.load %arg18[%c8_404, %c0_405] : memref<48x128xf32, #tpu.memory_space<vmem>>, vector<4x128xf32>
    %c4_406 = arith.constant 4 : index
    %c256_407 = arith.constant 256 : index
    %291 = vector.load %arg23[%c4_406, %c256_407] : memref<32x384xf32, #tpu.memory_space<vmem>>, vector<4x128xf32>
    tpu.vector_store %arg23[%c4_406, %c256_407], %290 {strides = array<i32>} : memref<32x384xf32, #tpu.memory_space<vmem>>, vector<4x128xf32>,
    %c12_408 = arith.constant 12 : index
    %c0_409 = arith.constant 0 : index
    %292 = vector.load %arg18[%c12_408, %c0_409] : memref<48x128xf32, #tpu.memory_space<vmem>>, vector<4x128xf32>
    %c8_410 = arith.constant 8 : index
    %c0_411 = arith.constant 0 : index
    %293 = vector.load %arg23[%c8_410, %c0_411] : memref<32x384xf32, #tpu.memory_space<vmem>>, vector<4x128xf32>
    tpu.vector_store %arg23[%c8_410, %c0_411], %292 {strides = array<i32>} : memref<32x384xf32, #tpu.memory_space<vmem>>, vector<4x128xf32>,
    %c13_412 = arith.constant 13 : index
    %c0_413 = arith.constant 0 : index
    %294 = vector.load %arg18[%c13_412, %c0_413] : memref<48x128xf32, #tpu.memory_space<vmem>>, vector<4x128xf32>
    %c8_414 = arith.constant 8 : index
    %c128_415 = arith.constant 128 : index
    %295 = vector.load %arg23[%c8_414, %c128_415] : memref<32x384xf32, #tpu.memory_space<vmem>>, vector<4x128xf32>
    tpu.vector_store %arg23[%c8_414, %c128_415], %294 {strides = array<i32>} : memref<32x384xf32, #tpu.memory_space<vmem>>, vector<4x128xf32>,
    %c14_416 = arith.constant 14 : index
    %c0_417 = arith.constant 0 : index
    %296 = vector.load %arg18[%c14_416, %c0_417] : memref<48x128xf32, #tpu.memory_space<vmem>>, vector<4x128xf32>
    %c8_418 = arith.constant 8 : index
    %c256_419 = arith.constant 256 : index
    %297 = vector.load %arg23[%c8_418, %c256_419] : memref<32x384xf32, #tpu.memory_space<vmem>>, vector<4x128xf32>
    tpu.vector_store %arg23[%c8_418, %c256_419], %296 {strides = array<i32>} : memref<32x384xf32, #tpu.memory_space<vmem>>, vector<4x128xf32>,
    %c18_420 = arith.constant 18 : index
    %c0_421 = arith.constant 0 : index
    %298 = vector.load %arg18[%c18_420, %c0_421] : memref<48x128xf32, #tpu.memory_space<vmem>>, vector<4x128xf32>
    %c12_422 = arith.constant 12 : index
    %c0_423 = arith.constant 0 : index
    %299 = vector.load %arg23[%c12_422, %c0_423] : memref<32x384xf32, #tpu.memory_space<vmem>>, vector<4x128xf32>
    tpu.vector_store %arg23[%c12_422, %c0_423], %298 {strides = array<i32>} : memref<32x384xf32, #tpu.memory_space<vmem>>, vector<4x128xf32>,
    %c19_424 = arith.constant 19 : index
    %c0_425 = arith.constant 0 : index
    %300 = vector.load %arg18[%c19_424, %c0_425] : memref<48x128xf32, #tpu.memory_space<vmem>>, vector<4x128xf32>
    %c12_426 = arith.constant 12 : index
    %c128_427 = arith.constant 128 : index
    %301 = vector.load %arg23[%c12_426, %c128_427] : memref<32x384xf32, #tpu.memory_space<vmem>>, vector<4x128xf32>
    tpu.vector_store %arg23[%c12_426, %c128_427], %300 {strides = array<i32>} : memref<32x384xf32, #tpu.memory_space<vmem>>, vector<4x128xf32>,
    %c20_428 = arith.constant 20 : index
    %c0_429 = arith.constant 0 : index
    %302 = vector.load %arg18[%c20_428, %c0_429] : memref<48x128xf32, #tpu.memory_space<vmem>>, vector<4x128xf32>
    %c12_430 = arith.constant 12 : index
    %c256_431 = arith.constant 256 : index
    %303 = vector.load %arg23[%c12_430, %c256_431] : memref<32x384xf32, #tpu.memory_space<vmem>>, vector<4x128xf32>
    tpu.vector_store %arg23[%c12_430, %c256_431], %302 {strides = array<i32>} : memref<32x384xf32, #tpu.memory_space<vmem>>, vector<4x128xf32>,
    %c24_432 = arith.constant 24 : index
    %c0_433 = arith.constant 0 : index
    %304 = vector.load %arg18[%c24_432, %c0_433] : memref<48x128xf32, #tpu.memory_space<vmem>>, vector<4x128xf32>
    %c16_434 = arith.constant 16 : index
    %c0_435 = arith.constant 0 : index
    %305 = vector.load %arg23[%c16_434, %c0_435] : memref<32x384xf32, #tpu.memory_space<vmem>>, vector<4x128xf32>
    tpu.vector_store %arg23[%c16_434, %c0_435], %304 {strides = array<i32>} : memref<32x384xf32, #tpu.memory_space<vmem>>, vector<4x128xf32>,
    %c25_436 = arith.constant 25 : index
    %c0_437 = arith.constant 0 : index
    %306 = vector.load %arg18[%c25_436, %c0_437] : memref<48x128xf32, #tpu.memory_space<vmem>>, vector<4x128xf32>
    %c16_438 = arith.constant 16 : index
    %c128_439 = arith.constant 128 : index
    %307 = vector.load %arg23[%c16_438, %c128_439] : memref<32x384xf32, #tpu.memory_space<vmem>>, vector<4x128xf32>
    tpu.vector_store %arg23[%c16_438, %c128_439], %306 {strides = array<i32>} : memref<32x384xf32, #tpu.memory_space<vmem>>, vector<4x128xf32>,
    %c26_440 = arith.constant 26 : index
    %c0_441 = arith.constant 0 : index
    %308 = vector.load %arg18[%c26_440, %c0_441] : memref<48x128xf32, #tpu.memory_space<vmem>>, vector<4x128xf32>
    %c16_442 = arith.constant 16 : index
    %c256_443 = arith.constant 256 : index
    %309 = vector.load %arg23[%c16_442, %c256_443] : memref<32x384xf32, #tpu.memory_space<vmem>>, vector<4x128xf32>
    tpu.vector_store %arg23[%c16_442, %c256_443], %308 {strides = array<i32>} : memref<32x384xf32, #tpu.memory_space<vmem>>, vector<4x128xf32>,
    %c30_444 = arith.constant 30 : index
    %c0_445 = arith.constant 0 : index
    %310 = vector.load %arg18[%c30_444, %c0_445] : memref<48x128xf32, #tpu.memory_space<vmem>>, vector<4x128xf32>
    %c20_446 = arith.constant 20 : index
    %c0_447 = arith.constant 0 : index
    %311 = vector.load %arg23[%c20_446, %c0_447] : memref<32x384xf32, #tpu.memory_space<vmem>>, vector<4x128xf32>
    tpu.vector_store %arg23[%c20_446, %c0_447], %310 {strides = array<i32>} : memref<32x384xf32, #tpu.memory_space<vmem>>, vector<4x128xf32>,
    %c31_448 = arith.constant 31 : index
    %c0_449 = arith.constant 0 : index
    %312 = vector.load %arg18[%c31_448, %c0_449] : memref<48x128xf32, #tpu.memory_space<vmem>>, vector<4x128xf32>
    %c20_450 = arith.constant 20 : index
    %c128_451 = arith.constant 128 : index
    %313 = vector.load %arg23[%c20_450, %c128_451] : memref<32x384xf32, #tpu.memory_space<vmem>>, vector<4x128xf32>
    tpu.vector_store %arg23[%c20_450, %c128_451], %312 {strides = array<i32>} : memref<32x384xf32, #tpu.memory_space<vmem>>, vector<4x128xf32>,
    %c32_452 = arith.constant 32 : index
    %c0_453 = arith.constant 0 : index
    %314 = vector.load %arg18[%c32_452, %c0_453] : memref<48x128xf32, #tpu.memory_space<vmem>>, vector<4x128xf32>
    %c20_454 = arith.constant 20 : index
    %c256_455 = arith.constant 256 : index
    %315 = vector.load %arg23[%c20_454, %c256_455] : memref<32x384xf32, #tpu.memory_space<vmem>>, vector<4x128xf32>
    tpu.vector_store %arg23[%c20_454, %c256_455], %314 {strides = array<i32>} : memref<32x384xf32, #tpu.memory_space<vmem>>, vector<4x128xf32>,
    %c36_456 = arith.constant 36 : index
    %c0_457 = arith.constant 0 : index
    %316 = vector.load %arg18[%c36_456, %c0_457] : memref<48x128xf32, #tpu.memory_space<vmem>>, vector<4x128xf32>
    %c24_458 = arith.constant 24 : index
    %c0_459 = arith.constant 0 : index
    %317 = vector.load %arg23[%c24_458, %c0_459] : memref<32x384xf32, #tpu.memory_space<vmem>>, vector<4x128xf32>
    tpu.vector_store %arg23[%c24_458, %c0_459], %316 {strides = array<i32>} : memref<32x384xf32, #tpu.memory_space<vmem>>, vector<4x128xf32>,
    %c37_460 = arith.constant 37 : index
    %c0_461 = arith.constant 0 : index
    %318 = vector.load %arg18[%c37_460, %c0_461] : memref<48x128xf32, #tpu.memory_space<vmem>>, vector<4x128xf32>
    %c24_462 = arith.constant 24 : index
    %c128_463 = arith.constant 128 : index
    %319 = vector.load %arg23[%c24_462, %c128_463] : memref<32x384xf32, #tpu.memory_space<vmem>>, vector<4x128xf32>
    tpu.vector_store %arg23[%c24_462, %c128_463], %318 {strides = array<i32>} : memref<32x384xf32, #tpu.memory_space<vmem>>, vector<4x128xf32>,
    %c38_464 = arith.constant 38 : index
    %c0_465 = arith.constant 0 : index
    %320 = vector.load %arg18[%c38_464, %c0_465] : memref<48x128xf32, #tpu.memory_space<vmem>>, vector<4x128xf32>
    %c24_466 = arith.constant 24 : index
    %c256_467 = arith.constant 256 : index
    %321 = vector.load %arg23[%c24_466, %c256_467] : memref<32x384xf32, #tpu.memory_space<vmem>>, vector<4x128xf32>
    tpu.vector_store %arg23[%c24_466, %c256_467], %320 {strides = array<i32>} : memref<32x384xf32, #tpu.memory_space<vmem>>, vector<4x128xf32>,
    %c42_468 = arith.constant 42 : index
    %c0_469 = arith.constant 0 : index
    %322 = vector.load %arg18[%c42_468, %c0_469] : memref<48x128xf32, #tpu.memory_space<vmem>>, vector<4x128xf32>
    %c28_470 = arith.constant 28 : index
    %c0_471 = arith.constant 0 : index
    %323 = vector.load %arg23[%c28_470, %c0_471] : memref<32x384xf32, #tpu.memory_space<vmem>>, vector<4x128xf32>
    tpu.vector_store %arg23[%c28_470, %c0_471], %322 {strides = array<i32>} : memref<32x384xf32, #tpu.memory_space<vmem>>, vector<4x128xf32>,
    %c43_472 = arith.constant 43 : index
    %c0_473 = arith.constant 0 : index
    %324 = vector.load %arg18[%c43_472, %c0_473] : memref<48x128xf32, #tpu.memory_space<vmem>>, vector<4x128xf32>
    %c28_474 = arith.constant 28 : index
    %c128_475 = arith.constant 128 : index
    %325 = vector.load %arg23[%c28_474, %c128_475] : memref<32x384xf32, #tpu.memory_space<vmem>>, vector<4x128xf32>
    tpu.vector_store %arg23[%c28_474, %c128_475], %324 {strides = array<i32>} : memref<32x384xf32, #tpu.memory_space<vmem>>, vector<4x128xf32>,
    %c44_476 = arith.constant 44 : index
    %c0_477 = arith.constant 0 : index
    %326 = vector.load %arg18[%c44_476, %c0_477] : memref<48x128xf32, #tpu.memory_space<vmem>>, vector<4x128xf32>
    %c28_478 = arith.constant 28 : index
    %c256_479 = arith.constant 256 : index
    %327 = vector.load %arg23[%c28_478, %c256_479] : memref<32x384xf32, #tpu.memory_space<vmem>>, vector<4x128xf32>
    tpu.vector_store %arg23[%c28_478, %c256_479], %326 {strides = array<i32>} : memref<32x384xf32, #tpu.memory_space<vmem>>, vector<4x128xf32>,
    %c0_480 = arith.constant 0 : index
    %c0_481 = arith.constant 0 : index
    %328 = vector.load %arg23[%c0_480, %c0_481] : memref<32x384xf32, #tpu.memory_space<vmem>>, vector<32x384xf32>
    %c0_482 = arith.constant 0 : index
    %c0_483 = arith.constant 0 : index
    %329 = vector.load %arg8[%c0_482, %c0_483] : memref<384x128xf32, #tpu.memory_space<vmem>>, vector<384x128xf32>
    %cst_484 = arith.constant dense<0.000000e+00> : vector<32x128xf32>
    %330 = tpu.matmul %328, %329, %cst_484 {dimension_numbers = #tpu.dot_dimension_numbers<[1], [0], [0], [1], [0, 0, 1, 1], [], []>} : vector<32x384xf32>, vector<384x128xf32>, vector<32x128xf32> -> vector<32x128xf32>
    %c0_485 = arith.constant 0 : index
    %c0_486 = arith.constant 0 : index
    %331 = vector.load %arg9[%c0_485, %c0_486] : memref<1x128xf32, #tpu.memory_space<vmem>>, vector<1x128xf32>
    %332 = vector.broadcast %331 : vector<1x128xf32> to vector<32x128xf32>
    %333 = arith.addf %330, %332 : vector<32x128xf32>
    %cst_487 = arith.constant 0.000000e+00 : f32
    %334 = vector.broadcast %cst_487 : f32 to vector<32x128xf32>
    %335 = arith.maximumf %333, %334 : vector<32x128xf32>
    %336 = vector.extract_strided_slice %335 {offsets = [0, 0], sizes = [4, 128], strides = [1, 1]} : vector<32x128xf32> to vector<4x128xf32>
    %c1_488 = arith.constant 1 : index
    %c0_489 = arith.constant 0 : index
    %337 = vector.load %arg19[%c1_488, %c0_489] : memref<48x128xf32, #tpu.memory_space<vmem>>, vector<4x128xf32>
    tpu.vector_store %arg19[%c1_488, %c0_489], %336 {strides = array<i32>} : memref<48x128xf32, #tpu.memory_space<vmem>>, vector<4x128xf32>,
    %338 = vector.extract_strided_slice %335 {offsets = [4, 0], sizes = [4, 128], strides = [1, 1]} : vector<32x128xf32> to vector<4x128xf32>
    %c7_490 = arith.constant 7 : index
    %c0_491 = arith.constant 0 : index
    %339 = vector.load %arg19[%c7_490, %c0_491] : memref<48x128xf32, #tpu.memory_space<vmem>>, vector<4x128xf32>
    tpu.vector_store %arg19[%c7_490, %c0_491], %338 {strides = array<i32>} : memref<48x128xf32, #tpu.memory_space<vmem>>, vector<4x128xf32>,
    %340 = vector.extract_strided_slice %335 {offsets = [8, 0], sizes = [4, 128], strides = [1, 1]} : vector<32x128xf32> to vector<4x128xf32>
    %c13_492 = arith.constant 13 : index
    %c0_493 = arith.constant 0 : index
    %341 = vector.load %arg19[%c13_492, %c0_493] : memref<48x128xf32, #tpu.memory_space<vmem>>, vector<4x128xf32>
    tpu.vector_store %arg19[%c13_492, %c0_493], %340 {strides = array<i32>} : memref<48x128xf32, #tpu.memory_space<vmem>>, vector<4x128xf32>,
    %342 = vector.extract_strided_slice %335 {offsets = [12, 0], sizes = [4, 128], strides = [1, 1]} : vector<32x128xf32> to vector<4x128xf32>
    %c19_494 = arith.constant 19 : index
    %c0_495 = arith.constant 0 : index
    %343 = vector.load %arg19[%c19_494, %c0_495] : memref<48x128xf32, #tpu.memory_space<vmem>>, vector<4x128xf32>
    tpu.vector_store %arg19[%c19_494, %c0_495], %342 {strides = array<i32>} : memref<48x128xf32, #tpu.memory_space<vmem>>, vector<4x128xf32>,
    %344 = vector.extract_strided_slice %335 {offsets = [16, 0], sizes = [4, 128], strides = [1, 1]} : vector<32x128xf32> to vector<4x128xf32>
    %c25_496 = arith.constant 25 : index
    %c0_497 = arith.constant 0 : index
    %345 = vector.load %arg19[%c25_496, %c0_497] : memref<48x128xf32, #tpu.memory_space<vmem>>, vector<4x128xf32>
    tpu.vector_store %arg19[%c25_496, %c0_497], %344 {strides = array<i32>} : memref<48x128xf32, #tpu.memory_space<vmem>>, vector<4x128xf32>,
    %346 = vector.extract_strided_slice %335 {offsets = [20, 0], sizes = [4, 128], strides = [1, 1]} : vector<32x128xf32> to vector<4x128xf32>
    %c31_498 = arith.constant 31 : index
    %c0_499 = arith.constant 0 : index
    %347 = vector.load %arg19[%c31_498, %c0_499] : memref<48x128xf32, #tpu.memory_space<vmem>>, vector<4x128xf32>
    tpu.vector_store %arg19[%c31_498, %c0_499], %346 {strides = array<i32>} : memref<48x128xf32, #tpu.memory_space<vmem>>, vector<4x128xf32>,
    %348 = vector.extract_strided_slice %335 {offsets = [24, 0], sizes = [4, 128], strides = [1, 1]} : vector<32x128xf32> to vector<4x128xf32>
    %c37_500 = arith.constant 37 : index
    %c0_501 = arith.constant 0 : index
    %349 = vector.load %arg19[%c37_500, %c0_501] : memref<48x128xf32, #tpu.memory_space<vmem>>, vector<4x128xf32>
    tpu.vector_store %arg19[%c37_500, %c0_501], %348 {strides = array<i32>} : memref<48x128xf32, #tpu.memory_space<vmem>>, vector<4x128xf32>,
    %350 = vector.extract_strided_slice %335 {offsets = [28, 0], sizes = [4, 128], strides = [1, 1]} : vector<32x128xf32> to vector<4x128xf32>
    %c43_502 = arith.constant 43 : index
    %c0_503 = arith.constant 0 : index
    %351 = vector.load %arg19[%c43_502, %c0_503] : memref<48x128xf32, #tpu.memory_space<vmem>>, vector<4x128xf32>
    tpu.vector_store %arg19[%c43_502, %c0_503], %350 {strides = array<i32>} : memref<48x128xf32, #tpu.memory_space<vmem>>, vector<4x128xf32>,
    %c0_504 = arith.constant 0 : index
    %c0_505 = arith.constant 0 : index
    %352 = vector.load %arg19[%c0_504, %c0_505] : memref<48x128xf32, #tpu.memory_space<vmem>>, vector<4x128xf32>
    %c0_506 = arith.constant 0 : index
    %c0_507 = arith.constant 0 : index
    %353 = vector.load %arg24[%c0_506, %c0_507] : memref<32x384xf32, #tpu.memory_space<vmem>>, vector<4x128xf32>
    tpu.vector_store %arg24[%c0_506, %c0_507], %352 {strides = array<i32>} : memref<32x384xf32, #tpu.memory_space<vmem>>, vector<4x128xf32>,
    %c1_508 = arith.constant 1 : index
    %c0_509 = arith.constant 0 : index
    %354 = vector.load %arg19[%c1_508, %c0_509] : memref<48x128xf32, #tpu.memory_space<vmem>>, vector<4x128xf32>
    %c0_510 = arith.constant 0 : index
    %c128_511 = arith.constant 128 : index
    %355 = vector.load %arg24[%c0_510, %c128_511] : memref<32x384xf32, #tpu.memory_space<vmem>>, vector<4x128xf32>
    tpu.vector_store %arg24[%c0_510, %c128_511], %354 {strides = array<i32>} : memref<32x384xf32, #tpu.memory_space<vmem>>, vector<4x128xf32>,
    %c2_512 = arith.constant 2 : index
    %c0_513 = arith.constant 0 : index
    %356 = vector.load %arg19[%c2_512, %c0_513] : memref<48x128xf32, #tpu.memory_space<vmem>>, vector<4x128xf32>
    %c0_514 = arith.constant 0 : index
    %c256_515 = arith.constant 256 : index
    %357 = vector.load %arg24[%c0_514, %c256_515] : memref<32x384xf32, #tpu.memory_space<vmem>>, vector<4x128xf32>
    tpu.vector_store %arg24[%c0_514, %c256_515], %356 {strides = array<i32>} : memref<32x384xf32, #tpu.memory_space<vmem>>, vector<4x128xf32>,
    %c6_516 = arith.constant 6 : index
    %c0_517 = arith.constant 0 : index
    %358 = vector.load %arg19[%c6_516, %c0_517] : memref<48x128xf32, #tpu.memory_space<vmem>>, vector<4x128xf32>
    %c4_518 = arith.constant 4 : index
    %c0_519 = arith.constant 0 : index
    %359 = vector.load %arg24[%c4_518, %c0_519] : memref<32x384xf32, #tpu.memory_space<vmem>>, vector<4x128xf32>
    tpu.vector_store %arg24[%c4_518, %c0_519], %358 {strides = array<i32>} : memref<32x384xf32, #tpu.memory_space<vmem>>, vector<4x128xf32>,
    %c7_520 = arith.constant 7 : index
    %c0_521 = arith.constant 0 : index
    %360 = vector.load %arg19[%c7_520, %c0_521] : memref<48x128xf32, #tpu.memory_space<vmem>>, vector<4x128xf32>
    %c4_522 = arith.constant 4 : index
    %c128_523 = arith.constant 128 : index
    %361 = vector.load %arg24[%c4_522, %c128_523] : memref<32x384xf32, #tpu.memory_space<vmem>>, vector<4x128xf32>
    tpu.vector_store %arg24[%c4_522, %c128_523], %360 {strides = array<i32>} : memref<32x384xf32, #tpu.memory_space<vmem>>, vector<4x128xf32>,
    %c8_524 = arith.constant 8 : index
    %c0_525 = arith.constant 0 : index
    %362 = vector.load %arg19[%c8_524, %c0_525] : memref<48x128xf32, #tpu.memory_space<vmem>>, vector<4x128xf32>
    %c4_526 = arith.constant 4 : index
    %c256_527 = arith.constant 256 : index
    %363 = vector.load %arg24[%c4_526, %c256_527] : memref<32x384xf32, #tpu.memory_space<vmem>>, vector<4x128xf32>
    tpu.vector_store %arg24[%c4_526, %c256_527], %362 {strides = array<i32>} : memref<32x384xf32, #tpu.memory_space<vmem>>, vector<4x128xf32>,
    %c12_528 = arith.constant 12 : index
    %c0_529 = arith.constant 0 : index
    %364 = vector.load %arg19[%c12_528, %c0_529] : memref<48x128xf32, #tpu.memory_space<vmem>>, vector<4x128xf32>
    %c8_530 = arith.constant 8 : index
    %c0_531 = arith.constant 0 : index
    %365 = vector.load %arg24[%c8_530, %c0_531] : memref<32x384xf32, #tpu.memory_space<vmem>>, vector<4x128xf32>
    tpu.vector_store %arg24[%c8_530, %c0_531], %364 {strides = array<i32>} : memref<32x384xf32, #tpu.memory_space<vmem>>, vector<4x128xf32>,
    %c13_532 = arith.constant 13 : index
    %c0_533 = arith.constant 0 : index
    %366 = vector.load %arg19[%c13_532, %c0_533] : memref<48x128xf32, #tpu.memory_space<vmem>>, vector<4x128xf32>
    %c8_534 = arith.constant 8 : index
    %c128_535 = arith.constant 128 : index
    %367 = vector.load %arg24[%c8_534, %c128_535] : memref<32x384xf32, #tpu.memory_space<vmem>>, vector<4x128xf32>
    tpu.vector_store %arg24[%c8_534, %c128_535], %366 {strides = array<i32>} : memref<32x384xf32, #tpu.memory_space<vmem>>, vector<4x128xf32>,
    %c14_536 = arith.constant 14 : index
    %c0_537 = arith.constant 0 : index
    %368 = vector.load %arg19[%c14_536, %c0_537] : memref<48x128xf32, #tpu.memory_space<vmem>>, vector<4x128xf32>
    %c8_538 = arith.constant 8 : index
    %c256_539 = arith.constant 256 : index
    %369 = vector.load %arg24[%c8_538, %c256_539] : memref<32x384xf32, #tpu.memory_space<vmem>>, vector<4x128xf32>
    tpu.vector_store %arg24[%c8_538, %c256_539], %368 {strides = array<i32>} : memref<32x384xf32, #tpu.memory_space<vmem>>, vector<4x128xf32>,
    %c18_540 = arith.constant 18 : index
    %c0_541 = arith.constant 0 : index
    %370 = vector.load %arg19[%c18_540, %c0_541] : memref<48x128xf32, #tpu.memory_space<vmem>>, vector<4x128xf32>
    %c12_542 = arith.constant 12 : index
    %c0_543 = arith.constant 0 : index
    %371 = vector.load %arg24[%c12_542, %c0_543] : memref<32x384xf32, #tpu.memory_space<vmem>>, vector<4x128xf32>
    tpu.vector_store %arg24[%c12_542, %c0_543], %370 {strides = array<i32>} : memref<32x384xf32, #tpu.memory_space<vmem>>, vector<4x128xf32>,
    %c19_544 = arith.constant 19 : index
    %c0_545 = arith.constant 0 : index
    %372 = vector.load %arg19[%c19_544, %c0_545] : memref<48x128xf32, #tpu.memory_space<vmem>>, vector<4x128xf32>
    %c12_546 = arith.constant 12 : index
    %c128_547 = arith.constant 128 : index
    %373 = vector.load %arg24[%c12_546, %c128_547] : memref<32x384xf32, #tpu.memory_space<vmem>>, vector<4x128xf32>
    tpu.vector_store %arg24[%c12_546, %c128_547], %372 {strides = array<i32>} : memref<32x384xf32, #tpu.memory_space<vmem>>, vector<4x128xf32>,
    %c20_548 = arith.constant 20 : index
    %c0_549 = arith.constant 0 : index
    %374 = vector.load %arg19[%c20_548, %c0_549] : memref<48x128xf32, #tpu.memory_space<vmem>>, vector<4x128xf32>
    %c12_550 = arith.constant 12 : index
    %c256_551 = arith.constant 256 : index
    %375 = vector.load %arg24[%c12_550, %c256_551] : memref<32x384xf32, #tpu.memory_space<vmem>>, vector<4x128xf32>
    tpu.vector_store %arg24[%c12_550, %c256_551], %374 {strides = array<i32>} : memref<32x384xf32, #tpu.memory_space<vmem>>, vector<4x128xf32>,
    %c24_552 = arith.constant 24 : index
    %c0_553 = arith.constant 0 : index
    %376 = vector.load %arg19[%c24_552, %c0_553] : memref<48x128xf32, #tpu.memory_space<vmem>>, vector<4x128xf32>
    %c16_554 = arith.constant 16 : index
    %c0_555 = arith.constant 0 : index
    %377 = vector.load %arg24[%c16_554, %c0_555] : memref<32x384xf32, #tpu.memory_space<vmem>>, vector<4x128xf32>
    tpu.vector_store %arg24[%c16_554, %c0_555], %376 {strides = array<i32>} : memref<32x384xf32, #tpu.memory_space<vmem>>, vector<4x128xf32>,
    %c25_556 = arith.constant 25 : index
    %c0_557 = arith.constant 0 : index
    %378 = vector.load %arg19[%c25_556, %c0_557] : memref<48x128xf32, #tpu.memory_space<vmem>>, vector<4x128xf32>
    %c16_558 = arith.constant 16 : index
    %c128_559 = arith.constant 128 : index
    %379 = vector.load %arg24[%c16_558, %c128_559] : memref<32x384xf32, #tpu.memory_space<vmem>>, vector<4x128xf32>
    tpu.vector_store %arg24[%c16_558, %c128_559], %378 {strides = array<i32>} : memref<32x384xf32, #tpu.memory_space<vmem>>, vector<4x128xf32>,
    %c26_560 = arith.constant 26 : index
    %c0_561 = arith.constant 0 : index
    %380 = vector.load %arg19[%c26_560, %c0_561] : memref<48x128xf32, #tpu.memory_space<vmem>>, vector<4x128xf32>
    %c16_562 = arith.constant 16 : index
    %c256_563 = arith.constant 256 : index
    %381 = vector.load %arg24[%c16_562, %c256_563] : memref<32x384xf32, #tpu.memory_space<vmem>>, vector<4x128xf32>
    tpu.vector_store %arg24[%c16_562, %c256_563], %380 {strides = array<i32>} : memref<32x384xf32, #tpu.memory_space<vmem>>, vector<4x128xf32>,
    %c30_564 = arith.constant 30 : index
    %c0_565 = arith.constant 0 : index
    %382 = vector.load %arg19[%c30_564, %c0_565] : memref<48x128xf32, #tpu.memory_space<vmem>>, vector<4x128xf32>
    %c20_566 = arith.constant 20 : index
    %c0_567 = arith.constant 0 : index
    %383 = vector.load %arg24[%c20_566, %c0_567] : memref<32x384xf32, #tpu.memory_space<vmem>>, vector<4x128xf32>
    tpu.vector_store %arg24[%c20_566, %c0_567], %382 {strides = array<i32>} : memref<32x384xf32, #tpu.memory_space<vmem>>, vector<4x128xf32>,
    %c31_568 = arith.constant 31 : index
    %c0_569 = arith.constant 0 : index
    %384 = vector.load %arg19[%c31_568, %c0_569] : memref<48x128xf32, #tpu.memory_space<vmem>>, vector<4x128xf32>
    %c20_570 = arith.constant 20 : index
    %c128_571 = arith.constant 128 : index
    %385 = vector.load %arg24[%c20_570, %c128_571] : memref<32x384xf32, #tpu.memory_space<vmem>>, vector<4x128xf32>
    tpu.vector_store %arg24[%c20_570, %c128_571], %384 {strides = array<i32>} : memref<32x384xf32, #tpu.memory_space<vmem>>, vector<4x128xf32>,
    %c32_572 = arith.constant 32 : index
    %c0_573 = arith.constant 0 : index
    %386 = vector.load %arg19[%c32_572, %c0_573] : memref<48x128xf32, #tpu.memory_space<vmem>>, vector<4x128xf32>
    %c20_574 = arith.constant 20 : index
    %c256_575 = arith.constant 256 : index
    %387 = vector.load %arg24[%c20_574, %c256_575] : memref<32x384xf32, #tpu.memory_space<vmem>>, vector<4x128xf32>
    tpu.vector_store %arg24[%c20_574, %c256_575], %386 {strides = array<i32>} : memref<32x384xf32, #tpu.memory_space<vmem>>, vector<4x128xf32>,
    %c36_576 = arith.constant 36 : index
    %c0_577 = arith.constant 0 : index
    %388 = vector.load %arg19[%c36_576, %c0_577] : memref<48x128xf32, #tpu.memory_space<vmem>>, vector<4x128xf32>
    %c24_578 = arith.constant 24 : index
    %c0_579 = arith.constant 0 : index
    %389 = vector.load %arg24[%c24_578, %c0_579] : memref<32x384xf32, #tpu.memory_space<vmem>>, vector<4x128xf32>
    tpu.vector_store %arg24[%c24_578, %c0_579], %388 {strides = array<i32>} : memref<32x384xf32, #tpu.memory_space<vmem>>, vector<4x128xf32>,
    %c37_580 = arith.constant 37 : index
    %c0_581 = arith.constant 0 : index
    %390 = vector.load %arg19[%c37_580, %c0_581] : memref<48x128xf32, #tpu.memory_space<vmem>>, vector<4x128xf32>
    %c24_582 = arith.constant 24 : index
    %c128_583 = arith.constant 128 : index
    %391 = vector.load %arg24[%c24_582, %c128_583] : memref<32x384xf32, #tpu.memory_space<vmem>>, vector<4x128xf32>
    tpu.vector_store %arg24[%c24_582, %c128_583], %390 {strides = array<i32>} : memref<32x384xf32, #tpu.memory_space<vmem>>, vector<4x128xf32>,
    %c38_584 = arith.constant 38 : index
    %c0_585 = arith.constant 0 : index
    %392 = vector.load %arg19[%c38_584, %c0_585] : memref<48x128xf32, #tpu.memory_space<vmem>>, vector<4x128xf32>
    %c24_586 = arith.constant 24 : index
    %c256_587 = arith.constant 256 : index
    %393 = vector.load %arg24[%c24_586, %c256_587] : memref<32x384xf32, #tpu.memory_space<vmem>>, vector<4x128xf32>
    tpu.vector_store %arg24[%c24_586, %c256_587], %392 {strides = array<i32>} : memref<32x384xf32, #tpu.memory_space<vmem>>, vector<4x128xf32>,
    %c42_588 = arith.constant 42 : index
    %c0_589 = arith.constant 0 : index
    %394 = vector.load %arg19[%c42_588, %c0_589] : memref<48x128xf32, #tpu.memory_space<vmem>>, vector<4x128xf32>
    %c28_590 = arith.constant 28 : index
    %c0_591 = arith.constant 0 : index
    %395 = vector.load %arg24[%c28_590, %c0_591] : memref<32x384xf32, #tpu.memory_space<vmem>>, vector<4x128xf32>
    tpu.vector_store %arg24[%c28_590, %c0_591], %394 {strides = array<i32>} : memref<32x384xf32, #tpu.memory_space<vmem>>, vector<4x128xf32>,
    %c43_592 = arith.constant 43 : index
    %c0_593 = arith.constant 0 : index
    %396 = vector.load %arg19[%c43_592, %c0_593] : memref<48x128xf32, #tpu.memory_space<vmem>>, vector<4x128xf32>
    %c28_594 = arith.constant 28 : index
    %c128_595 = arith.constant 128 : index
    %397 = vector.load %arg24[%c28_594, %c128_595] : memref<32x384xf32, #tpu.memory_space<vmem>>, vector<4x128xf32>
    tpu.vector_store %arg24[%c28_594, %c128_595], %396 {strides = array<i32>} : memref<32x384xf32, #tpu.memory_space<vmem>>, vector<4x128xf32>,
    %c44_596 = arith.constant 44 : index
    %c0_597 = arith.constant 0 : index
    %398 = vector.load %arg19[%c44_596, %c0_597] : memref<48x128xf32, #tpu.memory_space<vmem>>, vector<4x128xf32>
    %c28_598 = arith.constant 28 : index
    %c256_599 = arith.constant 256 : index
    %399 = vector.load %arg24[%c28_598, %c256_599] : memref<32x384xf32, #tpu.memory_space<vmem>>, vector<4x128xf32>
    tpu.vector_store %arg24[%c28_598, %c256_599], %398 {strides = array<i32>} : memref<32x384xf32, #tpu.memory_space<vmem>>, vector<4x128xf32>,
    %c0_600 = arith.constant 0 : index
    %c0_601 = arith.constant 0 : index
    %400 = vector.load %arg24[%c0_600, %c0_601] : memref<32x384xf32, #tpu.memory_space<vmem>>, vector<32x384xf32>
    %c0_602 = arith.constant 0 : index
    %c0_603 = arith.constant 0 : index
    %401 = vector.load %arg10[%c0_602, %c0_603] : memref<384x128xf32, #tpu.memory_space<vmem>>, vector<384x128xf32>
    %cst_604 = arith.constant dense<0.000000e+00> : vector<32x128xf32>
    %402 = tpu.matmul %400, %401, %cst_604 {dimension_numbers = #tpu.dot_dimension_numbers<[1], [0], [0], [1], [0, 0, 1, 1], [], []>} : vector<32x384xf32>, vector<384x128xf32>, vector<32x128xf32> -> vector<32x128xf32>
    %c0_605 = arith.constant 0 : index
    %c0_606 = arith.constant 0 : index
    %403 = vector.load %arg11[%c0_605, %c0_606] : memref<1x128xf32, #tpu.memory_space<vmem>>, vector<1x128xf32>
    %404 = vector.broadcast %403 : vector<1x128xf32> to vector<32x128xf32>
    %405 = arith.addf %402, %404 : vector<32x128xf32>
    %cst_607 = arith.constant 0.000000e+00 : f32
    %406 = vector.broadcast %cst_607 : f32 to vector<32x128xf32>
    %407 = arith.maximumf %405, %406 : vector<32x128xf32>
    %c0_608 = arith.constant 0 : index
    %c0_609 = arith.constant 0 : index
    %408 = vector.load %arg25[%c0_608, %c0_609] : memref<32x128xf32, #tpu.memory_space<vmem>>, vector<32x128xf32>
    tpu.vector_store %arg25[%c0_608, %c0_609], %407 {strides = array<i32>} : memref<32x128xf32, #tpu.memory_space<vmem>>, vector<32x128xf32>,
    %c0_610 = arith.constant 0 : index
    %c0_611 = arith.constant 0 : index
    %409 = tpu.strided_load %arg25[%c0_610, %c0_611] {strides = array<i32: 4, 1>} : memref<32x128xf32, #tpu.memory_space<vmem>>, vector<8x128xf32>
    %c0_612 = arith.constant 0 : index
    %c0_613 = arith.constant 0 : index
    %410 = vector.load %arg26[%c0_612, %c0_613] : memref<8x512xf32, #tpu.memory_space<vmem>>, vector<8x128xf32>
    tpu.vector_store %arg26[%c0_612, %c0_613], %409 {strides = array<i32>} : memref<8x512xf32, #tpu.memory_space<vmem>>, vector<8x128xf32>,
    %c1_614 = arith.constant 1 : index
    %c0_615 = arith.constant 0 : index
    %411 = tpu.strided_load %arg25[%c1_614, %c0_615] {strides = array<i32: 4, 1>} : memref<32x128xf32, #tpu.memory_space<vmem>>, vector<8x128xf32>
    %c0_616 = arith.constant 0 : index
    %c128_617 = arith.constant 128 : index
    %412 = vector.load %arg26[%c0_616, %c128_617] : memref<8x512xf32, #tpu.memory_space<vmem>>, vector<8x128xf32>
    tpu.vector_store %arg26[%c0_616, %c128_617], %411 {strides = array<i32>} : memref<8x512xf32, #tpu.memory_space<vmem>>, vector<8x128xf32>,
    %c2_618 = arith.constant 2 : index
    %c0_619 = arith.constant 0 : index
    %413 = tpu.strided_load %arg25[%c2_618, %c0_619] {strides = array<i32: 4, 1>} : memref<32x128xf32, #tpu.memory_space<vmem>>, vector<8x128xf32>
    %c0_620 = arith.constant 0 : index
    %c256_621 = arith.constant 256 : index
    %414 = vector.load %arg26[%c0_620, %c256_621] : memref<8x512xf32, #tpu.memory_space<vmem>>, vector<8x128xf32>
    tpu.vector_store %arg26[%c0_620, %c256_621], %413 {strides = array<i32>} : memref<8x512xf32, #tpu.memory_space<vmem>>, vector<8x128xf32>,
    %c3_622 = arith.constant 3 : index
    %c0_623 = arith.constant 0 : index
    %415 = tpu.strided_load %arg25[%c3_622, %c0_623] {strides = array<i32: 4, 1>} : memref<32x128xf32, #tpu.memory_space<vmem>>, vector<8x128xf32>
    %c0_624 = arith.constant 0 : index
    %c384 = arith.constant 384 : index
    %416 = vector.load %arg26[%c0_624, %c384] : memref<8x512xf32, #tpu.memory_space<vmem>>, vector<8x128xf32>
    tpu.vector_store %arg26[%c0_624, %c384], %415 {strides = array<i32>} : memref<8x512xf32, #tpu.memory_space<vmem>>, vector<8x128xf32>,
    %c0_625 = arith.constant 0 : index
    %c0_626 = arith.constant 0 : index
    %417 = vector.load %arg26[%c0_625, %c0_626] : memref<8x512xf32, #tpu.memory_space<vmem>>, vector<8x512xf32>
    %c0_627 = arith.constant 0 : index
    %c0_628 = arith.constant 0 : index
    %418 = vector.load %arg12[%c0_627, %c0_628] : memref<512x128xf32, #tpu.memory_space<vmem>>, vector<512x128xf32>
    %cst_629 = arith.constant dense<0.000000e+00> : vector<8x128xf32>
    %419 = tpu.matmul %417, %418, %cst_629 {dimension_numbers = #tpu.dot_dimension_numbers<[1], [0], [0], [1], [0, 0, 1, 1], [], []>} : vector<8x512xf32>, vector<512x128xf32>, vector<8x128xf32> -> vector<8x128xf32>
    %c0_630 = arith.constant 0 : index
    %c0_631 = arith.constant 0 : index
    %420 = vector.load %arg13[%c0_630, %c0_631] : memref<1x128xf32, #tpu.memory_space<vmem>>, vector<1x128xf32>
    %421 = vector.broadcast %420 : vector<1x128xf32> to vector<8x128xf32>
    %422 = arith.addf %419, %421 : vector<8x128xf32>
    %c0_632 = arith.constant 0 : index
    %c0_633 = arith.constant 0 : index
    %423 = vector.load %arg14[%c0_632, %c0_633] : memref<8x128xf32, #tpu.memory_space<vmem>>, vector<8x128xf32>
    tpu.vector_store %arg14[%c0_632, %c0_633], %422 {strides = array<i32>} : memref<8x128xf32, #tpu.memory_space<vmem>>, vector<8x128xf32>,
    return
  }
  func.func @transform_0(%arg0: i32) -> (i32, i32, i32) {
    %c0_i32 = arith.constant 0 : i32
    %c0_i32_0 = arith.constant 0 : i32
    %c0_i32_1 = arith.constant 0 : i32
    return %arg0, %c0_i32, %c0_i32_0 : i32, i32, i32
  }
  func.func @transform_1(%arg0: i32) -> (i32, i32) {
    %c0_i32 = arith.constant 0 : i32
    %c0_i32_0 = arith.constant 0 : i32
    %c0_i32_1 = arith.constant 0 : i32
    return %c0_i32, %c0_i32_0 : i32, i32
  }
  func.func @transform_2(%arg0: i32) -> (i32, i32) {
    %c0_i32 = arith.constant 0 : i32
    %c0_i32_0 = arith.constant 0 : i32
    %c0_i32_1 = arith.constant 0 : i32
    return %c0_i32, %c0_i32_0 : i32, i32
  }
  func.func @transform_3(%arg0: i32) -> (i32, i32) {
    %c0_i32 = arith.constant 0 : i32
    %c0_i32_0 = arith.constant 0 : i32
    %c0_i32_1 = arith.constant 0 : i32
    return %c0_i32, %c0_i32_0 : i32, i32
  }
  func.func @transform_4(%arg0: i32) -> (i32, i32) {
    %c0_i32 = arith.constant 0 : i32
    %c0_i32_0 = arith.constant 0 : i32
    %c0_i32_1 = arith.constant 0 : i32
    return %c0_i32, %c0_i32_0 : i32, i32
  }
  func.func @transform_5(%arg0: i32) -> (i32, i32) {
    %c0_i32 = arith.constant 0 : i32
    %c0_i32_0 = arith.constant 0 : i32
    %c0_i32_1 = arith.constant 0 : i32
    return %c0_i32, %c0_i32_0 : i32, i32
  }
  func.func @transform_6(%arg0: i32) -> (i32, i32) {
    %c0_i32 = arith.constant 0 : i32
    %c0_i32_0 = arith.constant 0 : i32
    %c0_i32_1 = arith.constant 0 : i32
    return %c0_i32, %c0_i32_0 : i32, i32
  }
  func.func @transform_7(%arg0: i32) -> (i32, i32) {
    %c0_i32 = arith.constant 0 : i32
    %c0_i32_0 = arith.constant 0 : i32
    %c0_i32_1 = arith.constant 0 : i32
    return %c0_i32, %c0_i32_0 : i32, i32
  }
  func.func @transform_8(%arg0: i32) -> (i32, i32) {
    %c0_i32 = arith.constant 0 : i32
    %c0_i32_0 = arith.constant 0 : i32
    %c0_i32_1 = arith.constant 0 : i32
    return %c0_i32, %c0_i32_0 : i32, i32
  }
  func.func @transform_9(%arg0: i32) -> (i32, i32) {
    %c0_i32 = arith.constant 0 : i32
    %c0_i32_0 = arith.constant 0 : i32
    %c0_i32_1 = arith.constant 0 : i32
    return %c0_i32, %c0_i32_0 : i32, i32
  }
  func.func @transform_10(%arg0: i32) -> (i32, i32) {
    %c0_i32 = arith.constant 0 : i32
    %c0_i32_0 = arith.constant 0 : i32
    %c0_i32_1 = arith.constant 0 : i32
    return %c0_i32, %c0_i32_0 : i32, i32
  }
  func.func @transform_11(%arg0: i32) -> (i32, i32) {
    %c0_i32 = arith.constant 0 : i32
    %c0_i32_0 = arith.constant 0 : i32
    %c0_i32_1 = arith.constant 0 : i32
    return %c0_i32, %c0_i32_0 : i32, i32
  }
  func.func @transform_12(%arg0: i32) -> (i32, i32) {
    %c0_i32 = arith.constant 0 : i32
    %c0_i32_0 = arith.constant 0 : i32
    %c0_i32_1 = arith.constant 0 : i32
    return %c0_i32, %c0_i32_0 : i32, i32
  }
  func.func @transform_13(%arg0: i32) -> (i32, i32) {
    %c0_i32 = arith.constant 0 : i32
    %c0_i32_0 = arith.constant 0 : i32
    return %arg0, %c0_i32 : i32, i32
  }
}

</mosaic_0001>

<bundles_post_ra>
// kernel: tpu_custom_call.1
= control target key start
LH: loop header
LB: loop body
LE: loop exit
PB: predicated region body
PF: predicated region fallthrough
CT: control target
= control target key end

     0   :  { %s5470_s0 = inlined_call_operand.vmem [shape: f32[16,28,28], index: 0, kind: input, shape index: {}]   ;;  %s5471_s1 = inlined_call_operand.vmem [shape: f32[384,128], index: 1, kind: input, shape index: {}]   ;;  %s5472_s2 = inlined_call_operand.vmem [shape: f32[1,128], index: 2, kind: input, shape index: {}]   ;;  %s5473_s3 = inlined_call_operand.hbm [shape: f32[384,128], index: 3, kind: input, shape index: {}]   ;;  %s5474_s4 = inlined_call_operand.vmem [shape: f32[1,128], index: 4, kind: input, shape index: {}]   ;;  %s5475_s5 = inlined_call_operand.hbm [shape: f32[384,128], index: 5, kind: input, shape index: {}]   ;;  %s5476_s6 = inlined_call_operand.vmem [shape: f32[1,128], index: 6, kind: input, shape index: {}]   ;;  %s5477_s7 = inlined_call_operand.hbm [shape: f32[384,128], index: 7, kind: input, shape index: {}]   ;;  %s5478_s8 = inlined_call_operand.vmem [shape: f32[1,128], index: 8, kind: input, shape index: {}]   ;;  %s5479_s9 = inlined_call_operand.hbm [shape: f32[384,128], index: 9, kind: input, shape index: {}]   ;;  %s5480_s10 = inlined_call_operand.vmem [shape: f32[1,128], index: 10, kind: input, shape index: {}]   ;;  %s5481_s11 = inlined_call_operand.vmem [shape: f32[512,128], index: 11, kind: input, shape index: {}]   ;;  %s5482_s12 = inlined_call_operand.vmem [shape: f32[1,128], index: 12, kind: input, shape index: {}]   ;;  %s5483_s13 = inlined_call_operand.hbm [shape: f32[16,128], index: 13, kind: output, shape index: {}]  }
   0x1   :  { %5496 = sst [smem:[#allocation34_spill]] %s5482_s12 }
   0x2   :  { %5497 = sst [smem:[#allocation35_spill]] %s5483_s13 }
   0x3   :  { %18 = vsyncpa [#allocation15], 0 }
   0x4   :  { %19 = vsyncpa [#allocation18], 0 }
   0x5   :  { %20 = vsyncpa [#allocation21], 0 }
   0x6   :  { %21 = vsyncpa [#allocation16], 0 }
   0x7   :  { %23 = vsyncpa [#allocation16 + $0x1], 0  ;;  %s4593_s25 = smov 0   ;;  %s4595_s26 = smov 0  }
   0x8   :  { %s4597_s27 = smov 0   ;;  %s4599_s28 = smov 0  }
   0x9 LB: > { %5498 = sst [smem:[#allocation27_spill]] %s4499_s25  ;;  %s4614_s29 = sadd.s32 4294967295, %s4511_s28   ;;  %s4511_s28 = sphi %s4599_s28, %s5527_s28   ;;  %s4507_s27 = sphi %s4597_s27, %s5529_s27   ;;  %s4503_s26 = sphi %s4595_s26, %s5531_s26   ;;  %s4499_s25 = sphi %s4593_s25, %s5530_s25  }
   0xa   : > { %5499 = sst [smem:[#allocation28_spill]] %s4507_s27  ;;  %s3147_s30 = sadd.s32 4294967294, %s4511_s28  }
   0xb   : > { %5500 = sst [smem:[#allocation29_spill]] %s4511_s28  ;;  %s4618_s14 = sadd.s32 1, %s4511_s28  }
   0xc   : > { %5501 = sst [smem:[#allocation30_spill]] %s4618_s14  ;;  %s314_s15 = sadd.s32 1, %s4507_s27 }
   0xd   : > { %s311_s16 = ssub.s32 %s4511_s28, %s4618_s14  ;;  %p324_p0 = scmp.ne.s32.totalorder %s4507_s27, %s4503_s26 }
   0xe   : > { %p312_p1 = scmp.eq.s32.totalorder %s311_s16, 0  ;;  %p325_p2 = scmp.eq.s32.totalorder %s4614_s29, 1 }
   0xf   : > { %p330_p3 = scmp.ne.s32.totalorder %s4503_s26, %s4499_s25  ;;  %p331_p4 = scmp.eq.s32.totalorder %s3147_s30, 1 }
  0x10   : > { %s4629_s17 = scalar_select %p312_p1, %s4507_s27, %s314_s15  }
  0x11   : > { %p4631_p5 = por %p325_p2, %p324_p0  ;;  %p4635_p6 = por %p331_p4, %p330_p3 }
  0x12   : > { %5502 = sst [smem:[#allocation31_spill]] %s4629_s17  ;;  %p3148_p7 = scmp.ge.s32.totalorder %s4511_s28, 1 }
  0x13   : > { %s5503_s18 = scalar_select %p4631_p5, 1, 0 }
  0x14   : > { %s5505_s19 = scalar_select %p4635_p6, 1, 0 }
  0x15   : > { %5504 = sst [smem:[#allocation32_spill]] %s5503_s18  ;;  %p338_p8 = scmp.lt.s32.totalorder %s4511_s28, 3 }
  0x16   : > { %5506 = sst [smem:[#allocation33_spill]] %s5505_s19  ;;  %p5489_p9 = scmp.eq.s32.totalorder %s4614_s29, 0 }
  0x17   : > { %p4642_p10 = pnand %p3148_p7, %p338_p8  ;;  %s4513_s21 = smov [#allocation17]  }
  0x18   : > { %s372_s22 = sshll.u32 %s4513_s21, 4  ;;  %s4514_s24 = smov [#allocation14]   ;;  %s4648_s22 = int_to_ptr.vmem [resolvable:$true] %s372_s22 }
  0x19   : > { %s5507_s20 = scalar_select %p4642_p10, 1, 0 }
  0x1a   : > { %p4258_p11 = pneg %p4642_p10  ;;  %s356_s30 = sshll.u32 %s4514_s24, 4  ;;  %s4656_s30 = int_to_ptr.vmem [resolvable:$true] %s356_s30 }
  0x1b   : > { %s4515_s15 = smov [#allocation19]   ;;  %s4325_s14 = scalar_lea.hbm %s5475_s5, 6144 }
  0x1c   : > { %p4652_p12 = pnand %p5489_p9, %p4258_p11  ;;  %s4658_s16 = sshll.u32 %s4515_s15, 4  ;;  %s389_s16 = int_to_ptr.vmem [resolvable:$true] %s4658_s16 }
  0x1d   : > { %p4326_p13 = scmp.ne.s32.totalorder %s5475_s5, %s4325_s14  ;;  %p4332_p3 = scmp.lt.u32.totalorder %s4325_s14, %s5475_s5 }
  0x1e   : > { %p4668_p0 = pneg %p4652_p12 }
  0x20   : > { %p4328_p1 = pnand %p4668_p0, %p4326_p13 }
  0x22   : > { %p4329_p2 = pneg %p4328_p1 }
  0x24   : > { %p4334_p4 = pnand %p4332_p3, %p4329_p2 }
  0x26   : > { %4337 = shalt.err (!%p4334_p4)
}
  0x27   : > { %s4338_s27 = scalar_lea.vmem %s4648_s22, 6144  ;;  %p4346_p9 = scmp.lt.s32.totalorder %s4648_s22, %s4648_s22 }
  0x28   : > { %p4339_p7 = scmp.ne.s32.totalorder %s4648_s22, %s4338_s27  ;;  %p4347_p6 = scmp.lt.s32.totalorder %s4338_s27, %s4338_s27 }
  0x2a   : > { %p4341_p8 = pnand %p4339_p7, %p4668_p0  ;;  %p4348_p13 = por %p4347_p6, %p4346_p9 }
  0x2c   : > { %p4342_p11 = pneg %p4341_p8 }
  0x2e   : > { %p4349_p1 = pnand %p4348_p13, %p4342_p11 }
  0x30   : > { %4352 = shalt.err (!%p4349_p1)
}
  0x31   : > { %s4516_s17 = smov 128   ;;  %s4517_s14 = smov 8  }
  0x32   : > { %4264 = dma.hbm_to_vmem [thread:$0]  (!%p4652_p12), %s5475_s5, 6144, %s4648_s22, [#allocation18], %s4516_s17, %s4516_s17, %s4517_s14  }
  0x33   : > { %s4353_s27 = scalar_lea.hbm %s5473_s3, 6144 }
  0x34   : > { %p4354_p6 = scmp.ne.s32.totalorder %s5473_s3, %s4353_s27  ;;  %p4360_p3 = scmp.lt.u32.totalorder %s4353_s27, %s5473_s3 }
  0x36   : > { %p4356_p9 = pnand %p4354_p6, %p4668_p0 }
  0x38   : > { %p4357_p2 = pneg %p4356_p9 }
  0x3a   : > { %p4362_p4 = pnand %p4360_p3, %p4357_p2 }
  0x3c   : > { %4365 = shalt.err (!%p4362_p4)
}
  0x3d   : > { %s4366_s22 = scalar_lea.vmem %s4656_s30, 6144  ;;  %p4374_p13 = scmp.lt.s32.totalorder %s4656_s30, %s4656_s30 }
  0x3e   : > { %p4367_p7 = scmp.ne.s32.totalorder %s4656_s30, %s4366_s22  ;;  %p4375_p1 = scmp.lt.s32.totalorder %s4366_s22, %s4366_s22 }
  0x40   : > { %p4369_p8 = pnand %p4367_p7, %p4668_p0  ;;  %p4376_p6 = por %p4375_p1, %p4374_p13 }
  0x42   : > { %p4370_p11 = pneg %p4369_p8 }
  0x44   : > { %p4377_p9 = pnand %p4376_p6, %p4370_p11 }
  0x46   : > { %4380 = shalt.err (!%p4377_p9)
}
  0x47   : > { %4261 = dma.hbm_to_vmem [thread:$0]  (!%p4652_p12), %s5473_s3, 6144, %s4656_s30, [#allocation15], %s4516_s17, %s4516_s17, %s4517_s14  }
  0x48   : > { %s4381_s19 = scalar_lea.hbm %s5477_s7, 6144 }
  0x49   : > { %p4382_p2 = scmp.ne.s32.totalorder %s5477_s7, %s4381_s19  ;;  %p4388_p7 = scmp.lt.u32.totalorder %s4381_s19, %s5477_s7 }
  0x4b   : > { %p4384_p3 = pnand %p4382_p2, %p4668_p0 }
  0x4d   : > { %p4385_p4 = pneg %p4384_p3 }
  0x4f   : > { %p4390_p8 = pnand %p4388_p7, %p4385_p4 }
  0x51   : > { %4393 = shalt.err (!%p4390_p8)
}
  0x52   : > { %s4394_s22 = scalar_lea.vmem %s389_s16, 6144  ;;  %p4402_p6 = scmp.lt.s32.totalorder %s389_s16, %s389_s16 }
  0x53   : > { %p4395_p11 = scmp.ne.s32.totalorder %s389_s16, %s4394_s22  ;;  %p4403_p9 = scmp.lt.s32.totalorder %s4394_s22, %s4394_s22 }
  0x55   : > { %p4397_p13 = pnand %p4395_p11, %p4668_p0  ;;  %p4404_p5 = por %p4403_p9, %p4402_p6 }
  0x57   : > { %p4398_p1 = pneg %p4397_p13 }
  0x59   : > { %p4405_p10 = pnand %p4404_p5, %p4398_p1 }
  0x5b   : > { %4408 = shalt.err (!%p4405_p10)
}
  0x5c   : > { %4267 = dma.hbm_to_vmem [thread:$0]  (!%p4652_p12), %s5477_s7, 6144, %s389_s16, [#allocation18], %s4516_s17, %s4516_s17, %s4517_s14  }
  0x5d   : > { %s4518_s13 = smov [#allocation20]   ;;  %s4409_s21 = scalar_lea.hbm %s5479_s9, 6144 }
  0x5e   : > { %s404_s28 = sshll.u32 %s4518_s13, 4  ;;  %p4410_p5 = scmp.ne.s32.totalorder %s5479_s9, %s4409_s21  ;;  %s405_s28 = int_to_ptr.vmem [resolvable:$true] %s404_s28 }
  0x5f   : > { %p4416_p3 = scmp.lt.u32.totalorder %s4409_s21, %s5479_s9 }
  0x60   : > { %p4412_p10 = pnand %p4410_p5, %p4668_p0 }
  0x62   : > { %p4413_p2 = pneg %p4412_p10 }
  0x64   : > { %p4418_p4 = pnand %p4416_p3, %p4413_p2 }
  0x66   : > { %4421 = shalt.err (!%p4418_p4)
}
  0x67   : > { %s4422_s16 = scalar_lea.vmem %s405_s28, 6144  ;;  %p4430_p13 = scmp.lt.s32.totalorder %s405_s28, %s405_s28 }
  0x68   : > { %p4423_p7 = scmp.ne.s32.totalorder %s405_s28, %s4422_s16  ;;  %p4431_p1 = scmp.lt.s32.totalorder %s4422_s16, %s4422_s16 }
  0x6a   : > { %p4425_p8 = pnand %p4423_p7, %p4668_p0  ;;  %p4432_p6 = por %p4431_p1, %p4430_p13 }
  0x6c   : > { %p4426_p11 = pneg %p4425_p8 }
  0x6e   : > { %p4433_p9 = pnand %p4432_p6, %p4426_p11 }
  0x70   : > { %4436 = shalt.err (!%p4433_p9)
}
  0x71   : > { %4270 = dma.hbm_to_vmem [thread:$0]  (!%p4652_p12), %s5479_s9, 6144, %s405_s28, [#allocation21], %s4516_s17, %s4516_s17, %s4517_s14  }
  0x72   : > { %p5510_p5 = scmp.ne.s32.totalorder %s5507_s20, 0 }
  0x73   : > { %p5511_p0 = scmp.eq.s32.totalorder (!%p5510_p5), %s4614_s29, 0 }
  0x74   : > { %439 = sbr.rel (%p5510_p5) target bundleno = 1672 (0x688), region = 72 }
  0x7b   : > { %4482 = dma.done.wait (%p5511_p0), [#allocation15], 6144   ;;  %p5512_p10 = pmov %p5511_p0 }
  0x7c   : > { %p5513_p2 = pmov %p5511_p0 }
  0x7d   : > { %4484 = vsyncadd (%p5512_p10), [#allocation15], 4294961152 }
  0x7e   : > { %4486 = dma.done.wait (%p5513_p2), [#allocation18], 12288   ;;  %p5514_p3 = pmov %p5511_p0 }
  0x7f   : > { %p5515_p4 = pmov %p5511_p0 }
  0x80   : > { %4488 = vsyncadd (%p5514_p3), [#allocation18], 4294955008 }
  0x81   : > { %4490 = dma.done.wait (%p5515_p4), [#allocation21], 6144   ;;  %p5516_p12 = pmov %p5511_p0 }
  0x82   : > { %v4519_v0 = vmov 0.0   ;;  %v996_v1 = vld [vmem:[%s5471_s1 + $0x80] sm:$0xff]  ;;  %v997_v2 = vld [vmem:[%s5471_s1 + $0x88] sm:$0xff]  ;;  %s3160_s28 = sshll.u32 %s4614_s29, 3  ;;  %v998_v6 = vld [vmem:[%s5471_s1 + $0x90] sm:$0xff]  ;;  %vm573_vm0 = vcmask 228352  }
  0x83   : > { %4492 = vsyncadd (%p5516_p12), [#allocation21], 4294961152  ;;  %503 = vst [vmem:[#allocation2] sm:$0xff] %v4519_v0  ;;  %v980_v3 = vld [vmem:[%s5471_s1] sm:$0xff]  ;;  %v3864_v4 = vpack.c.bf16 %v997_v2, %v996_v1  ;;  %v981_v5 = vld [vmem:[%s5471_s1 + $0x8] sm:$0xff]  ;;  %p4879_p7 = scmp.lt.s32.totalorder %s3160_s28, 15 }
  0x84   : > { %504 = vst [vmem:[#allocation2 + $0x8] sm:$0xff] %v4519_v0  ;;  %505 = vst [vmem:[#allocation2 + $0x10] sm:$0xff] %v4519_v0  ;;  %v999_v7 = vld [vmem:[%s5471_s1 + $0x98] sm:$0xff]  ;;  %v3866_v8 = vpack.c.bf16 %v981_v5, %v980_v3  ;;  %v1012_v10 = vld [vmem:[%s5471_s1 + $0x100] sm:$0xff]  ;;  %vm577_vm1 = vcmask 224256   ;;  %vm665_vm2 = vcmask 1045504  }
  0x85   : > { %506 = vst [vmem:[#allocation2 + $0x18] sm:$0xff] %v4519_v0  ;;  %507 = vst [vmem:[#allocation2 + $0x20] sm:$0xff] %v4519_v0  ;;  %v3868_v9 = vpack.c.bf16 %v999_v7, %v998_v6  ;;  %v1013_v11 = vld [vmem:[%s5471_s1 + $0x108] sm:$0xff]  ;;  %v982_v12 = vld [vmem:[%s5471_s1 + $0x10] sm:$0xff]  ;;  %3865 = vmatprep.subr.bf16.mxu0 %v3864_v4  ;;  %s5533_s28 = smov (!%p4879_p7, %s3160_s28), 15  ;;  %vm711_vm3 = vcmask 1043456  }
  0x86   : > { %508 = vst [vmem:[#allocation2 + $0x28] sm:$0xff] %v4519_v0  ;;  %509 = vst [vmem:[#allocation2 + $0x30] sm:$0xff] %v4519_v0  ;;  %v3896_v13 = vpack.c.bf16 %v1013_v11, %v1012_v10  ;;  %v983_v14 = vld [vmem:[%s5471_s1 + $0x18] sm:$0xff]  ;;  %v1000_v15 = vld [vmem:[%s5471_s1 + $0xa0] sm:$0xff]  ;;  %3867 = vmatpush3.bf16.msra.mxu0 %v3866_v8  ;;  %s3201_s13 = sshll.u32 %s5533_s28, 5  ;;  %vm757_vm4 = vcmask 1041408  }
  0x87   : > { %510 = vst [vmem:[#allocation2 + $0x38] sm:$0xff] %v4519_v0  ;;  %511 = vst [vmem:[#allocation2 + $0x40] sm:$0xff] %v4519_v0  ;;  %v1001_v16 = vld [vmem:[%s5471_s1 + $0xa8] sm:$0xff]  ;;  %v3870_v17 = vpack.c.bf16 %v983_v14, %v982_v12  ;;  %v1014_v18 = vld [vmem:[%s5471_s1 + $0x110] sm:$0xff]  ;;  %3869 = vmatprep.subr.bf16.mxu0 %v3868_v9  ;;  %s4950_s17 = scalar_lea.vmem %s5470_s0, %s3201_s13  ;;  %vm4521_vm5 = vmmov 0   ;;  %s493_s18 = sand.u32 1, %s4503_s26  }
  0x88   : > { %512 = vst [vmem:[#allocation2 + $0x48] sm:$0xff] %v4519_v0  ;;  %513 = vst [vmem:[#allocation2 + $0x50] sm:$0xff] %v4519_v0  ;;  %v1015_v19 = vld [vmem:[%s5471_s1 + $0x118] sm:$0xff]  ;;  %3897 = vmatprep.subr.bf16.mxu1 %v3896_v13  ;;  %v3872_v20 = vpack.c.bf16 %v1001_v16, %v1000_v15  ;;  %v984_v22 = vld [vmem:[%s5471_s1 + $0x20] sm:$0xff]  ;;  %s3159_s19 = sshll.u32 %s493_s18, 3  ;;  %s5518_s15 = sld [smem:[#allocation34_spill]] }
  0x89   : > { %514 = vst [vmem:[#allocation2 + $0x58] sm:$0xff] %v4519_v0  ;;  %515 = vst [vmem:[#allocation2 + $0x60] sm:$0xff] %v4519_v0  ;;  %v3900_v21 = vpack.c.bf16 %v1015_v19, %v1014_v18  ;;  %v985_v23 = vld [vmem:[%s5471_s1 + $0x28] sm:$0xff]  ;;  %v1002_v24 = vld [vmem:[%s5471_s1 + $0xb0] sm:$0xff]  ;;  %3899 = vmatpush3.bf16.msra.mxu1 %v3896_v13  ;;  %s5519_s27 = sld [smem:[#allocation32_spill]]  ;;  %s3198_s22 = sshll.u32 %s4614_s29, 7 }
  0x8a   : > { %516 = vst [vmem:[#allocation2 + $0x68] sm:$0xff] %v4519_v0  ;;  %517 = vst [vmem:[#allocation2 + $0x70] sm:$0xff] %v4519_v0  ;;  %v1003_v25 = vld [vmem:[%s5471_s1 + $0xb8] sm:$0xff]  ;;  %v1016_v26 = vld [vmem:[%s5471_s1 + $0x120] sm:$0xff]  ;;  %3871 = vmatpush3.bf16.msra.mxu0 %v3870_v17  ;;  %v3874_v29 = vpack.c.bf16 %v985_v23, %v984_v22  ;;  %s495_s16 = scalar_lea.vmem [#allocation22], %s3159_s19  ;;  %s5520_s25 = sld [smem:[#allocation35_spill]] }
  0x8b   : > { %518 = vst [vmem:[#allocation2 + $0x78] sm:$0xff] %v4519_v0  ;;  %519 = vst [vmem:[#allocation2 + $0x80] sm:$0xff] %v4519_v0  ;;  %v1017_v27 = vld [vmem:[%s5471_s1 + $0x128] sm:$0xff]  ;;  %3901 = vmatprep.subr.bf16.mxu1 %v3900_v21  ;;  %v1018_v30 = vld [vmem:[%s5471_s1 + $0x130] sm:$0xff]  ;;  %3873 = vmatprep.subr.bf16.mxu0 %v3872_v20  ;;  %v3876_v32 = vpack.c.bf16 %v1003_v25, %v1002_v24  ;;  %s3047_s30 = sshll.u32 %s495_s16, 4  ;;  %s3034_s23 = scalar_lea.sflag [#allocation16], %s493_s18  ;;  %s5430_s30 = int_to_ptr.vmem [resolvable:$true] %s3047_s30 }
  0x8c   : > { %520 = vst [vmem:[#allocation2 + $0x88] sm:$0xff] %v4519_v0  ;;  %521 = vst [vmem:[#allocation2 + $0x90] sm:$0xff] %v4519_v0  ;;  %v3904_v28 = vpack.c.bf16 %v1017_v27, %v1016_v26  ;;  %v1019_v31 = vld [vmem:[%s5471_s1 + $0x138] sm:$0xff]  ;;  %v986_v33 = vld [vmem:[%s5471_s1 + $0x30] sm:$0xff]  ;;  %s4522_s29 = smov [#allocation22]  }
  0x8d   : > { %522 = vst [vmem:[#allocation2 + $0x98] sm:$0xff] %v4519_v0  ;;  %523 = vst [vmem:[#allocation2 + $0xa0] sm:$0xff] %v4519_v0  ;;  %v987_v34 = vld [vmem:[%s5471_s1 + $0x38] sm:$0xff]  ;;  %3903 = vmatpush3.bf16.msra.mxu1 %v3900_v21  ;;  %v1004_v35 = vld [vmem:[%s5471_s1 + $0xc0] sm:$0xff]  ;;  %v3908_v37 = vpack.c.bf16 %v1019_v31, %v1018_v30  ;;  %s4441_s14 = sshll.u32 %s4522_s29, 4  ;;  %s4442_s14 = int_to_ptr.vmem [resolvable:$false] %s4441_s14 }
  0x8e   : > { %524 = vst [vmem:[#allocation2 + $0xa8] sm:$0xff] %v4519_v0  ;;  %525 = vst [vmem:[#allocation2 + $0xb0] sm:$0xff] %v4519_v0  ;;  %v1005_v36 = vld [vmem:[%s5471_s1 + $0xc8] sm:$0xff]  ;;  %3905 = vmatprep.subr.bf16.mxu1 %v3904_v28  ;;  %3875 = vmatpush3.bf16.msra.mxu0 %v3874_v29  ;;  %v3878_v38 = vpack.c.bf16 %v987_v34, %v986_v33  ;;  %v1020_v39 = vld [vmem:[%s5471_s1 + $0x140] sm:$0xff]  ;;  %s4443_s19 = scalar_lea.vmem %s4442_s14, 256  ;;  %p4444_p6 = scmp.lt.s32.totalorder %s5430_s30, %s4442_s14 }
  0x8f   : > { %526 = vst [vmem:[#allocation2 + $0xb8] sm:$0xff] %v4519_v0  ;;  %527 = vst [vmem:[#allocation2 + $0xc0] sm:$0xff] %v4519_v0  ;;  %v1021_v40 = vld [vmem:[%s5471_s1 + $0x148] sm:$0xff]  ;;  %3877 = vmatprep.subr.bf16.mxu0 %v3876_v32  ;;  %v3880_v41 = vpack.c.bf16 %v1005_v36, %v1004_v35  ;;  %v988_v42 = vld [vmem:[%s5471_s1 + $0x40] sm:$0xff]  ;;  %p5522_p11 = scmp.ne.s32.totalorder %s5519_s27, 0 }
  0x90   : > { %528 = vst [vmem:[#allocation2 + $0xc8] sm:$0xff] %v4519_v0  ;;  %529 = vst [vmem:[#allocation2 + $0xd0] sm:$0xff] %v4519_v0  ;;  %v989_v43 = vld [vmem:[%s5471_s1 + $0x48] sm:$0xff]  ;;  %v1006_v44 = vld [vmem:[%s5471_s1 + $0xd0] sm:$0xff]  ;;  %v3912_v46 = vpack.c.bf16 %v1021_v40, %v1020_v39  ;;  %s5521_s20 = smov %s5520_s25  ;;  %s5428_s21 = scalar_lea.hbm %s5520_s25, %s3198_s22 }
  0x91   : > { %530 = vst [vmem:[#allocation2 + $0xd8] sm:$0xff] %v4519_v0  ;;  %531 = vst [vmem:[#allocation2 + $0xe0] sm:$0xff] %v4519_v0  ;;  %3907 = vmatpush3.bf16.msra.mxu1 %v3904_v28  ;;  %v1007_v45 = vld [vmem:[%s5471_s1 + $0xd8] sm:$0xff]  ;;  %v4955_v47 = vld [vmem:[%s5471_s1 + $0x50] sm:$0xff]  ;;  %v3882_v51 = vpack.c.bf16 %v989_v43, %v988_v42 }
  0x92   : > { %532 = vst [vmem:[#allocation2 + $0xe8] sm:$0xff] %v4519_v0  ;;  %533 = vst [vmem:[#allocation3] sm:$0x1] %v4519_v0  ;;  %3909 = vmatprep.subr.bf16.mxu1 %v3908_v37  ;;  %v4960_v48 = vld [vmem:[%s5471_s1 + $0x58] sm:$0xff]  ;;  %v569_v49 = vld [vmem:[%s4950_s17] sm:$0xff]  ;;  %3879 = vmatpush3.bf16.msra.mxu0 %v3878_v38  ;;  %v3884_v57 = vpack.c.bf16 %v1007_v45, %v1006_v44 }
  0x93   : > { %534 = vst [vmem:[#allocation3 + $0xf] sm:$0x3] %v4519_v0  ;;  %535 = vst [vmem:[#allocation3 + $0x1f] sm:$0x3] %v4519_v0  ;;  %v570_v50 = vld [vmem:[%s4950_s17 + $0x8] sm:$0xff]  ;;  %v4967_v52 = vld [vmem:[%s5471_s1 + $0xe0] sm:$0xff]  ;;  %3881 = vmatprep.subr.bf16.mxu0 %v3880_v41  ;;  %v3886_v9 = vpack.c.bf16 %v4960_v48, %v4955_v47 }
  0x94   : > { %536 = vst [vmem:[#allocation3 + $0x2f] sm:$0x3] %v4519_v0  ;;  %537 = vst [vmem:[#allocation3 + $0x3f] sm:$0x3] %v4519_v0  ;;  %v4972_v53 = vld [vmem:[%s5471_s1 + $0xe8] sm:$0xff]  ;;  %v1022_v54 = vld [vmem:[%s5471_s1 + $0x150] sm:$0xff] }
  0x95   : > { %538 = vst [vmem:[#allocation3 + $0x4f] sm:$0x3] %v4519_v0  ;;  %539 = vst [vmem:[#allocation3 + $0x5f] sm:$0x3] %v4519_v0  ;;  %v1023_v55 = vld [vmem:[%s5471_s1 + $0x158] sm:$0xff]  ;;  %v571_v56 = vld [vmem:[%s4950_s17 + $0x10] sm:$0xff]  ;;  %3911 = vmatpush3.bf16.msra.mxu1 %v3908_v37  ;;  %v3888_v15 = vpack.c.bf16 %v4972_v53, %v4967_v52 }
  0x96   : > { %540 = vst [vmem:[#allocation3 + $0x6f] sm:$0x3] %v4519_v0  ;;  %542 = vst [vmem:[#allocation4] sm:$0x1] %v4519_v0  ;;  %v572_v58 = vld [vmem:[%s4950_s17 + $0x18] sm:$0xf]  ;;  %3913 = vmatprep.subr.bf16.mxu1 %v3912_v46  ;;  %v3916_v3 = vpack.c.bf16 %v1023_v55, %v1022_v54  ;;  %3883 = vmatpush3.bf16.msra.mxu0 %v3882_v51 }
  0x97   : > { %543 = vst [vmem:[#allocation4 + $0x8] sm:$0x3] %v4519_v0  ;;  %544 = vst [vmem:[#allocation4 + $0x11] sm:$0x3] %v4519_v0  ;;  %v3163_v59 = vld [vmem:[%s4950_s17 + $0x20] sm:$0xff]  ;;  %v3164_v60 = vld [vmem:[%s4950_s17 + $0x28] sm:$0xff]  ;;  %3885 = vmatprep.subr.bf16.mxu0 %v3884_v57 }
  0x98   : > { %545 = vst [vmem:[#allocation4 + $0x1a] sm:$0x3] %v4519_v0  ;;  %546 = vst [vmem:[#allocation4 + $0x23] sm:$0x3] %v4519_v0  ;;  %v1024_v61 = vld [vmem:[%s5471_s1 + $0x160] sm:$0xff]  ;;  %v1025_v62 = vld [vmem:[%s5471_s1 + $0x168] sm:$0xff] }
  0x99   : > { %547 = vst [vmem:[#allocation4 + $0x2c] sm:$0x3] %v4519_v0  ;;  %548 = vst [vmem:[#allocation4 + $0x35] sm:$0x3] %v4519_v0  ;;  %v3165_v63 = vld [vmem:[%s4950_s17 + $0x30] sm:$0xff]  ;;  %v3167_v2 = vld [vmem:[%s4950_s17 + $0x40] sm:$0xff]  ;;  %3915 = vmatpush3.bf16.msra.mxu1 %v3912_v46  ;;  %v3920_v24 = vpack.c.bf16 %v1025_v62, %v1024_v61 }
  0x9a   : > { %549 = vst [vmem:[#allocation4 + $0x3e] sm:$0x3] %v4519_v0  ;;  %550 = vst [vmem:[#allocation4 + $0x47] sm:$0x1] %v4519_v0  ;;  %v3166_v1 = vld [vmem:[%s4950_s17 + $0x38] sm:$0xf]  ;;  %3917 = vmatprep.subr.bf16.mxu1 %v3916_v3  ;;  %3887 = vmatpush3.bf16.msra.mxu0 %v3886_v9 }
  0x9b   : > { %551 = vst [vmem:[#allocation5] sm:$0x1] %v4519_v0  ;;  %552 = vst [vmem:[#allocation5 + $0x5] sm:$0x3] %v4519_v0  ;;  %v5002_v4 = vld [vmem:[%s5471_s1 + $0x60] sm:$0xff]  ;;  %v5007_v5 = vld [vmem:[%s5471_s1 + $0x68] sm:$0xff]  ;;  %3889 = vmatprep.subr.bf16.mxu0 %v3888_v15 }
  0x9c   : > { %553 = vst [vmem:[#allocation5 + $0xb] sm:$0x3] %v4519_v0  ;;  %554 = vst [vmem:[#allocation5 + $0x11] sm:$0x3] %v4519_v0  ;;  %v3168_v6 = vld [vmem:[%s4950_s17 + $0x48] sm:$0xff]  ;;  %v3169_v7 = vld [vmem:[%s4950_s17 + $0x50] sm:$0xff]  ;;  %v3890_v30 = vpack.c.bf16 %v5007_v5, %v5002_v4 }
  0x9d   : > { %555 = vst [vmem:[#allocation5 + $0x17] sm:$0x3] %v4519_v0  ;;  %556 = vst [vmem:[#allocation5 + $0x1d] sm:$0x3] %v4519_v0  ;;  %v3170_v8 = vld [vmem:[%s4950_s17 + $0x58] sm:$0xf]  ;;  %3919 = vmatpush3.bf16.msra.mxu1 %v3916_v3 }
  0x9e   : > { %557 = vst [vmem:[#allocation5 + $0x23] sm:$0x3] %v4519_v0  ;;  %558 = vst [vmem:[#allocation5 + $0x29] sm:$0x3] %v4519_v0  ;;  %v5020_v10 = vld [vmem:[%s5471_s1 + $0xf0] sm:$0xff]  ;;  %v5025_v11 = vld [vmem:[%s5471_s1 + $0xf8] sm:$0xff]  ;;  %3921 = vmatprep.subr.bf16.mxu1 %v3920_v24  ;;  %3891 = vmatpush3.bf16.msra.mxu0 %v3890_v30 }
  0x9f   : > { %559 = vst [vmem:[#allocation5 + $0x2f] sm:$0x1] %v4519_v0  ;;  %560 = vst [vmem:[#allocation6] sm:$0x1] %v4519_v0  ;;  %v3171_v12 = vld [vmem:[%s4950_s17 + $0x60] sm:$0xff]  ;;  %v3172_v13 = vld [vmem:[%s4950_s17 + $0x68] sm:$0xff]  ;;  %v3892_v34 = vpack.c.bf16 %v5025_v11, %v5020_v10 }
  0xa0   : > { %561 = vst [vmem:[#allocation6 + $0x5] sm:$0x3] %v4519_v0  ;;  %562 = vst [vmem:[#allocation6 + $0xb] sm:$0x3] %v4519_v0  ;;  %v3173_v14 = vld [vmem:[%s4950_s17 + $0x70] sm:$0xff]  ;;  %v3175_v17 = vld [vmem:[%s4950_s17 + $0x80] sm:$0xff] }
  0xa1   : > { %563 = vst [vmem:[#allocation6 + $0x11] sm:$0x3] %v4519_v0  ;;  %564 = vst [vmem:[#allocation6 + $0x17] sm:$0x3] %v4519_v0  ;;  %v3174_v16 = vld [vmem:[%s4950_s17 + $0x78] sm:$0xf]  ;;  %3893 = vmatprep.subr.bf16.mxu0 %v3892_v34  ;;  %3923 = vmatpush3.bf16.msra.mxu1 %v3920_v24 }
  0xa2   : > { %565 = vst [vmem:[#allocation6 + $0x1d] sm:$0x3] %v4519_v0  ;;  %566 = vst [vmem:[#allocation6 + $0x23] sm:$0x3] %v4519_v0  ;;  %v3176_v18 = vld [vmem:[%s4950_s17 + $0x88] sm:$0xff]  ;;  %v1026_v19 = vld [vmem:[%s5471_s1 + $0x170] sm:$0xff] }
  0xa3   : > { %567 = vst [vmem:[#allocation6 + $0x29] sm:$0x3] %v4519_v0  ;;  %568 = vst [vmem:[#allocation6 + $0x2f] sm:$0x1] %v4519_v0  ;;  %v1027_v20 = vld [vmem:[%s5471_s1 + $0x178] sm:$0xff]  ;;  %v3177_v21 = vld [vmem:[%s4950_s17 + $0x90] sm:$0xff] }
  0xa4   : > { %574 = vst.msk [vmem:[#allocation2 + $0x1] sm:$0xff] %vm573_vm0, %v569_v49  ;;  %575 = vst.msk [vmem:[#allocation2 + $0x9] sm:$0xff] %vm573_vm0, %v570_v50  ;;  %v3178_v22 = vld [vmem:[%s4950_s17 + $0x98] sm:$0xf]  ;;  %v3179_v23 = vld [vmem:[%s4950_s17 + $0xa0] sm:$0xff]  ;;  %v3924_v41 = vpack.c.bf16 %v1027_v20, %v1026_v19 }
  0xa5   : > { %576 = vst.msk [vmem:[#allocation2 + $0x11] sm:$0xff] %vm573_vm0, %v571_v56  ;;  %584 = vst.msk [vmem:[#allocation2 + $0x1f] sm:$0xff] %vm573_vm0, %v3163_v59  ;;  %v5056_v25 = vld [vmem:[%s5471_s1 + $0x70] sm:$0xff]  ;;  %v5061_v26 = vld [vmem:[%s5471_s1 + $0x78] sm:$0xff] }
  0xa6   : > { %578 = vst.msk [vmem:[#allocation2 + $0x19] sm:$0xf] %vm577_vm1, %v572_v58  ;;  %587 = vst.msk [vmem:[#allocation2 + $0x37] sm:$0xf] %vm577_vm1, %v3166_v1  ;;  %v3180_v31 = vld [vmem:[%s4950_s17 + $0xa8] sm:$0xff]  ;;  %v3181_v32 = vld [vmem:[%s4950_s17 + $0xb0] sm:$0xff]  ;;  %v3894_v45 = vpack.c.bf16 %v5061_v26, %v5056_v25  ;;  %3925 = vmatprep.subr.bf16.mxu1 %v3924_v41 }
  0xa7   : > { %585 = vst.msk [vmem:[#allocation2 + $0x27] sm:$0xff] %vm573_vm0, %v3164_v60  ;;  %586 = vst.msk [vmem:[#allocation2 + $0x2f] sm:$0xff] %vm573_vm0, %v3165_v63  ;;  %v3182_v33 = vld [vmem:[%s4950_s17 + $0xb8] sm:$0xf]  ;;  %v3183_v37 = vld [vmem:[%s4950_s17 + $0xc0] sm:$0xff]  ;;  %3927 = vmatpush3.bf16.msra.mxu1 %v3924_v41 }
  0xa8   : > { %593 = vst.msk [vmem:[#allocation2 + $0x3d] sm:$0xff] %vm573_vm0, %v3167_v2  ;;  %594 = vst.msk [vmem:[#allocation2 + $0x45] sm:$0xff] %vm573_vm0, %v3168_v6  ;;  %v3184_v52 = vld [vmem:[%s4950_s17 + $0xc8] sm:$0xff]  ;;  %3895 = vmatpush3.bf16.msra.mxu0 %v3894_v45  ;;  %v3185_v2 = vld [vmem:[%s4950_s17 + $0xd0] sm:$0xff] }
  0xa9   : > { %595 = vst.msk [vmem:[#allocation2 + $0x4d] sm:$0xff] %vm573_vm0, %v3169_v7  ;;  %602 = vst.msk [vmem:[#allocation2 + $0x5b] sm:$0xff] %vm573_vm0, %v3171_v12  ;;  %v3187_v10 = vld [vmem:[%s4950_s17 + $0xe0] sm:$0xff]  ;;  %v3188_v20 = vld [vmem:[%s4950_s17 + $0xe8] sm:$0xff] }
  0xaa   : > { %596 = vst.msk [vmem:[#allocation2 + $0x55] sm:$0xf] %vm577_vm1, %v3170_v8  ;;  %605 = vst.msk [vmem:[#allocation2 + $0x73] sm:$0xf] %vm577_vm1, %v3174_v16  ;;  %v3189_v25 = vld [vmem:[%s4950_s17 + $0xf0] sm:$0xff] }
  0xab   : > { %603 = vst.msk [vmem:[#allocation2 + $0x63] sm:$0xff] %vm573_vm0, %v3172_v13  ;;  %604 = vst.msk [vmem:[#allocation2 + $0x6b] sm:$0xff] %vm573_vm0, %v3173_v14  ;;  %v648_v27 = vld [vmem:[#allocation2 + $0x1] ss:$2 sm:$0xff]  ;;  %v5063_v28 = vld [vmem:[#allocation2] ss:$2 sm:$0xff] }
  0xac   : > { %611 = vst.msk [vmem:[#allocation2 + $0x79] sm:$0xff] %vm573_vm0, %v3175_v17  ;;  %612 = vst.msk [vmem:[#allocation2 + $0x81] sm:$0xff] %vm573_vm0, %v3176_v18  ;;  %v654_v29 = vld [vmem:[#allocation2 + $0x2] ss:$2 sm:$0xff]  ;;  %1099 = vmatprep.mubr.f32.mxu0 %v648_v27 }
  0xad   : > { %613 = vst.msk [vmem:[#allocation2 + $0x89] sm:$0xff] %vm573_vm0, %v3177_v21  ;;  %620 = vst.msk [vmem:[#allocation2 + $0x97] sm:$0xff] %vm573_vm0, %v3179_v23  ;;  %v650_v35 = vld [vmem:[#allocation2 + $0x11] ss:$2 sm:$0x3f]  ;;  %3676 = vmatprep.mubr.f32.mxu1 %v654_v29  ;;  %1100 = vmatmul.mubr.f32.vlgmr.msra.gmra.mrb[0].mxu0 %v5063_v28 }
  0xae   : > { %614 = vst.msk [vmem:[#allocation2 + $0x91] sm:$0xf] %vm577_vm1, %v3178_v22  ;;  %v676_v36 = vld [vmem:[#allocation2 + $0x1f] ss:$2 sm:$0xff]  ;;  %623 = vst.msk [vmem:[#allocation2 + $0xaf] sm:$0xf] %vm577_vm1, %v3182_v33 }
  0xaf   : > { %621 = vst.msk [vmem:[#allocation2 + $0x9f] sm:$0xff] %vm573_vm0, %v3180_v31  ;;  %622 = vst.msk [vmem:[#allocation2 + $0xa7] sm:$0xff] %vm573_vm0, %v3181_v32  ;;  %v681_v38 = vrot.slane %v676_v36, 2  ;;  %v644_v39 = vld [vmem:[#allocation2 + $0x10] ss:$2 sm:$0x3f] }
  0xb0   : > { %652 = vst [vmem:[#allocation7 + $0x20] sm:$0x3f] %v650_v35  ;;  %v660_v40 = vld [vmem:[#allocation2 + $0x1e] ss:$2 sm:$0xff]  ;;  %629 = vst.msk [vmem:[#allocation2 + $0xb5] sm:$0xff] %vm573_vm0, %v3183_v37 }
  0xb1   : > { %646 = vst [vmem:[#allocation7 + $0x18] sm:$0x3f] %v644_v39  ;;  %v666_v42 = vrot.slane %v660_v40, 2  ;;  %v656_v43 = vld [vmem:[#allocation2 + $0x12] ss:$2 sm:$0x3f] }
  0xb2   : > { %v691_v44 = vld [vmem:[#allocation2 + $0x20] ss:$2 sm:$0xff]  ;;  %687 = vst [vmem:[#allocation7 + $0x20] sm:$0xc0] %v681_v38  ;;  %658 = vst [vmem:[#allocation7 + $0x28] sm:$0x3f] %v656_v43 }
  0xb3   : > { %v696_v46 = vrot.slane %v691_v44, 2  ;;  %v678_v47 = vld [vmem:[#allocation2 + $0x2f] ss:$2 sm:$0x3f]  ;;  %v722_v48 = vld [vmem:[#allocation2 + $0x3d] ss:$2 sm:$0xff] }
  0xb4   : > { %672 = vst [vmem:[#allocation7 + $0x18] sm:$0xc0] %v666_v42  ;;  %v682_v49 = vrot.slane %v678_v47, 2  ;;  %v662_v50 = vld [vmem:[#allocation2 + $0x2e] ss:$2 sm:$0x3f] }
  0xb5   : > { %v727_v51 = vrot.slane %v722_v48, 4  ;;  %702 = vst [vmem:[#allocation7 + $0x28] sm:$0xc0] %v696_v46  ;;  %v667_v53 = vrot.slane %v662_v50, 2  ;;  %v706_v55 = vld [vmem:[#allocation2 + $0x3c] ss:$2 sm:$0xff] }
  0xb6   : > { %v693_v54 = vld [vmem:[#allocation2 + $0x30] ss:$2 sm:$0x3f]  ;;  %630 = vst.msk [vmem:[#allocation2 + $0xbd] sm:$0xff] %vm573_vm0, %v3184_v52  ;;  %v683_v56 = vsel %vm665_vm2, %v681_v38, %v682_v49  ;;  %689 = vst [vmem:[#allocation7 + $0x50] sm:$0xf] %v682_v49 }
  0xb7   : > { %733 = vst [vmem:[#allocation7 + $0x50] sm:$0xf0] %v727_v51  ;;  %v697_v57 = vrot.slane %v693_v54, 2  ;;  %v712_v58 = vrot.slane %v706_v55, 4  ;;  %v737_v59 = vld [vmem:[#allocation2 + $0x3e] ss:$2 sm:$0xff]  ;;  %v5086_v61 = vsel %vm665_vm2, %v666_v42, %v667_v53 }
  0xb8   : > { %v766_v60 = vld [vmem:[#allocation2 + $0x5b] ss:$2 sm:$0xff]  ;;  %674 = vst [vmem:[#allocation7 + $0x48] sm:$0xf] %v667_v53  ;;  %v742_v62 = vrot.slane %v737_v59, 4  ;;  %631 = vst.msk [vmem:[#allocation2 + $0xc5] sm:$0xff] %vm573_vm0, %v3185_v2 }
  0xb9   : > { %v724_v63 = vld [vmem:[#allocation2 + $0x4d] ss:$2 sm:$0x3f]  ;;  %v771_v1 = vrot.slane %v766_v60, 6  ;;  %v698_v3 = vsel %vm665_vm2, %v696_v46, %v697_v57  ;;  %704 = vst [vmem:[#allocation7 + $0x58] sm:$0xf] %v697_v57 }
  0xba   : > { %718 = vst [vmem:[#allocation7 + $0x48] sm:$0xf0] %v712_v58  ;;  %v728_v4 = vrot.slane %v724_v63, 4  ;;  %v708_v5 = vld [vmem:[#allocation2 + $0x4c] ss:$2 sm:$0x3f] }
  0xbb   : > { %v752_v6 = vld [vmem:[#allocation2 + $0x5a] ss:$2 sm:$0xff]  ;;  %748 = vst [vmem:[#allocation7 + $0x58] sm:$0xf0] %v742_v62  ;;  %v713_v7 = vrot.slane %v708_v5, 4  ;;  %638 = vst.msk [vmem:[#allocation2 + $0xd3] sm:$0xff] %vm573_vm0, %v3187_v10 }
  0xbc   : > { %776 = vst [vmem:[#allocation7 + $0x80] sm:$0xfc] %v771_v1  ;;  %v739_v8 = vld [vmem:[#allocation2 + $0x4e] ss:$2 sm:$0x3f]  ;;  %v758_v9 = vrot.slane %v752_v6, 6  ;;  %v5094_v12 = vsel %vm711_vm3, %v727_v51, %v728_v4 }
  0xbd   : > { %v942_v11 = vld [vmem:[#allocation7 + $0x20] sm:$0xff]  ;;  %735 = vst [vmem:[#allocation7 + $0x80] sm:$0x3] %v728_v4  ;;  %v743_v13 = vrot.slane %v739_v8, 4  ;;  %v941_v16 = vld [vmem:[#allocation7 + $0x18] sm:$0xff]  ;;  %v5100_v17 = vsel %vm711_vm3, %v712_v58, %v713_v7  ;;  %v943_v21 = vld [vmem:[#allocation7 + $0x28] sm:$0xff] }
  0xbe   : > { %v779_v14 = vld [vmem:[#allocation2 + $0x5c] ss:$2 sm:$0xff]  ;;  %v5096_v15 = vld [vmem:[#allocation2 + $0x79] ss:$2 sm:$0xff]  ;;  %1104 = vmatprep.mubr.f32.mxu0 %v942_v11  ;;  %720 = vst [vmem:[#allocation7 + $0x78] sm:$0x3] %v713_v7  ;;  %3677 = vmatmul.mubr.f32.vlgmr.msra.gmra.mrb[0].mxu1 %v943_v21 }
  0xbf   : > { %763 = vst [vmem:[#allocation7 + $0x78] sm:$0xfc] %v758_v9  ;;  %v784_v18 = vrot.slane %v779_v14, 6  ;;  %v768_v19 = vld [vmem:[#allocation2 + $0x6b] ss:$2 sm:$0x3f]  ;;  %v744_v22 = vsel %vm711_vm3, %v742_v62, %v743_v13  ;;  %1105 = vmatmul.mubr.f32.gmra.mrb[2].mxu0 %v941_v16  ;;  %3679 = vmatprep.mubr.f32.mxu1 %v698_v3 }
  0xc0   : > { %750 = vst [vmem:[#allocation7 + $0x88] sm:$0x3] %v743_v13  ;;  %v772_v23 = vrot.slane %v768_v19, 6  ;;  %v754_v24 = vld [vmem:[#allocation2 + $0x6a] ss:$2 sm:$0x3f]  ;;  %1109 = vmatprep.mubr.f32.mxu0 %v683_v56 }
  0xc1   : > { %639 = vst.msk [vmem:[#allocation2 + $0xdb] sm:$0xff] %vm573_vm0, %v3188_v20  ;;  %789 = vst [vmem:[#allocation7 + $0x88] sm:$0xfc] %v784_v18  ;;  %v759_v26 = vrot.slane %v754_v24, 6  ;;  %v5110_v30 = vld [vmem:[#allocation2 + $0x78] ss:$2 sm:$0xff] }
  0xc2   : > { %v781_v27 = vld [vmem:[#allocation2 + $0x6c] ss:$2 sm:$0x3f]  ;;  %640 = vst.msk [vmem:[#allocation2 + $0xe3] sm:$0xff] %vm573_vm0, %v3189_v25  ;;  %v5108_v28 = vsel %vm757_vm4, %v771_v1, %v772_v23  ;;  %v804_v31 = vld [vmem:[#allocation2 + $0x7a] ss:$2 sm:$0xff] }
  0xc3   : > { %v785_v29 = vrot.slane %v781_v27, 6  ;;  %v5113_v32 = vsel %vm757_vm4, %v758_v9, %v759_v26  ;;  %v800_v33 = vld [vmem:[#allocation2 + $0x89] ss:$2 sm:$0x3f]  ;;  %v825_v34 = vld [vmem:[#allocation2 + $0x97] ss:$2 sm:$0xff]  ;;  %1110 = vmatmul.mubr.f32.gmra.mrb[4].mxu0 %v5086_v61 }
  0xc4   : > { %v948_v35 = vld [vmem:[#allocation7 + $0x50] sm:$0xff]  ;;  %v949_v36 = vld [vmem:[#allocation7 + $0x58] sm:$0xff]  ;;  %802 = vst [vmem:[#allocation7 + $0xc8] sm:$0x3f] %v800_v33  ;;  %v830_v38 = vrot.slane %v825_v34, 2  ;;  %v947_v45 = vld [vmem:[#allocation7 + $0x48] sm:$0xff] }
  0xc5   : > { %v786_v37 = vsel %vm757_vm4, %v784_v18, %v785_v29  ;;  %v794_v39 = vld [vmem:[#allocation2 + $0x88] ss:$2 sm:$0x3f]  ;;  %3680 = vmatmul.mubr.f32.gmra.mrb[2].mxu1 %v949_v36  ;;  %v810_v40 = vld [vmem:[#allocation2 + $0x96] ss:$2 sm:$0xff]  ;;  %1114 = vmatprep.mubr.f32.mxu0 %v948_v35 }
  0xc6   : > { %796 = vst [vmem:[#allocation7 + $0xc0] sm:$0x3f] %v794_v39  ;;  %v827_v41 = vld [vmem:[#allocation2 + $0xa7] ss:$2 sm:$0x3f]  ;;  %3682 = vmatprep.mubr.f32.mxu1 %v744_v22  ;;  %v815_v42 = vrot.slane %v810_v40, 2 }
  0xc7   : > { %836 = vst [vmem:[#allocation7 + $0xc8] sm:$0xc0] %v830_v38  ;;  %v831_v43 = vrot.slane %v827_v41, 2  ;;  %v806_v44 = vld [vmem:[#allocation2 + $0x8a] ss:$2 sm:$0x3f]  ;;  %1115 = vmatmul.mubr.f32.gmra.mrb[6].mxu0 %v947_v45 }
  0xc8   : > { %808 = vst [vmem:[#allocation7 + $0xd0] sm:$0x3f] %v806_v44  ;;  %v840_v46 = vld [vmem:[#allocation2 + $0x98] ss:$2 sm:$0xff]  ;;  %821 = vst [vmem:[#allocation7 + $0xc0] sm:$0xc0] %v815_v42  ;;  %1119 = vmatprep.mubr.f32.mxu0 %v5094_v12 }
  0xc9   : > { %v812_v47 = vld [vmem:[#allocation2 + $0xa6] ss:$2 sm:$0x3f]  ;;  %v5118_v49 = vsel %vm665_vm2, %v830_v38, %v831_v43  ;;  %838 = vst [vmem:[#allocation7 + $0xf8] sm:$0xf] %v831_v43  ;;  %v845_v50 = vrot.slane %v840_v46, 2 }
  0xca   : > { %v955_v48 = vld [vmem:[#allocation7 + $0x88] sm:$0xff]  ;;  %v816_v51 = vrot.slane %v812_v47, 2  ;;  %v842_v52 = vld [vmem:[#allocation2 + $0xa8] ss:$2 sm:$0x3f]  ;;  %v954_v61 = vld [vmem:[#allocation7 + $0x80] sm:$0xff] }
  0xcb   : > { %3683 = vmatmul.mubr.f32.gmra.mrb[4].mxu1 %v955_v48  ;;  %v846_v53 = vrot.slane %v842_v52, 2  ;;  %v870_v54 = vld [vmem:[#allocation2 + $0xb5] ss:$2 sm:$0xff]  ;;  %v855_v55 = vld [vmem:[#allocation2 + $0xb4] ss:$2 sm:$0xff]  ;;  %1120 = vmatmul.mubr.f32.gmra.mrb[8].mxu0 %v5100_v17  ;;  %v4520_v43 = vmov 0.0|0.0  }
  0xcc   : > { %3685 = vmatprep.mubr.f32.mxu1 %v786_v37  ;;  %851 = vst [vmem:[#allocation7 + $0xd0] sm:$0xc0] %v845_v50  ;;  %v5121_v56 = vsel %vm665_vm2, %v815_v42, %v816_v51  ;;  %823 = vst [vmem:[#allocation7 + $0xf0] sm:$0xf] %v816_v51  ;;  %v875_v57 = vrot.slane %v870_v54, 4  ;;  %v860_v58 = vrot.slane %v855_v55, 4  ;;  %1124 = vmatprep.mubr.f32.mxu0 %v954_v61 }
  0xcd   : > { %v3186_v59 = vld [vmem:[%s4950_s17 + $0xd8] sm:$0xf]  ;;  %v847_v62 = vsel %vm665_vm2, %v845_v50, %v846_v53  ;;  %853 = vst [vmem:[#allocation7 + $0x100] sm:$0xf] %v846_v53  ;;  %v953_v8 = vld [vmem:[#allocation7 + $0x78] sm:$0xff]  ;;  %3960 = vmatprep.subr.bf16.mxu0 %v4520_v43  ;;  %v1530_v46 = vld [vmem:[#allocation14 + $0x90] sm:$0xff] }
  0xce   : > { %v885_v60 = vld [vmem:[#allocation2 + $0xb6] ss:$2 sm:$0xff]  ;;  %632 = vst.msk [vmem:[#allocation2 + $0xcd] sm:$0xf] %vm577_vm1, %v3186_v59  ;;  %v913_v1 = vld [vmem:[#allocation2 + $0xd3] ss:$2 sm:$0xff] }
  0xcf   : > { %v890_v63 = vrot.slane %v885_v60, 4  ;;  %v900_v2 = vld [vmem:[#allocation2 + $0xd2] ss:$2 sm:$0xff]  ;;  %881 = vst [vmem:[#allocation7 + $0xf8] sm:$0xf0] %v875_v57  ;;  %v918_v3 = vrot.slane %v913_v1, 6  ;;  %3686 = vmatmul.mubr.f32.gmra.mrb[6].mxu1 %v804_v31  ;;  %1125 = vmatmul.mubr.f32.gmra.mrb[10].mxu0 %v953_v8 }
  0xd0   : > { %866 = vst [vmem:[#allocation7 + $0xf0] sm:$0xf0] %v860_v58  ;;  %v905_v4 = vrot.slane %v900_v2, 6  ;;  %v926_v5 = vld [vmem:[#allocation2 + $0xd4] ss:$2 sm:$0xff]  ;;  %1129 = vmatprep.mubr.f32.mxu0 %v5108_v28  ;;  %v1531_v47 = vld [vmem:[#allocation14 + $0x98] sm:$0xff] }
  0xd1   : > { %v3190_v6 = vld [vmem:[%s4950_s17 + $0xf8] sm:$0xf]  ;;  %896 = vst [vmem:[#allocation7 + $0x100] sm:$0xf0] %v890_v63  ;;  %v931_v7 = vrot.slane %v926_v5, 6  ;;  %v963_v26 = vld [vmem:[#allocation7 + $0xc8] sm:$0xff] }
  0xd2   : > { %641 = vst.msk [vmem:[#allocation2 + $0xeb] sm:$0xf] %vm577_vm1, %v3190_v6  ;;  %923 = vst [vmem:[#allocation7 + $0x128] sm:$0xfc] %v918_v3  ;;  %v1544_v36 = vld [vmem:[#allocation14 + $0x100] sm:$0xff]  ;;  %v1545_v37 = vld [vmem:[#allocation14 + $0x108] sm:$0xff] }
  0xd3   : > { %910 = vst [vmem:[#allocation7 + $0x120] sm:$0xfc] %v905_v4  ;;  %936 = vst [vmem:[#allocation7 + $0x130] sm:$0xfc] %v931_v7  ;;  %v964_v9 = vld [vmem:[#allocation7 + $0xd0] sm:$0xff]  ;;  %1130 = vmatmul.mubr.f32.gmra.mrb[12].mxu0 %v5113_v32  ;;  %v962_v32 = vld [vmem:[#allocation7 + $0xc0] sm:$0xff]  ;;  %v3961_v39 = vpack.c.bf16 %v1545_v37, %v1544_v36 }
  0xd4   : > { %3688 = vmatprep.mubr.f32.mxu1 %v964_v9  ;;  %1134 = vmatprep.mubr.f32.mxu0 %v5096_v15  ;;  %v1528_v38 = vld [vmem:[#allocation14 + $0x80] sm:$0xff]  ;;  %v1529_v40 = vld [vmem:[#allocation14 + $0x88] sm:$0xff]  ;;  %v1546_v48 = vld [vmem:[#allocation14 + $0x110] sm:$0xff]  ;;  %s4437_s17 = scalar_lea.vmem %s5430_s30, 128 }
  0xd5   : > { %v872_v10 = vld [vmem:[#allocation2 + $0xc5] ss:$2 sm:$0x3f]  ;;  %v857_v11 = vld [vmem:[#allocation2 + $0xc4] ss:$2 sm:$0x3f]  ;;  %3689 = vmatmul.mubr.f32.gmra.mrb[8].mxu1 %v847_v62  ;;  %v3928_v44 = vpack.c.bf16 %v1529_v40, %v1528_v38  ;;  %3962 = vmatpush3.bf16.msra.mxu0 %v3961_v39  ;;  %p4438_p8 = scmp.ne.s32.totalorder %s5430_s30, %s4437_s17  ;;  %p4445_p9 = scmp.lt.s32.totalorder %s4443_s19, %s4437_s17 }
  0xd6   : > { %v876_v12 = vrot.slane %v872_v10, 4  ;;  %v861_v13 = vrot.slane %v857_v11, 4  ;;  %v887_v16 = vld [vmem:[#allocation2 + $0xc6] ss:$2 sm:$0x3f]  ;;  %v1513_v42 = vld [vmem:[#allocation14 + $0x8] sm:$0xff]  ;;  %3963 = vmatprep.subr.bf16.mxu0 %v4520_v43 }
  0xd7   : > { %v891_v19 = vrot.slane %v887_v16, 4  ;;  %1135 = vmatmul.mubr.f32.gmra.mrb[14].mxu0 %v5110_v30  ;;  %v969_v33 = vld [vmem:[#allocation7 + $0xf8] sm:$0xff]  ;;  %v968_v34 = vld [vmem:[#allocation7 + $0xf0] sm:$0xff]  ;;  %3929 = vmatprep.subr.bf16.mxu1 %v3928_v44  ;;  %v1514_v51 = vld [vmem:[#allocation14 + $0x10] sm:$0xff]  ;;  %p4439_p13 = pnand %p4438_p8, %p5522_p11  ;;  %p4446_p5 = por %p4445_p9, %p4444_p6 }
  0xd8   : > { %v970_v14 = vld [vmem:[#allocation7 + $0x100] sm:$0xff]  ;;  %v877_v18 = vsel %vm711_vm3, %v875_v57, %v876_v12  ;;  %883 = vst [vmem:[#allocation7 + $0x128] sm:$0x3] %v876_v12  ;;  %v862_v17 = vsel %vm711_vm3, %v860_v58, %v861_v13  ;;  %868 = vst [vmem:[#allocation7 + $0x120] sm:$0x3] %v861_v13  ;;  %1139 = vmatprep.mubr.f32.mxu0 %v963_v26  ;;  %v1512_v41 = vld [vmem:[#allocation14] sm:$0xff] }
  0xd9   : > { %3691 = vmatprep.mubr.f32.mxu1 %v970_v14  ;;  %v915_v20 = vld [vmem:[#allocation2 + $0xe3] ss:$2 sm:$0x3f]  ;;  %v928_v22 = vld [vmem:[#allocation2 + $0xe4] ss:$2 sm:$0x3f]  ;;  %v892_v23 = vsel %vm711_vm3, %v890_v63, %v891_v19  ;;  %v3930_v45 = vpack.c.bf16 %v1513_v42, %v1512_v41  ;;  %p4440_p1 = pneg %p4439_p13 }
  0xda   : > { %v919_v21 = vrot.slane %v915_v20, 6  ;;  %898 = vst [vmem:[#allocation7 + $0x130] sm:$0x3] %v891_v19  ;;  %v932_v24 = vrot.slane %v928_v22, 6  ;;  %3692 = vmatmul.mubr.f32.gmra.mrb[10].mxu1 %v892_v23  ;;  %v1547_v50 = vld [vmem:[#allocation14 + $0x118] sm:$0xff]  ;;  %v1532_v55 = vld [vmem:[#allocation14 + $0xa0] sm:$0xff] }
  0xdb   : > { %v902_v25 = vld [vmem:[#allocation2 + $0xe2] ss:$2 sm:$0x3f]  ;;  %1140 = vmatmul.mubr.f32.gmra.mrb[16].mxu0 %v962_v32  ;;  %3931 = vmatpush3.bf16.msra.mxu1 %v3930_v45  ;;  %v3964_v53 = vpack.c.bf16 %v1547_v50, %v1546_v48  ;;  %v1548_v57 = vld [vmem:[#allocation14 + $0x120] sm:$0xff]  ;;  %v1549_v59 = vld [vmem:[#allocation14 + $0x128] sm:$0xff]  ;;  %p4447_p0 = pnand %p4446_p5, %p4440_p1 }
  0xdc   : > { %v920_v27 = vsel %vm757_vm4, %v918_v3, %v919_v21  ;;  %v906_v28 = vrot.slane %v902_v25, 6  ;;  %v933_v29 = vsel %vm757_vm4, %v931_v7, %v932_v24  ;;  %1144 = vmatprep.mubr.f32.mxu0 %v5118_v49  ;;  %v3932_v49 = vpack.c.bf16 %v1531_v47, %v1530_v46  ;;  %v1515_v52 = vld [vmem:[#allocation14 + $0x18] sm:$0xff]  ;;  %v1516_v60 = vld [vmem:[#allocation14 + $0x20] sm:$0xff]  ;;  %v1517_v61 = vld [vmem:[#allocation14 + $0x28] sm:$0xff] }
  0xdd   : > { %v3934_v54 = vpack.c.bf16 %v1515_v52, %v1514_v51  ;;  %3965 = vmatpush3.bf16.msra.mxu0 %v3964_v53  ;;  %v3967_v62 = vpack.c.bf16 %v1549_v59, %v1548_v57  ;;  %v3938_v63 = vpack.c.bf16 %v1517_v61, %v1516_v60  ;;  %v1534_v1 = vld [vmem:[#allocation14 + $0xb0] sm:$0xff]  ;;  %v1535_v2 = vld [vmem:[#allocation14 + $0xb8] sm:$0xff]  ;;  %v1536_v10 = vld [vmem:[#allocation14 + $0xc0] sm:$0xff] }
  0xde   : > { %v907_v31 = vsel %vm757_vm4, %v905_v4, %v906_v28  ;;  %3933 = vmatprep.subr.bf16.mxu1 %v3932_v49  ;;  %3966 = vmatprep.subr.bf16.mxu0 %v4520_v43  ;;  %v1550_v3 = vld [vmem:[#allocation14 + $0x130] sm:$0xff]  ;;  %v3940_v4 = vpack.c.bf16 %v1535_v2, %v1534_v1  ;;  %v1551_v5 = vld [vmem:[#allocation14 + $0x138] sm:$0xff]  ;;  %v1537_v11 = vld [vmem:[#allocation14 + $0xc8] sm:$0xff] }
  0xdf   : > { %1145 = vmatmul.mubr.f32.gmra.mrb[18].mxu0 %v5121_v56  ;;  %v975_v35 = vld [vmem:[#allocation7 + $0x128] sm:$0xff]  ;;  %v974_v30 = vld [vmem:[#allocation7 + $0x120] sm:$0xff]  ;;  %3935 = vmatpush3.bf16.msra.mxu1 %v3934_v54  ;;  %v1519_v7 = vld [vmem:[#allocation14 + $0x38] sm:$0xff]  ;;  %v3970_v8 = vpack.c.bf16 %v1551_v5, %v1550_v3  ;;  %v3944_v13 = vpack.c.bf16 %v1537_v11, %v1536_v10 }
  0xe0   : > { %1149 = vmatprep.mubr.f32.mxu0 %v969_v33  ;;  %v1533_v56 = vld [vmem:[#allocation14 + $0xa8] sm:$0xff]  ;;  %v1518_v6 = vld [vmem:[#allocation14 + $0x30] sm:$0xff]  ;;  %v1552_v12 = vld [vmem:[#allocation14 + $0x140] sm:$0xff] }
  0xe1   : > { %v976_v15 = vld [vmem:[#allocation7 + $0x130] sm:$0xff]  ;;  %v3936_v58 = vpack.c.bf16 %v1533_v56, %v1532_v55  ;;  %3968 = vmatpush3.bf16.msra.mxu0 %v3967_v62  ;;  %v3942_v9 = vpack.c.bf16 %v1519_v7, %v1518_v6  ;;  %v1553_v14 = vld [vmem:[#allocation14 + $0x148] sm:$0xff]  ;;  %v1520_v16 = vld [vmem:[#allocation14 + $0x40] sm:$0xff] }
  0xe2   : > { %3694 = vmatprep.mubr.f32.mxu1 %v976_v15  ;;  %3969 = vmatprep.subr.bf16.mxu0 %v4520_v43  ;;  %v1538_v20 = vld [vmem:[#allocation14 + $0xd0] sm:$0xff]  ;;  %v1539_v21 = vld [vmem:[#allocation14 + $0xd8] sm:$0xff]  ;;  %v1556_v32 = vld [vmem:[#allocation14 + $0x160] sm:$0xff] }
  0xe3   : > { %3695 = vmatmul.mubr.f32.gmra.mrb[12].mxu1 %v933_v29  ;;  %1150 = vmatmul.mubr.f32.gmra.mrb[20].mxu0 %v968_v34  ;;  %v1554_v22 = vld [vmem:[#allocation14 + $0x150] sm:$0xff]  ;;  %v3948_v23 = vpack.c.bf16 %v1539_v21, %v1538_v20  ;;  %v1555_v24 = vld [vmem:[#allocation14 + $0x158] sm:$0xff]  ;;  %v1540_v29 = vld [vmem:[#allocation14 + $0xe0] sm:$0xff] }
  0xe4   : > { %1154 = vmatprep.mubr.f32.mxu0 %v877_v18  ;;  %3937 = vmatprep.subr.bf16.mxu1 %v3936_v58  ;;  %v1521_v18 = vld [vmem:[#allocation14 + $0x48] sm:$0xff]  ;;  %v1522_v25 = vld [vmem:[#allocation14 + $0x50] sm:$0xff]  ;;  %v1523_v26 = vld [vmem:[#allocation14 + $0x58] sm:$0xff] }
  0xe5   : > { %3939 = vmatpush3.bf16.msra.mxu1 %v3938_v63  ;;  %3971 = vmatpush3.bf16.msra.mxu0 %v3970_v8  ;;  %v3946_v19 = vpack.c.bf16 %v1521_v18, %v1520_v16  ;;  %v3950_v28 = vpack.c.bf16 %v1523_v26, %v1522_v25  ;;  %v1557_v33 = vld [vmem:[#allocation14 + $0x168] sm:$0xff]  ;;  %v1524_v34 = vld [vmem:[#allocation14 + $0x60] sm:$0xff]  ;;  %v1542_v37 = vld [vmem:[#allocation14 + $0xf0] sm:$0xff] }
  0xe6   : > { %3941 = vmatprep.subr.bf16.mxu1 %v3940_v4  ;;  %3972 = vmatprep.subr.bf16.mxu0 %v4520_v43  ;;  %v1543_v38 = vld [vmem:[#allocation14 + $0xf8] sm:$0xff]  ;;  %v1558_v39 = vld [vmem:[#allocation14 + $0x170] sm:$0xff] }
  0xe7   : > { %1155 = vmatmul.mubr.f32.gmra.mrb[22].mxu0 %v862_v17  ;;  %v3973_v17 = vpack.c.bf16 %v1553_v14, %v1552_v12  ;;  %v3956_v40 = vpack.c.bf16 %v1543_v38, %v1542_v37  ;;  %v1559_v41 = vld [vmem:[#allocation14 + $0x178] sm:$0xff]  ;;  %v1526_v42 = vld [vmem:[#allocation14 + $0x70] sm:$0xff] }
  0xe8   : > { %1159 = vmatprep.mubr.f32.mxu0 %v975_v35  ;;  %v1525_v35 = vld [vmem:[#allocation14 + $0x68] sm:$0xff]  ;;  %v1527_v44 = vld [vmem:[#allocation14 + $0x78] sm:$0xff]  ;;  %v3982_v45 = vpack.c.bf16 %v1559_v41, %v1558_v39  ;;  %v5155_v49 = vld [vmem:[%s5472_s2] ss:$0 sm:$0xff] }
  0xe9   : > { %3943 = vmatpush3.bf16.msra.mxu1 %v3942_v9  ;;  %3974 = vmatpush3.bf16.msra.mxu0 %v3973_v17  ;;  %v3954_v36 = vpack.c.bf16 %v1525_v35, %v1524_v34  ;;  %v3958_v46 = vpack.c.bf16 %v1527_v44, %v1526_v42 }
  0xea   : > { %3945 = vmatprep.subr.bf16.mxu1 %v3944_v13  ;;  %3975 = vmatprep.subr.bf16.mxu0 %v4520_v43 }
  0xeb   : > { %1160 = vmatmul.mubr.f32.gmra.mrb[24].mxu0 %v974_v30  ;;  %v3979_v30 = vpack.c.bf16 %v1557_v33, %v1556_v32 }
  0xec   : > { %1164 = vmatprep.mubr.f32.mxu0 %v920_v27  ;;  %v3976_v27 = vpack.c.bf16 %v1555_v24, %v1554_v22 }
  0xed   : > { %3947 = vmatpush3.bf16.msra.mxu1 %v3946_v19 }
  0xee   : > { %3949 = vmatprep.subr.bf16.mxu1 %v3948_v23  ;;  %3977 = vmatpush3.bf16.msra.mxu0 %v3976_v27 }
  0xef   : > { %1165 = vmatmul.mubr.f32.gmra.mrb[26].mxu0 %v907_v31  ;;  %v1541_v31 = vld [vmem:[#allocation14 + $0xe8] sm:$0xff]  ;;  %3978 = vmatprep.subr.bf16.mxu0 %v4520_v43 }
  0xf0   : > { %v3952_v15 = vpack.c.bf16 %v1541_v31, %v1540_v29  ;;  %3729 = vmatprep.mubr.msk.f32.mxu0 %vm4521_vm5, %v4519_v0 }
  0xf1   : > { %3951 = vmatpush3.bf16.msra.mxu1 %v3950_v28 }
  0xf2   : > { %3953 = vmatprep.subr.bf16.mxu1 %v3952_v15  ;;  %3980 = vmatpush3.bf16.msra.mxu0 %v3979_v30 }
  0xf3   : > { %3981 = vmatprep.subr.bf16.mxu0 %v4520_v43 }
  0xf5   : > { %3955 = vmatpush3.bf16.msra.mxu1 %v3954_v36 }
  0xf6   : > { %3957 = vmatprep.subr.bf16.mxu1 %v3956_v40  ;;  %3983 = vmatpush3.bf16.msra.mxu0 %v3982_v45 }
  0xf9   : > { %3959 = vmatpush3.bf16.msra.mxu1 %v3958_v46 }
 0x180   : > { %v3234_v47 = vpop.f32.mrb[0].mxu0 }
 0x181   : > { %v3235_v48 = vpop.f32.mrb[1].mxu0 }
 0x182   : > { %v3236_v43 = vadd.f32 %v3235_v48, %v3234_v47 }
 0x184   : > { %v1102_v52 = vadd.f32 %v3236_v43, %v5155_v49 }
 0x191   : > { %v3678_v50 = vpop.f32.mrb[0].mxu1 }
 0x192   : > { %v3237_v51 = vpop.f32.mrb[2].mxu0  ;;  %v1236_v53 = vpop.f32.mrb[1].mxu1 }
 0x193   : > { %v3238_v54 = vpop.f32.mrb[3].mxu0  ;;  %v1237_v56 = vadd.f32 %v1236_v53, %v1102_v52 }
 0x194   : > { %v3239_v55 = vadd.f32 %v3238_v54, %v3237_v51 }
 0x195   : > { %v1305_v59 = vmax.f32 %v1237_v56, 0.0 }
 0x196   : > { %v1107_v58 = vadd.f32 %v3239_v55, %v5155_v49  ;;  %v3240_v60 = vpop.f32.mrb[4].mxu0 }
 0x197   : > { %v3241_v62 = vpop.f32.mrb[5].mxu0  ;;  %1319 = vst [vmem:[#allocation3 + $0x1] sm:$0xff] %v1305_v59 }
 0x198   : > { %v3681_v57 = vpop.f32.mrb[2].mxu1  ;;  %v1242_v63 = vadd.f32 %v3678_v50, %v1107_v58  ;;  %v3242_v1 = vadd.f32 %v3241_v62, %v3240_v60 }
 0x199   : > { %v1246_v61 = vpop.f32.mrb[3].mxu1 }
 0x19a   : > { %v1306_v3 = vmax.f32 %v1242_v63, 0.0  ;;  %v3243_v4 = vpop.f32.mrb[6].mxu0  ;;  %v1112_v5 = vadd.f32 %v3242_v1, %v5155_v49 }
 0x19b   : > { %v3244_v7 = vpop.f32.mrb[7].mxu0 }
 0x19c   : > { %1320 = vst [vmem:[#allocation3 + $0x9] sm:$0x3f] %v1306_v3  ;;  %1321 = vst [vmem:[#allocation3 + $0xb] sm:$0xc0] %v1306_v3  ;;  %v3245_v8 = vadd.f32 %v3244_v7, %v3243_v4  ;;  %v1247_v9 = vadd.f32 %v1246_v61, %v1112_v5 }
 0x19e   : > { %v3684_v2 = vpop.f32.mrb[4].mxu1  ;;  %v1117_v11 = vadd.f32 %v3245_v8, %v5155_v49  ;;  %v1307_v12 = vmax.f32 %v1247_v9, 0.0  ;;  %v3246_v13 = vpop.f32.mrb[8].mxu0 }
 0x19f   : > { %v1256_v6 = vpop.f32.mrb[5].mxu1  ;;  %v3247_v16 = vpop.f32.mrb[9].mxu0 }
 0x1a0   : > { %v1252_v18 = vadd.f32 %v3681_v57, %v1117_v11  ;;  %1322 = vst [vmem:[#allocation3 + $0x13] sm:$0xff] %v1307_v12  ;;  %v3248_v17 = vadd.f32 %v3247_v16, %v3246_v13 }
 0x1a2   : > { %v5160_v10 = vpop.f32.mrb[6].mxu1  ;;  %v1308_v19 = vmax.f32 %v1252_v18, 0.0  ;;  %v3249_v20 = vpop.f32.mrb[10].mxu0  ;;  %v1122_v21 = vadd.f32 %v3248_v17, %v5155_v49 }
 0x1a3   : > { %v1266_v14 = vpop.f32.mrb[7].mxu1  ;;  %v1339_v22 = vld [vmem:[#allocation3] ss:$2 sm:$0x7f]  ;;  %v3250_v24 = vpop.f32.mrb[11].mxu0 }
 0x1a4   : > { %v1345_v23 = vld [vmem:[#allocation3 + $0x2] ss:$2 sm:$0x7f]  ;;  %1340 = vst [vmem:[#allocation8] sm:$0x7f] %v1339_v22  ;;  %v1257_v25 = vadd.f32 %v1256_v6, %v1122_v21  ;;  %v3251_v28 = vadd.f32 %v3250_v24, %v3249_v20 }
 0x1a5   : > { %1346 = vst [vmem:[#allocation8 + $0x10] sm:$0x7f] %v1345_v23  ;;  %1323 = vst [vmem:[#allocation3 + $0x1b] ss:$6 sps:$4 sm:$0xff] %v1308_v19  }
 0x1a6   : > { %v1342_v27 = vld [vmem:[#allocation3 + $0x1] ss:$2 sm:$0x7f]  ;;  %v1309_v31 = vmax.f32 %v1257_v25, 0.0  ;;  %v3252_v32 = vpop.f32.mrb[12].mxu0  ;;  %v1127_v15 = vadd.f32 %v3251_v28, %v5155_v49 }
 0x1a7   : > { %1343 = vst [vmem:[#allocation8 + $0x8] sm:$0x7f] %v1342_v27  ;;  %v3253_v33 = vpop.f32.mrb[13].mxu0 }
 0x1a8   : > { %v5164_v26 = vpop.f32.mrb[8].mxu1  ;;  %1325 = vst [vmem:[#allocation3 + $0x25] sm:$0xff] %v1309_v31  ;;  %v3254_v34 = vadd.f32 %v3253_v33, %v3252_v32  ;;  %v1262_v30 = vadd.f32 %v3684_v2, %v1127_v15 }
 0x1a9   : > { %v1276_v29 = vpop.f32.mrb[9].mxu1 }
 0x1aa   : > { %v3255_v37 = vpop.f32.mrb[14].mxu0  ;;  %v1132_v38 = vadd.f32 %v3254_v34, %v5155_v49  ;;  %v1310_v45 = vmax.f32 %v1262_v30, 0.0 }
 0x1ab   : > { %v3256_v48 = vpop.f32.mrb[15].mxu0 }
 0x1ac   : > { %v1348_v39 = vld [vmem:[#allocation3 + $0x10] ss:$2 sm:$0x7f]  ;;  %v1355_v40 = vld [vmem:[#allocation3 + $0x11] ss:$2 sm:$0x7f]  ;;  %v1267_v46 = vadd.f32 %v1266_v14, %v1132_v38  ;;  %v3257_v43 = vadd.f32 %v3256_v48, %v3255_v37 }
 0x1ad   : > { %v5167_v35 = vpop.f32.mrb[10].mxu1  ;;  %v1350_v41 = vrot.slane %v1348_v39, 1  ;;  %v1357_v42 = vrot.slane %v1355_v40, 1  ;;  %v1362_v44 = vld [vmem:[#allocation3 + $0x12] ss:$2 sm:$0x7f] }
 0x1ae   : > { %v5169_v36 = vpop.f32.mrb[11].mxu1  ;;  %v1364_v47 = vrot.slane %v1362_v44, 1  ;;  %1326 = vst [vmem:[#allocation3 + $0x2d] sm:$0x3] %v1310_v45  ;;  %1327 = vst [vmem:[#allocation3 + $0x2f] sm:$0xfc] %v1310_v45  ;;  %v1137_v55 = vadd.f32 %v3257_v43, %v5155_v49 }
 0x1af   : > { %1352 = vst [vmem:[#allocation8] sm:$0x80] %v1350_v41  ;;  %1353 = vst [vmem:[#allocation8 + $0x18] sm:$0x3f] %v1350_v41  ;;  %v1311_v50 = vmax.f32 %v1267_v46, 0.0  ;;  %v3258_v51 = vpop.f32.mrb[16].mxu0 }
 0x1b0   : > { %1359 = vst [vmem:[#allocation8 + $0x8] sm:$0x80] %v1357_v42  ;;  %1360 = vst [vmem:[#allocation8 + $0x20] sm:$0x3f] %v1357_v42  ;;  %v3259_v53 = vpop.f32.mrb[17].mxu0  ;;  %v1272_v59 = vadd.f32 %v5160_v10, %v1137_v55 }
 0x1b1   : > { %1366 = vst [vmem:[#allocation8 + $0x10] sm:$0x80] %v1364_v47  ;;  %1367 = vst [vmem:[#allocation8 + $0x28] sm:$0x3f] %v1364_v47  ;;  %v3260_v56 = vadd.f32 %v3259_v53, %v3258_v51 }
 0x1b2   : > { %v1369_v52 = vld [vmem:[#allocation3 + $0x20] ss:$2 sm:$0x7f]  ;;  %1328 = vst [vmem:[#allocation3 + $0x37] sm:$0xff] %v1311_v50  ;;  %v3261_v60 = vpop.f32.mrb[18].mxu0  ;;  %v1312_v63 = vmax.f32 %v1272_v59, 0.0 }
 0x1b3   : > { %v1371_v54 = vrot.slane %v1369_v52, 2  ;;  %v1142_v61 = vadd.f32 %v3260_v56, %v5155_v49  ;;  %v3262_v62 = vpop.f32.mrb[19].mxu0 }
 0x1b4   : > { %v3263_v1 = vadd.f32 %v3262_v62, %v3261_v60  ;;  %1329 = vst [vmem:[#allocation3 + $0x41] sm:$0xff] %v1312_v63 }
 0x1b5   : > { %1373 = vst [vmem:[#allocation8 + $0x18] sm:$0xc0] %v1371_v54  ;;  %1374 = vst [vmem:[#allocation8 + $0x30] sm:$0x1f] %v1371_v54  ;;  %v1277_v2 = vadd.f32 %v1276_v29, %v1142_v61 }
 0x1b6   : > { %v5173_v57 = vpop.f32.mrb[12].mxu1  ;;  %v1376_v3 = vld [vmem:[#allocation3 + $0x21] ss:$2 sm:$0x7f]  ;;  %v1147_v7 = vadd.f32 %v3263_v1, %v5155_v49  ;;  %v3264_v9 = vpop.f32.mrb[20].mxu0  ;;  %v1491_v22 = vld [vmem:[#allocation8] sm:$0xff] }
 0x1b7   : > { %v5175_v58 = vpop.f32.mrb[13].mxu1  ;;  %v1383_v4 = vld [vmem:[#allocation3 + $0x22] ss:$2 sm:$0x7f]  ;;  %v1378_v5 = vrot.slane %v1376_v3, 2  ;;  %v1313_v8 = vmax.f32 %v1277_v2, 0.0 }
 0x1b8   : > { %v1385_v6 = vrot.slane %v1383_v4, 2  ;;  %v1492_v11 = vld [vmem:[#allocation8 + $0x8] sm:$0xff]  ;;  %v1493_v12 = vld [vmem:[#allocation8 + $0x10] sm:$0xff]  ;;  %v1282_v17 = vadd.f32 %v5164_v26, %v1147_v7  ;;  %v3265_v19 = vpop.f32.mrb[21].mxu0 }
 0x1b9   : > { %v1390_v13 = vld [vmem:[#allocation3 + $0x30] ss:$2 sm:$0x7f]  ;;  %v1397_v10 = vld [vmem:[#allocation3 + $0x31] ss:$2 sm:$0x7f]  ;;  %1631 = vmatprep.mubr.f32.mxu1 %v1492_v11  ;;  %3730 = vmatmul.mubr.f32.vlgmr.msra.gmra.mrb[28].mxu0 %v1493_v12  ;;  %v3266_v21 = vadd.f32 %v3265_v19, %v3264_v9 }
 0x1ba   : > { %1380 = vst [vmem:[#allocation8 + $0x20] sm:$0xc0] %v1378_v5  ;;  %1381 = vst [vmem:[#allocation8 + $0x38] sm:$0x1f] %v1378_v5  ;;  %v1392_v14 = vrot.slane %v1390_v13, 3  ;;  %v1399_v16 = vrot.slane %v1397_v10, 3  ;;  %3732 = vmatprep.mubr.msk.f32.mxu0 %vm4521_vm5, %v4519_v0  ;;  %1632 = vmatmul.mubr.f32.vlgmr.msra.gmra.mrb[14].mxu1 %v1491_v22 }
 0x1bb   : > { %1387 = vst [vmem:[#allocation8 + $0x28] sm:$0xc0] %v1385_v6  ;;  %1388 = vst [vmem:[#allocation8 + $0x40] sm:$0x1f] %v1385_v6  ;;  %v1314_v23 = vmax.f32 %v1282_v17, 0.0  ;;  %v3267_v24 = vpop.f32.mrb[22].mxu0  ;;  %v1152_v27 = vadd.f32 %v3266_v21, %v5155_v49 }
 0x1bc   : > { %v1404_v18 = vld [vmem:[#allocation3 + $0x32] ss:$2 sm:$0x7f]  ;;  %1330 = vst [vmem:[#allocation3 + $0x49] sm:$0x3f] %v1313_v8  ;;  %v3268_v25 = vpop.f32.mrb[23].mxu0 }
 0x1bd   : > { %1331 = vst [vmem:[#allocation3 + $0x4b] sm:$0xc0] %v1313_v8  ;;  %v1406_v20 = vrot.slane %v1404_v18, 3  ;;  %1394 = vst [vmem:[#allocation8 + $0x48] ss:$-20 sps:$4 sm:$0xef] %v1392_v14   ;;  %v3269_v26 = vadd.f32 %v3268_v25, %v3267_v24  ;;  %v1287_v28 = vadd.f32 %v5169_v36, %v1152_v27 }
 0x1be   : > { %1401 = vst [vmem:[#allocation8 + $0x50] ss:$-20 sps:$4 sm:$0xef] %v1399_v16   ;;  %1332 = vst [vmem:[#allocation3 + $0x53] sm:$0xff] %v1314_v23  ;;  %v3270_v31 = vpop.f32.mrb[24].mxu0  ;;  %v1494_v46 = vld [vmem:[#allocation8 + $0x18] sm:$0xff] }
 0x1bf   : > { %1408 = vst [vmem:[#allocation8 + $0x58] ss:$-20 sps:$4 sm:$0xef] %v1406_v20   ;;  %v1157_v29 = vadd.f32 %v3269_v26, %v5155_v49  ;;  %v1315_v38 = vmax.f32 %v1287_v28, 0.0  ;;  %v3271_v42 = vpop.f32.mrb[25].mxu0  ;;  %v1923_v24 = vld [vmem:[#allocation17 + $0x80] sm:$0xff] }
 0x1c0   : > { %v3272_v36 = vadd.f32 %v3271_v42, %v3270_v31  ;;  %v1924_v25 = vld [vmem:[#allocation17 + $0x88] sm:$0xff]  ;;  %v1907_v26 = vld [vmem:[#allocation17] sm:$0xff]  ;;  %v1925_v31 = vld [vmem:[#allocation17 + $0x90] sm:$0xff] }
 0x1c1   : > { %v1292_v37 = vadd.f32 %v5167_v35, %v1157_v29  ;;  %v1495_v40 = vld [vmem:[#allocation8 + $0x20] sm:$0xff]  ;;  %1333 = vst [vmem:[#allocation3 + $0x5b] ss:$6 sps:$4 sm:$0xff] %v1315_v38   ;;  %v3984_v27 = vpack.c.bf16 %v1924_v25, %v1923_v24  ;;  %v1908_v28 = vld [vmem:[#allocation17 + $0x8] sm:$0xff]  ;;  %v1939_v42 = vld [vmem:[#allocation17 + $0x100] sm:$0xff] }
 0x1c2   : > { %v1496_v41 = vld [vmem:[#allocation8 + $0x28] sm:$0xff]  ;;  %1636 = vmatprep.mubr.f32.mxu1 %v1495_v40  ;;  %v3273_v47 = vpop.f32.mrb[26].mxu0  ;;  %v1162_v43 = vadd.f32 %v3272_v36, %v5155_v49  ;;  %v3986_v29 = vpack.c.bf16 %v1908_v28, %v1907_v26  ;;  %v1912_v40 = vld [vmem:[#allocation17 + $0x28] sm:$0xff]  ;;  %v1929_v36 = vld [vmem:[#allocation17 + $0xb0] sm:$0xff] }
 0x1c3   : > { %v1411_v32 = vld [vmem:[#allocation3 + $0x40] ss:$2 sm:$0x7f]  ;;  %v1418_v15 = vld [vmem:[#allocation3 + $0x41] ss:$2 sm:$0x7f]  ;;  %3733 = vmatmul.mubr.f32.gmra.mrb[30].mxu0 %v1496_v41  ;;  %1637 = vmatmul.mubr.f32.gmra.mrb[16].mxu1 %v1494_v46 }
 0x1c4   : > { %v1413_v33 = vrot.slane %v1411_v32, 4  ;;  %v1420_v34 = vrot.slane %v1418_v15, 4  ;;  %v1425_v30 = vld [vmem:[#allocation3 + $0x42] ss:$2 sm:$0x7f]  ;;  %v1316_v45 = vmax.f32 %v1292_v37, 0.0  ;;  %3735 = vmatprep.mubr.msk.f32.mxu0 %vm4521_vm5, %v4519_v0  ;;  %v1297_v52 = vadd.f32 %v5175_v58, %v1162_v43  ;;  %3985 = vmatprep.subr.bf16.mxu1 %v3984_v27 }
 0x1c5   : > { %v1427_v39 = vrot.slane %v1425_v30, 4  ;;  %v1498_v44 = vld [vmem:[#allocation8 + $0x38] sm:$0xff]  ;;  %v3274_v48 = vpop.f32.mrb[27].mxu0  ;;  %v1497_v51 = vld [vmem:[#allocation8 + $0x30] sm:$0xff]  ;;  %3987 = vmatpush3.bf16.msra.mxu1 %v3986_v29  ;;  %v1926_v32 = vld [vmem:[#allocation17 + $0x98] sm:$0xff] }
 0x1c6   : > { %1415 = vst [vmem:[#allocation8 + $0x60] ss:$-20 sps:$4 sm:$0xf7] %v1413_v33   ;;  %1422 = vst [vmem:[#allocation8 + $0x68] ss:$-20 sps:$4 sm:$0xf7] %v1420_v34   ;;  %1641 = vmatprep.mubr.f32.mxu1 %v1498_v44  ;;  %v3275_v50 = vadd.f32 %v3274_v48, %v3273_v47  ;;  %v3988_v15 = vpack.c.bf16 %v1926_v32, %v1925_v31 }
 0x1c7   : > { %1429 = vst [vmem:[#allocation8 + $0x70] ss:$-20 sps:$4 sm:$0xf7] %v1427_v39   ;;  %v1499_v35 = vld [vmem:[#allocation8 + $0x40] sm:$0xff]  ;;  %1335 = vst [vmem:[#allocation3 + $0x65] sm:$0xff] %v1316_v45  ;;  %1642 = vmatmul.mubr.f32.gmra.mrb[18].mxu1 %v1497_v51  ;;  %v1317_v54 = vmax.f32 %v1297_v52, 0.0 }
 0x1c8   : > { %3736 = vmatmul.mubr.f32.gmra.mrb[32].mxu0 %v1499_v35  ;;  %v1167_v53 = vadd.f32 %v3275_v50, %v5155_v49  ;;  %v1432_v56 = vld [vmem:[#allocation3 + $0x50] ss:$2 sm:$0x7f]  ;;  %v1439_v59 = vld [vmem:[#allocation3 + $0x51] ss:$2 sm:$0x7f]  ;;  %3989 = vmatprep.subr.bf16.mxu1 %v3988_v15 }
 0x1c9   : > { %3738 = vmatprep.mubr.msk.f32.mxu0 %vm4521_vm5, %v4519_v0  ;;  %v1434_v60 = vrot.slane %v1432_v56, 5  ;;  %v1441_v61 = vrot.slane %v1439_v59, 5  ;;  %v1446_v62 = vld [vmem:[#allocation3 + $0x52] ss:$2 sm:$0x7f]  ;;  %v1927_v30 = vld [vmem:[#allocation17 + $0xa0] sm:$0xff] }
 0x1ca   : > { %v1302_v55 = vadd.f32 %v5173_v57, %v1167_v53  ;;  %1336 = vst [vmem:[#allocation3 + $0x6d] sm:$0x3] %v1317_v54  ;;  %1337 = vst [vmem:[#allocation3 + $0x6f] sm:$0xfc] %v1317_v54  ;;  %v1448_v1 = vrot.slane %v1446_v62, 5  ;;  %v1909_v33 = vld [vmem:[#allocation17 + $0x10] sm:$0xff] }
 0x1cb   : > { %1436 = vst [vmem:[#allocation8 + $0x60] sm:$0xf8] %v1434_v60  ;;  %1437 = vst [vmem:[#allocation8 + $0x78] sm:$0x3] %v1434_v60  ;;  %v1910_v34 = vld [vmem:[#allocation17 + $0x18] sm:$0xff]  ;;  %v1928_v37 = vld [vmem:[#allocation17 + $0xa8] sm:$0xff] }
 0x1cc   : > { %v1318_v63 = vmax.f32 %v1302_v55, 0.0  ;;  %1443 = vst [vmem:[#allocation8 + $0x68] sm:$0xf8] %v1441_v61  ;;  %1444 = vst [vmem:[#allocation8 + $0x80] sm:$0x3] %v1441_v61  ;;  %v3992_v38 = vpack.c.bf16 %v1928_v37, %v1927_v30  ;;  %v1911_v39 = vld [vmem:[#allocation17 + $0x20] sm:$0xff] }
 0x1cd   : > { %v1501_v2 = vld [vmem:[#allocation8 + $0x50] sm:$0xff]  ;;  %v1500_v57 = vld [vmem:[#allocation8 + $0x48] sm:$0xff]  ;;  %1450 = vst [vmem:[#allocation8 + $0x70] sm:$0xf8] %v1448_v1  ;;  %1451 = vst [vmem:[#allocation8 + $0x88] sm:$0x3] %v1448_v1  ;;  %v3994_v41 = vpack.c.bf16 %v1912_v40, %v1911_v39 }
 0x1ce   : > { %v1453_v58 = vld [vmem:[#allocation3 + $0x60] ss:$2 sm:$0x7f]  ;;  %v1502_v3 = vld [vmem:[#allocation8 + $0x58] sm:$0xff]  ;;  %1338 = vst [vmem:[#allocation3 + $0x77] sm:$0xff] %v1318_v63  ;;  %1646 = vmatprep.mubr.f32.mxu1 %v1501_v2  ;;  %v1930_v46 = vld [vmem:[#allocation17 + $0xb8] sm:$0xff] }
 0x1cf   : > { %v1455_v49 = vrot.slane %v1453_v58, 6  ;;  %3739 = vmatmul.mubr.f32.gmra.mrb[34].mxu0 %v1502_v3  ;;  %1647 = vmatmul.mubr.f32.gmra.mrb[20].mxu1 %v1500_v57  ;;  %v1940_v44 = vld [vmem:[#allocation17 + $0x108] sm:$0xff]  ;;  %v3996_v47 = vpack.c.bf16 %v1930_v46, %v1929_v36  ;;  %v1913_v35 = vld [vmem:[#allocation17 + $0x30] sm:$0xff]  ;;  %v1914_v48 = vld [vmem:[#allocation17 + $0x38] sm:$0xff] }
 0x1d0   : > { %3741 = vmatprep.mubr.msk.f32.mxu0 %vm4521_vm5, %v4519_v0  ;;  %v4016_v45 = vpack.c.bf16 %v1940_v44, %v1939_v42  ;;  %v3998_v43 = vpack.c.bf16 %v1914_v48, %v1913_v35  ;;  %v1941_v50 = vld [vmem:[#allocation17 + $0x110] sm:$0xff]  ;;  %v1942_v51 = vld [vmem:[#allocation17 + $0x118] sm:$0xff]  ;;  %v1931_v53 = vld [vmem:[#allocation17 + $0xc0] sm:$0xff] }
 0x1d1   : > { %1457 = vst [vmem:[#allocation8 + $0x78] sm:$0xfc] %v1455_v49  ;;  %1458 = vst [vmem:[#allocation8 + $0x90] sm:$0x1] %v1455_v49  ;;  %v4020_v52 = vpack.c.bf16 %v1942_v51, %v1941_v50  ;;  %v1932_v54 = vld [vmem:[#allocation17 + $0xc8] sm:$0xff]  ;;  %v1915_v56 = vld [vmem:[#allocation17 + $0x40] sm:$0xff] }
 0x1d2   : > { %v1460_v4 = vld [vmem:[#allocation3 + $0x61] ss:$2 sm:$0x7f]  ;;  %v1467_v5 = vld [vmem:[#allocation3 + $0x62] ss:$2 sm:$0x7f]  ;;  %4017 = vmatprep.subr.bf16.mxu0 %v4016_v45  ;;  %v4000_v55 = vpack.c.bf16 %v1932_v54, %v1931_v53 }
 0x1d3   : > { %v1462_v6 = vrot.slane %v1460_v4, 6  ;;  %v1469_v7 = vrot.slane %v1467_v5, 6  ;;  %v1504_v8 = vld [vmem:[#allocation8 + $0x68] sm:$0xff]  ;;  %v1503_v9 = vld [vmem:[#allocation8 + $0x60] sm:$0xff]  ;;  %4019 = vmatpush3.bf16.msra.mxu0 %v4016_v45  ;;  %v1916_v59 = vld [vmem:[#allocation17 + $0x48] sm:$0xff] }
 0x1d4   : > { %1651 = vmatprep.mubr.f32.mxu1 %v1504_v8  ;;  %v1505_v12 = vld [vmem:[#allocation8 + $0x70] sm:$0xff]  ;;  %4021 = vmatprep.subr.bf16.mxu0 %v4020_v52  ;;  %v4002_v60 = vpack.c.bf16 %v1916_v59, %v1915_v56  ;;  %v1943_v61 = vld [vmem:[#allocation17 + $0x120] sm:$0xff]  ;;  %v1933_v1 = vld [vmem:[#allocation17 + $0xd0] sm:$0xff] }
 0x1d5   : > { %v1480_v11 = vld [vmem:[#allocation3 + $0x71] ss:$2 sm:$0x7f]  ;;  %1464 = vst [vmem:[#allocation8 + $0x80] sm:$0xfc] %v1462_v6  ;;  %3742 = vmatmul.mubr.f32.gmra.mrb[36].mxu0 %v1505_v12  ;;  %1652 = vmatmul.mubr.f32.gmra.mrb[22].mxu1 %v1503_v9  ;;  %v1944_v62 = vld [vmem:[#allocation17 + $0x128] sm:$0xff] }
 0x1d6   : > { %1465 = vst [vmem:[#allocation8 + $0x98] sm:$0x1] %v1462_v6  ;;  %1471 = vst [vmem:[#allocation8 + $0x88] sm:$0xfc] %v1469_v7  ;;  %v1482_v13 = vrot.slane %v1480_v11, 7  ;;  %3744 = vmatprep.mubr.msk.f32.mxu0 %vm4521_vm5, %v4519_v0  ;;  %v4024_v63 = vpack.c.bf16 %v1944_v62, %v1943_v61  ;;  %v1934_v58 = vld [vmem:[#allocation17 + $0xd8] sm:$0xff] }
 0x1d7   : > { %1472 = vst [vmem:[#allocation8 + $0xa0] sm:$0x1] %v1469_v7  ;;  %v1486_v10 = vld [vmem:[#allocation3 + $0x72] ss:$2 sm:$0x7f]  ;;  %4023 = vmatpush3.bf16.msra.mxu0 %v4020_v52  ;;  %v4004_v2 = vpack.c.bf16 %v1934_v58, %v1933_v1  ;;  %v1935_v7 = vld [vmem:[#allocation17 + $0xe0] sm:$0xff] }
 0x1d8   : > { %v1488_v14 = vrot.slane %v1486_v10, 7  ;;  %v1474_v16 = vld [vmem:[#allocation3 + $0x70] ss:$2 sm:$0x7f]  ;;  %1484 = vst [vmem:[#allocation8 + $0x98] sm:$0xfe] %v1482_v13  ;;  %4025 = vmatprep.subr.bf16.mxu0 %v4024_v63 }
 0x1d9   : > { %v1476_v18 = vrot.slane %v1474_v16, 7  ;;  %v1506_v20 = vld [vmem:[#allocation8 + $0x78] sm:$0xff]  ;;  %v1918_v49 = vld [vmem:[#allocation17 + $0x58] sm:$0xff]  ;;  %v1936_v8 = vld [vmem:[#allocation17 + $0xe8] sm:$0xff] }
 0x1da   : > { %1490 = vst [vmem:[#allocation8 + $0xa0] sm:$0xfe] %v1488_v14  ;;  %v1917_v3 = vld [vmem:[#allocation17 + $0x50] sm:$0xff]  ;;  %v1946_v5 = vld [vmem:[#allocation17 + $0x138] sm:$0xff]  ;;  %v4008_v9 = vpack.c.bf16 %v1936_v8, %v1935_v7  ;;  %v1919_v11 = vld [vmem:[#allocation17 + $0x60] sm:$0xff] }
 0x1db   : > { %1478 = vst [vmem:[#allocation8 + $0x90] sm:$0xfe] %v1476_v18  ;;  %v4006_v57 = vpack.c.bf16 %v1918_v49, %v1917_v3  ;;  %4027 = vmatpush3.bf16.msra.mxu0 %v4024_v63  ;;  %v1945_v4 = vld [vmem:[#allocation17 + $0x130] sm:$0xff]  ;;  %v1920_v12 = vld [vmem:[#allocation17 + $0x68] sm:$0xff]  ;;  %v1947_v10 = vld [vmem:[#allocation17 + $0x140] sm:$0xff] }
 0x1dc   : > { %v1507_v17 = vld [vmem:[#allocation8 + $0x80] sm:$0xff]  ;;  %v4028_v6 = vpack.c.bf16 %v1946_v5, %v1945_v4  ;;  %v4010_v13 = vpack.c.bf16 %v1920_v12, %v1919_v11  ;;  %v1948_v14 = vld [vmem:[#allocation17 + $0x148] sm:$0xff]  ;;  %v1937_v18 = vld [vmem:[#allocation17 + $0xf0] sm:$0xff] }
 0x1dd   : > { %v1508_v19 = vld [vmem:[#allocation8 + $0x88] sm:$0xff]  ;;  %1656 = vmatprep.mubr.f32.mxu1 %v1507_v17  ;;  %v4032_v16 = vpack.c.bf16 %v1948_v14, %v1947_v10  ;;  %v1938_v17 = vld [vmem:[#allocation17 + $0xf8] sm:$0xff]  ;;  %v1952_v26 = vld [vmem:[#allocation17 + $0x168] sm:$0xff] }
 0x1de   : > { %3745 = vmatmul.mubr.f32.gmra.mrb[38].mxu0 %v1508_v19  ;;  %1657 = vmatmul.mubr.f32.gmra.mrb[24].mxu1 %v1506_v20  ;;  %v4012_v19 = vpack.c.bf16 %v1938_v17, %v1937_v18  ;;  %v1921_v20 = vld [vmem:[#allocation17 + $0x70] sm:$0xff]  ;;  %v1950_v24 = vld [vmem:[#allocation17 + $0x158] sm:$0xff]  ;;  %v1951_v27 = vld [vmem:[#allocation17 + $0x160] sm:$0xff] }
 0x1df   : > { %3747 = vmatprep.mubr.msk.f32.mxu0 %vm4521_vm5, %v4519_v0  ;;  %v1510_v21 = vld [vmem:[#allocation8 + $0x98] sm:$0xff]  ;;  %v3990_v0 = vpack.c.bf16 %v1910_v34, %v1909_v33  ;;  %4029 = vmatprep.subr.bf16.mxu0 %v4028_v6  ;;  %v4040_v28 = vpack.c.bf16 %v1952_v26, %v1951_v27  ;;  %v1954_v31 = vld [vmem:[#allocation17 + $0x178] sm:$0xff] }
 0x1e0   : > { %1661 = vmatprep.mubr.f32.mxu1 %v1510_v21  ;;  %4031 = vmatpush3.bf16.msra.mxu0 %v4028_v6  ;;  %v1922_v21 = vld [vmem:[#allocation17 + $0x78] sm:$0xff]  ;;  %v1953_v29 = vld [vmem:[#allocation17 + $0x170] sm:$0xff] }
 0x1e1   : > { %v1511_v22 = vld [vmem:[#allocation8 + $0xa0] sm:$0xff]  ;;  %3991 = vmatpush3.bf16.msra.mxu1 %v3990_v0  ;;  %4033 = vmatprep.subr.bf16.mxu0 %v4032_v16  ;;  %v4044_v32 = vpack.c.bf16 %v1954_v31, %v1953_v29  ;;  %v5204_v0 = vld [vmem:[%s5474_s4] ss:$0 sm:$0xff] }
 0x1e2   : > { %v1509_v23 = vld [vmem:[#allocation8 + $0x90] sm:$0xff]  ;;  %3748 = vmatmul.mubr.f32.gmra.mrb[40].mxu0 %v1511_v22  ;;  %3993 = vmatprep.subr.bf16.mxu1 %v3992_v38  ;;  %v4014_v22 = vpack.c.bf16 %v1922_v21, %v1921_v20 }
 0x1e3   : > { %1662 = vmatmul.mubr.f32.gmra.mrb[26].mxu1 %v1509_v23  ;;  %v1949_v23 = vld [vmem:[#allocation17 + $0x150] sm:$0xff] }
 0x1e4   : > { %4035 = vmatpush3.bf16.msra.mxu0 %v4032_v16  ;;  %v4036_v25 = vpack.c.bf16 %v1950_v24, %v1949_v23 }
 0x1e5   : > { %3995 = vmatpush3.bf16.msra.mxu1 %v3994_v41 }
 0x1e6   : > { %3997 = vmatprep.subr.bf16.mxu1 %v3996_v47  ;;  %4037 = vmatprep.subr.bf16.mxu0 %v4036_v25 }
 0x1e8   : > { %4039 = vmatpush3.bf16.msra.mxu0 %v4036_v25 }
 0x1e9   : > { %3999 = vmatpush3.bf16.msra.mxu1 %v3998_v43  ;;  %4041 = vmatprep.subr.bf16.mxu0 %v4040_v28 }
 0x1ea   : > { %4001 = vmatprep.subr.bf16.mxu1 %v4000_v55 }
 0x1ec   : > { %4043 = vmatpush3.bf16.msra.mxu0 %v4040_v28 }
 0x1ed   : > { %4003 = vmatpush3.bf16.msra.mxu1 %v4002_v60  ;;  %4045 = vmatprep.subr.bf16.mxu0 %v4044_v32 }
 0x1ee   : > { %4005 = vmatprep.subr.bf16.mxu1 %v4004_v2 }
 0x1f0   : > { %4047 = vmatpush3.bf16.msra.mxu0 %v4044_v32 }
 0x1f1   : > { %4007 = vmatpush3.bf16.msra.mxu1 %v4006_v57 }
 0x1f2   : > { %4009 = vmatprep.subr.bf16.mxu1 %v4008_v9 }
 0x1f5   : > { %4011 = vmatpush3.bf16.msra.mxu1 %v4010_v13 }
 0x1f6   : > { %4013 = vmatprep.subr.bf16.mxu1 %v4012_v19 }
 0x1f9   : > { %4015 = vmatpush3.bf16.msra.mxu1 %v4014_v22 }
 0x28c   : > { %v1733_v15 = vpop.f32.mrb[28].mxu0 }
 0x28d   : > { %v3731_v33 = vpop.f32.mrb[29].mxu0  ;;  %v3338_v34 = vpop.f32.mrb[14].mxu1 }
 0x28e   : > { %v3339_v30 = vpop.f32.mrb[15].mxu1 }
 0x28f   : > { %v3340_v37 = vadd.f32 %v3339_v30, %v3338_v34 }
 0x291   : > { %v1634_v38 = vadd.f32 %v3340_v37, %v5204_v0 }
 0x293   : > { %v1734_v39 = vadd.f32 %v1733_v15, %v1634_v38 }
 0x295   : > { %v1767_v40 = vmax.f32 %v1734_v39, 0.0 }
 0x296   : > { %v1738_v41 = vpop.f32.mrb[30].mxu0  ;;  %v3341_v42 = vpop.f32.mrb[16].mxu1 }
 0x297   : > { %v3734_v44 = vpop.f32.mrb[31].mxu0  ;;  %1774 = vst [vmem:[#allocation4 + $0x1] sm:$0x7f] %v1767_v40  ;;  %1775 = vst [vmem:[#allocation4 + $0x3] sm:$0x80] %v1767_v40  ;;  %v3342_v45 = vpop.f32.mrb[17].mxu1 }
 0x298   : > { %v3343_v36 = vadd.f32 %v3342_v45, %v3341_v42 }
 0x29a   : > { %v1639_v47 = vadd.f32 %v3343_v36, %v5204_v0  ;;  %v3344_v35 = vpop.f32.mrb[18].mxu1 }
 0x29b   : > { %v1743_v46 = vpop.f32.mrb[32].mxu0  ;;  %v3345_v43 = vpop.f32.mrb[19].mxu1 }
 0x29c   : > { %v3737_v48 = vpop.f32.mrb[33].mxu0  ;;  %v1739_v50 = vadd.f32 %v1738_v41, %v1639_v47  ;;  %v3346_v51 = vadd.f32 %v3345_v43, %v3344_v35 }
 0x29e   : > { %v1768_v52 = vmax.f32 %v1739_v50, 0.0  ;;  %v1644_v53 = vadd.f32 %v3346_v51, %v5204_v0  ;;  %v1791_v54 = vld [vmem:[#allocation4 + $0x1] ss:$2 sm:$0xf] }
 0x29f   : > { %1792 = vst [vmem:[#allocation9 + $0x8] sm:$0xf] %v1791_v54  ;;  %v1794_v56 = vld [vmem:[#allocation4 + $0x2] ss:$2 sm:$0xf] }
 0x2a0   : > { %1776 = vst [vmem:[#allocation4 + $0xb] sm:$0x3f] %v1768_v52  ;;  %1777 = vst [vmem:[#allocation4 + $0xd] sm:$0xc0] %v1768_v52  ;;  %v1744_v59 = vadd.f32 %v1743_v46, %v1644_v53 }
 0x2a1   : > { %1795 = vst [vmem:[#allocation9 + $0x10] sm:$0xf] %v1794_v56  ;;  %v1788_v62 = vld [vmem:[#allocation4] ss:$2 sm:$0xf] }
 0x2a2   : > { %v1748_v55 = vpop.f32.mrb[34].mxu0  ;;  %v3347_v60 = vpop.f32.mrb[20].mxu1  ;;  %1789 = vst [vmem:[#allocation9] sm:$0xf] %v1788_v62  ;;  %v1769_v1 = vmax.f32 %v1744_v59, 0.0 }
 0x2a3   : > { %v3740_v61 = vpop.f32.mrb[35].mxu0  ;;  %v3348_v63 = vpop.f32.mrb[21].mxu1 }
 0x2a4   : > { %v3349_v58 = vadd.f32 %v3348_v63, %v3347_v60  ;;  %1778 = vst [vmem:[#allocation4 + $0x15] sm:$0x1f] %v1769_v1  ;;  %1779 = vst [vmem:[#allocation4 + $0x17] sm:$0xe0] %v1769_v1 }
 0x2a6   : > { %v1649_v2 = vadd.f32 %v3349_v58, %v5204_v0 }
 0x2a7   : > { %v1797_v49 = vld [vmem:[#allocation4 + $0x9] ss:$2 sm:$0xf]  ;;  %v1803_v57 = vld [vmem:[#allocation4 + $0xa] ss:$2 sm:$0xf] }
 0x2a8   : > { %v1749_v3 = vadd.f32 %v1748_v55, %v1649_v2  ;;  %v1799_v4 = vrot.slane %v1797_v49, 4  ;;  %v1753_v6 = vpop.f32.mrb[36].mxu0  ;;  %v3350_v7 = vpop.f32.mrb[22].mxu1  ;;  %v1805_v8 = vrot.slane %v1803_v57, 4 }
 0x2a9   : > { %v3743_v9 = vpop.f32.mrb[37].mxu0  ;;  %v3351_v11 = vpop.f32.mrb[23].mxu1  ;;  %v1809_v12 = vld [vmem:[#allocation4 + $0xb] ss:$2 sm:$0xf] }
 0x2aa   : > { %v1770_v5 = vmax.f32 %v1749_v3, 0.0  ;;  %1801 = vst [vmem:[#allocation9] sm:$0xf0] %v1799_v4  ;;  %v3352_v13 = vadd.f32 %v3351_v11, %v3350_v7  ;;  %1807 = vst [vmem:[#allocation9 + $0x8] sm:$0xf0] %v1805_v8  ;;  %v1811_v10 = vrot.slane %v1809_v12, 4 }
 0x2ab   : > { %v1818_v14 = vld [vmem:[#allocation4 + $0x13] ss:$2 sm:$0xf]  ;;  %v1821_v16 = vld [vmem:[#allocation4 + $0x14] ss:$2 sm:$0xf] }
 0x2ac   : > { %1780 = vst [vmem:[#allocation4 + $0x1f] ss:$6 sps:$4 sm:$0xff] %v1770_v5   ;;  %v1654_v18 = vadd.f32 %v3352_v13, %v5204_v0  ;;  %1813 = vst [vmem:[#allocation9 + $0x10] sm:$0xf0] %v1811_v10  ;;  %v2256_v8 = vld [vmem:[#allocation19 + $0x80] sm:$0xff]  ;;  %v2257_v9 = vld [vmem:[#allocation19 + $0x88] sm:$0xff] }
 0x2ad   : > { %1819 = vst [vmem:[#allocation9 + $0x20] sm:$0xf] %v1818_v14  ;;  %1822 = vst [vmem:[#allocation9 + $0x28] sm:$0xf] %v1821_v16  ;;  %v2240_v11 = vld [vmem:[#allocation19] sm:$0xff]  ;;  %v4048_v12 = vpack.c.bf16 %v2257_v9, %v2256_v8  ;;  %v2241_v13 = vld [vmem:[#allocation19 + $0x8] sm:$0xff] }
 0x2ae   : > { %v1815_v17 = vld [vmem:[#allocation4 + $0x12] ss:$2 sm:$0xf]  ;;  %v1754_v19 = vadd.f32 %v1753_v6, %v1654_v18  ;;  %v4050_v16 = vpack.c.bf16 %v2241_v13, %v2240_v11  ;;  %v2285_v8 = vld [vmem:[#allocation19 + $0x168] sm:$0xff] }
 0x2af   : > { %1816 = vst [vmem:[#allocation9 + $0x18] sm:$0xf] %v1815_v17  ;;  %v2258_v10 = vld [vmem:[#allocation19 + $0x90] sm:$0xff]  ;;  %v2259_v14 = vld [vmem:[#allocation19 + $0x98] sm:$0xff]  ;;  %v2272_v17 = vld [vmem:[#allocation19 + $0x100] sm:$0xff]  ;;  %4049 = vmatprep.subr.bf16.mxu1 %v4048_v12 }
 0x2b0   : > { %v1771_v21 = vmax.f32 %v1754_v19, 0.0  ;;  %v4052_v18 = vpack.c.bf16 %v2259_v14, %v2258_v10  ;;  %v2273_v19 = vld [vmem:[#allocation19 + $0x108] sm:$0xff]  ;;  %v2254_v9 = vld [vmem:[#allocation19 + $0x70] sm:$0xff]  ;;  %v2255_v11 = vld [vmem:[#allocation19 + $0x78] sm:$0xff] }
 0x2b1   : > { %v1758_v20 = vpop.f32.mrb[38].mxu0  ;;  %v3353_v22 = vpop.f32.mrb[24].mxu1  ;;  %v1896_v25 = vld [vmem:[#allocation9 + $0x8] sm:$0xff]  ;;  %v1895_v26 = vld [vmem:[#allocation9] sm:$0xff]  ;;  %v4078_v13 = vpack.c.bf16 %v2255_v11, %v2254_v9  ;;  %v2286_v10 = vld [vmem:[#allocation19 + $0x170] sm:$0xff] }
 0x2b2   : > { %v3746_v23 = vpop.f32.mrb[39].mxu0  ;;  %v3354_v27 = vpop.f32.mrb[25].mxu1  ;;  %1782 = vst [vmem:[#allocation4 + $0x29] sm:$0x7] %v1771_v21  ;;  %1783 = vst [vmem:[#allocation4 + $0x2b] sm:$0xf8] %v1771_v21  ;;  %2026 = vmatprep.mubr.f32.mxu1 %v1896_v25  ;;  %v4080_v21 = vpack.c.bf16 %v2273_v19, %v2272_v17 }
 0x2b3   : > { %v1836_v24 = vld [vmem:[#allocation4 + $0x1d] ss:$2 sm:$0xf]  ;;  %v3355_v29 = vadd.f32 %v3354_v27, %v3353_v22  ;;  %v1830_v31 = vld [vmem:[#allocation4 + $0x1c] ss:$2 sm:$0xf]  ;;  %2027 = vmatmul.mubr.f32.vlgmr.msra.gmra.mrb[28].mxu1 %v1895_v26 }
 0x2b4   : > { %v1838_v28 = vrot.slane %v1836_v24, 4  ;;  %v1897_v32 = vld [vmem:[#allocation9 + $0x10] sm:$0xff]  ;;  %v1832_v33 = vrot.slane %v1830_v31, 4  ;;  %v1824_v34 = vld [vmem:[#allocation4 + $0x1b] ss:$2 sm:$0xf]  ;;  %4051 = vmatpush3.bf16.msra.mxu1 %v4050_v16  ;;  %4081 = vmatprep.subr.bf16.mxu0 %v4080_v21 }
 0x2b5   : > { %v1763_v15 = vpop.f32.mrb[40].mxu0  ;;  %3782 = vmatprep.mubr.f32.mxu0 %v1897_v32  ;;  %v1659_v30 = vadd.f32 %v3355_v29, %v5204_v0  ;;  %v1826_v39 = vrot.slane %v1824_v34, 4  ;;  %v2243_v22 = vld [vmem:[#allocation19 + $0x18] sm:$0xff]  ;;  %4053 = vmatprep.subr.bf16.mxu1 %v4052_v18  ;;  %v2260_v24 = vld [vmem:[#allocation19 + $0xa0] sm:$0xff]  ;;  %v2261_v25 = vld [vmem:[#allocation19 + $0xa8] sm:$0xff] }
 0x2b6   : > { %1840 = vst [vmem:[#allocation9 + $0x28] sm:$0xf0] %v1838_v28  ;;  %v3356_v37 = vpop.f32.mrb[26].mxu1  ;;  %v3749_v38 = vpop.f32.mrb[41].mxu0  ;;  %1834 = vst [vmem:[#allocation9 + $0x20] sm:$0xf0] %v1832_v33  ;;  %v4056_v26 = vpack.c.bf16 %v2261_v25, %v2260_v24 }
 0x2b7   : > { %v3357_v40 = vpop.f32.mrb[27].mxu1  ;;  %v1759_v41 = vadd.f32 %v1758_v20, %v1659_v30  ;;  %1828 = vst [vmem:[#allocation9 + $0x18] sm:$0xf0] %v1826_v39  ;;  %v2242_v20 = vld [vmem:[#allocation19 + $0x10] sm:$0xff]  ;;  %v2275_v28 = vld [vmem:[#allocation19 + $0x118] sm:$0xff]  ;;  %v2244_v29 = vld [vmem:[#allocation19 + $0x20] sm:$0xff] }
 0x2b8   : > { %v3358_v42 = vadd.f32 %v3357_v40, %v3356_v37  ;;  %v4054_v23 = vpack.c.bf16 %v2243_v22, %v2242_v20  ;;  %v2274_v27 = vld [vmem:[#allocation19 + $0x110] sm:$0xff]  ;;  %v2245_v31 = vld [vmem:[#allocation19 + $0x28] sm:$0xff]  ;;  %v2263_v34 = vld [vmem:[#allocation19 + $0xb8] sm:$0xff] }
 0x2b9   : > { %v1772_v44 = vmax.f32 %v1759_v41, 0.0  ;;  %v1845_v36 = vld [vmem:[#allocation4 + $0x25] ss:$2 sm:$0xf]  ;;  %v4084_v32 = vpack.c.bf16 %v2275_v28, %v2274_v27  ;;  %v2262_v33 = vld [vmem:[#allocation19 + $0xb0] sm:$0xff]  ;;  %v2247_v40 = vld [vmem:[#allocation19 + $0x38] sm:$0xff] }
 0x2ba   : > { %v1664_v45 = vadd.f32 %v3358_v42, %v5204_v0  ;;  %v1848_v46 = vld [vmem:[#allocation4 + $0x26] ss:$2 sm:$0xf]  ;;  %1846 = vst [vmem:[#allocation9 + $0x38] sm:$0xf] %v1845_v36  ;;  %4055 = vmatpush3.bf16.msra.mxu1 %v4054_v23  ;;  %v4060_v37 = vpack.c.bf16 %v2263_v34, %v2262_v33  ;;  %v2246_v39 = vld [vmem:[#allocation19 + $0x30] sm:$0xff] }
 0x2bb   : > { %1784 = vst [vmem:[#allocation4 + $0x33] sm:$0x3] %v1772_v44  ;;  %1785 = vst [vmem:[#allocation4 + $0x35] sm:$0xfc] %v1772_v44  ;;  %4057 = vmatprep.subr.bf16.mxu1 %v4056_v26  ;;  %v2276_v30 = vld [vmem:[#allocation19 + $0x120] sm:$0xff]  ;;  %v2277_v38 = vld [vmem:[#allocation19 + $0x128] sm:$0xff]  ;;  %v4062_v42 = vpack.c.bf16 %v2247_v40, %v2246_v39 }
 0x2bc   : > { %v1764_v47 = vadd.f32 %v1763_v15, %v1664_v45  ;;  %1849 = vst [vmem:[#allocation9 + $0x40] sm:$0xf] %v1848_v46  ;;  %v1842_v35 = vld [vmem:[#allocation4 + $0x24] ss:$2 sm:$0xf]  ;;  %v4058_v15 = vpack.c.bf16 %v2245_v31, %v2244_v29  ;;  %v4088_v41 = vpack.c.bf16 %v2277_v38, %v2276_v30  ;;  %v2278_v36 = vld [vmem:[#allocation19 + $0x130] sm:$0xff] }
 0x2bd   : > { %v1900_v48 = vld [vmem:[#allocation9 + $0x28] sm:$0xff]  ;;  %1843 = vst [vmem:[#allocation9 + $0x30] sm:$0xf] %v1842_v35  ;;  %v1899_v50 = vld [vmem:[#allocation9 + $0x20] sm:$0xff]  ;;  %v2287_v14 = vld [vmem:[#allocation19 + $0x178] sm:$0xff] }
 0x2be   : > { %v1773_v43 = vmax.f32 %v1764_v47, 0.0  ;;  %3783 = vmatmul.mubr.f32.vlgmr.msra.gmra.mrb[42].mxu0 %v1900_v48  ;;  %2031 = vmatprep.mubr.f32.mxu1 %v1899_v50  ;;  %v1898_v51 = vld [vmem:[#allocation9 + $0x18] sm:$0xff]  ;;  %v2264_v44 = vld [vmem:[#allocation19 + $0xc0] sm:$0xff]  ;;  %v2265_v45 = vld [vmem:[#allocation19 + $0xc8] sm:$0xff]  ;;  %v4108_v16 = vpack.c.bf16 %v2287_v14, %v2286_v10 }
 0x2bf   : > { %2032 = vmatmul.mubr.f32.gmra.mrb[30].mxu1 %v1898_v51  ;;  %4083 = vmatpush3.bf16.msra.mxu0 %v4080_v21  ;;  %v4064_v46 = vpack.c.bf16 %v2265_v45, %v2264_v44  ;;  %v2279_v47 = vld [vmem:[#allocation19 + $0x138] sm:$0xff]  ;;  %v2248_v35 = vld [vmem:[#allocation19 + $0x40] sm:$0xff]  ;;  %v2249_v48 = vld [vmem:[#allocation19 + $0x48] sm:$0xff] }
 0x2c0   : > { %1786 = vst [vmem:[#allocation4 + $0x3d] sm:$0x1] %v1773_v43  ;;  %1787 = vst [vmem:[#allocation4 + $0x3f] sm:$0xfe] %v1773_v43  ;;  %4085 = vmatprep.subr.bf16.mxu0 %v4084_v32  ;;  %4059 = vmatpush3.bf16.msra.mxu1 %v4058_v15  ;;  %v4092_v43 = vpack.c.bf16 %v2279_v47, %v2278_v36  ;;  %v4066_v50 = vpack.c.bf16 %v2249_v48, %v2248_v35  ;;  %v2266_v51 = vld [vmem:[#allocation19 + $0xd0] sm:$0xff]  ;;  %v2589_v18 = vld [vmem:[#allocation20 + $0x80] sm:$0xff] }
 0x2c1   : > { %4061 = vmatprep.subr.bf16.mxu1 %v4060_v37  ;;  %v2590_v17 = vld [vmem:[#allocation20 + $0x88] sm:$0xff]  ;;  %v5216_v23 = vld [vmem:[%s5476_s6] ss:$0 sm:$0xff]  ;;  %v2573_v47 = vld [vmem:[#allocation20] sm:$0xff] }
 0x2c2   : > { %v1857_v52 = vld [vmem:[#allocation4 + $0x2e] ss:$2 sm:$0xf]  ;;  %v1863_v0 = vld [vmem:[#allocation4 + $0x2f] ss:$2 sm:$0xf]  ;;  %v4112_v19 = vpack.c.bf16 %v2590_v17, %v2589_v18 }
 0x2c3   : > { %v1859_v53 = vrot.slane %v1857_v52, 4  ;;  %v1865_v54 = vrot.slane %v1863_v0, 4  ;;  %v1851_v55 = vld [vmem:[#allocation4 + $0x2d] ss:$2 sm:$0xf]  ;;  %4087 = vmatpush3.bf16.msra.mxu0 %v4084_v32  ;;  %v2267_v52 = vld [vmem:[#allocation19 + $0xd8] sm:$0xff] }
 0x2c4   : > { %v1853_v56 = vrot.slane %v1851_v55, 4  ;;  %v1875_v59 = vld [vmem:[#allocation4 + $0x38] ss:$2 sm:$0xf]  ;;  %4089 = vmatprep.subr.bf16.mxu0 %v4088_v41  ;;  %4063 = vmatpush3.bf16.msra.mxu1 %v4062_v42  ;;  %v2280_v0 = vld [vmem:[#allocation19 + $0x140] sm:$0xff]  ;;  %v2250_v55 = vld [vmem:[#allocation19 + $0x50] sm:$0xff] }
 0x2c5   : > { %1861 = vst [vmem:[#allocation9 + $0x38] sm:$0xf0] %v1859_v53  ;;  %1867 = vst [vmem:[#allocation9 + $0x40] sm:$0xf0] %v1865_v54  ;;  %4065 = vmatprep.subr.bf16.mxu1 %v4064_v46  ;;  %v4068_v53 = vpack.c.bf16 %v2267_v52, %v2266_v51  ;;  %v2281_v54 = vld [vmem:[#allocation19 + $0x148] sm:$0xff] }
 0x2c6   : > { %1876 = vst [vmem:[#allocation9 + $0x58] sm:$0xf] %v1875_v59  ;;  %v1869_v60 = vld [vmem:[#allocation4 + $0x36] ss:$2 sm:$0xf]  ;;  %v4096_v59 = vpack.c.bf16 %v2281_v54, %v2280_v0  ;;  %v2574_v35 = vld [vmem:[#allocation20 + $0x8] sm:$0xff] }
 0x2c7   : > { %1855 = vst [vmem:[#allocation9 + $0x30] sm:$0xf0] %v1853_v56  ;;  %v1872_v61 = vld [vmem:[#allocation4 + $0x37] ss:$2 sm:$0xf]  ;;  %4091 = vmatpush3.bf16.msra.mxu0 %v4088_v41 }
 0x2c8   : > { %v1884_v62 = vld [vmem:[#allocation4 + $0x40] ss:$2 sm:$0xf]  ;;  %1870 = vst [vmem:[#allocation9 + $0x48] sm:$0xf] %v1869_v60  ;;  %4093 = vmatprep.subr.bf16.mxu0 %v4092_v43  ;;  %4067 = vmatpush3.bf16.msra.mxu1 %v4066_v50  ;;  %v2251_v56 = vld [vmem:[#allocation19 + $0x58] sm:$0xff] }
 0x2c9   : > { %1873 = vst [vmem:[#allocation9 + $0x50] sm:$0xf] %v1872_v61  ;;  %v1886_v63 = vrot.slane %v1884_v62, 4  ;;  %v1890_v1 = vld [vmem:[#allocation4 + $0x41] ss:$2 sm:$0xf]  ;;  %v4070_v60 = vpack.c.bf16 %v2251_v56, %v2250_v55  ;;  %4069 = vmatprep.subr.bf16.mxu1 %v4068_v53 }
 0x2ca   : > { %v1892_v58 = vrot.slane %v1890_v1, 4  ;;  %v1878_v2 = vld [vmem:[#allocation4 + $0x3f] ss:$2 sm:$0xf]  ;;  %v2269_v62 = vld [vmem:[#allocation19 + $0xe8] sm:$0xff] }
 0x2cb   : > { %1888 = vst [vmem:[#allocation9 + $0x50] sm:$0xf0] %v1886_v63  ;;  %v1880_v3 = vrot.slane %v1878_v2, 4  ;;  %4095 = vmatpush3.bf16.msra.mxu0 %v4092_v43  ;;  %v2268_v61 = vld [vmem:[#allocation19 + $0xe0] sm:$0xff]  ;;  %v2282_v63 = vld [vmem:[#allocation19 + $0x150] sm:$0xff] }
 0x2cc   : > { %1894 = vst [vmem:[#allocation9 + $0x58] sm:$0xf0] %v1892_v58  ;;  %v1902_v49 = vld [vmem:[#allocation9 + $0x38] sm:$0xff]  ;;  %v1903_v57 = vld [vmem:[#allocation9 + $0x40] sm:$0xff]  ;;  %4097 = vmatprep.subr.bf16.mxu0 %v4096_v59  ;;  %4071 = vmatpush3.bf16.msra.mxu1 %v4070_v60  ;;  %v4072_v1 = vpack.c.bf16 %v2269_v62, %v2268_v61 }
 0x2cd   : > { %1882 = vst [vmem:[#allocation9 + $0x48] sm:$0xf0] %v1880_v3  ;;  %2036 = vmatprep.mubr.f32.mxu1 %v1902_v49  ;;  %3785 = vmatprep.mubr.f32.mxu0 %v1903_v57  ;;  %v2283_v58 = vld [vmem:[#allocation19 + $0x158] sm:$0xff]  ;;  %v2252_v2 = vld [vmem:[#allocation19 + $0x60] sm:$0xff]  ;;  %v2253_v3 = vld [vmem:[#allocation19 + $0x68] sm:$0xff] }
 0x2ce   : > { %v1901_v4 = vld [vmem:[#allocation9 + $0x30] sm:$0xff]  ;;  %v4100_v49 = vpack.c.bf16 %v2283_v58, %v2282_v63  ;;  %v4074_v57 = vpack.c.bf16 %v2253_v3, %v2252_v2  ;;  %4073 = vmatprep.subr.bf16.mxu1 %v4072_v1  ;;  %v4114_v63 = vpack.c.bf16 %v2574_v35, %v2573_v47  ;;  %v2594_v47 = vld [vmem:[#allocation20 + $0xa8] sm:$0xff] }
 0x2cf   : > { %2037 = vmatmul.mubr.f32.gmra.mrb[32].mxu1 %v1901_v4  ;;  %4099 = vmatpush3.bf16.msra.mxu0 %v4096_v59  ;;  %v2270_v4 = vld [vmem:[#allocation19 + $0xf0] sm:$0xff] }
 0x2d0   : > { %4101 = vmatprep.subr.bf16.mxu0 %v4100_v49  ;;  %4075 = vmatpush3.bf16.msra.mxu1 %v4074_v57  ;;  %v2607_v35 = vld [vmem:[#allocation20 + $0x110] sm:$0xff] }
 0x2d2   : > { %v1905_v5 = vld [vmem:[#allocation9 + $0x50] sm:$0xff] }
 0x2d3   : > { %2041 = vmatprep.mubr.f32.mxu1 %v1905_v5  ;;  %v1906_v6 = vld [vmem:[#allocation9 + $0x58] sm:$0xff]  ;;  %4103 = vmatpush3.bf16.msra.mxu0 %v4100_v49 }
 0x2d4   : > { %3786 = vmatmul.mubr.f32.gmra.mrb[44].mxu0 %v1906_v6  ;;  %v1904_v7 = vld [vmem:[#allocation9 + $0x48] sm:$0xff]  ;;  %v2271_v5 = vld [vmem:[#allocation19 + $0xf8] sm:$0xff]  ;;  %v2284_v6 = vld [vmem:[#allocation19 + $0x160] sm:$0xff] }
 0x2d5   : > { %2042 = vmatmul.mubr.f32.gmra.mrb[34].mxu1 %v1904_v7  ;;  %v4076_v7 = vpack.c.bf16 %v2271_v5, %v2270_v4  ;;  %v4104_v12 = vpack.c.bf16 %v2285_v8, %v2284_v6 }
 0x2d7   : > { %4077 = vmatprep.subr.bf16.mxu1 %v4076_v7  ;;  %4105 = vmatprep.subr.bf16.mxu0 %v4104_v12 }
 0x2d8   : > { %4079 = vmatpush3.bf16.msra.mxu1 %v4078_v13  ;;  %4107 = vmatpush3.bf16.msra.mxu0 %v4104_v12 }
 0x2d9   : > { %4109 = vmatprep.subr.bf16.mxu0 %v4108_v16  ;;  %4113 = vmatprep.subr.bf16.mxu1 %v4112_v19 }
 0x2dc   : > { %4111 = vmatpush3.bf16.msra.mxu0 %v4108_v16 }
 0x386   : > { %v3414_v20 = vpop.f32.mrb[28].mxu1 }
 0x387   : > { %v3415_v21 = vpop.f32.mrb[29].mxu1 }
 0x388   : > { %v3416_v22 = vadd.f32 %v3415_v21, %v3414_v20 }
 0x38a   : > { %v2029_v25 = vadd.f32 %v3416_v22, %v5216_v23 }
 0x391   : > { %v3784_v24 = vpop.f32.mrb[42].mxu0 }
 0x392   : > { %v2113_v27 = vpop.f32.mrb[43].mxu0  ;;  %v3417_v26 = vpop.f32.mrb[30].mxu1 }
 0x393   : > { %v2114_v28 = vadd.f32 %v2113_v27, %v2029_v25  ;;  %v3418_v29 = vpop.f32.mrb[31].mxu1 }
 0x394   : > { %v3419_v32 = vadd.f32 %v3418_v29, %v3417_v26 }
 0x395   : > { %v2132_v31 = vmax.f32 %v2114_v28, 0.0 }
 0x396   : > { %v2034_v15 = vadd.f32 %v3419_v32, %v5216_v23 }
 0x397   : > { %2136 = vst [vmem:[#allocation5 + $0x1] ss:$6 sps:$4 sm:$0xff] %v2132_v31  }
 0x398   : > { %v2119_v33 = vadd.f32 %v3784_v24, %v2034_v15 }
 0x39a   : > { %v2133_v34 = vmax.f32 %v2119_v33, 0.0 }
 0x39c   : > { %2138 = vst [vmem:[#allocation5 + $0xd] ss:$6 sps:$4 sm:$0xff] %v2133_v34  }
 0x39e   : > { %v2144_v30 = vld [vmem:[#allocation5] sm:$0xf]  ;;  %v2150_v37 = vld [vmem:[#allocation5 + $0x6] sm:$0xf] }
 0x39f   : > { %v2155_v38 = vld [vmem:[#allocation5 + $0x7] sm:$0xf]  ;;  %2145 = vst [vmem:[#allocation10] sm:$0xf] %v2144_v30  ;;  %v2152_v39 = vrot.slane %v2150_v37, 4 }
 0x3a0   : > { %v2157_v40 = vrot.slane %v2155_v38, 4  ;;  %v2160_v41 = vld [vmem:[#allocation5 + $0x8] sm:$0xf]  ;;  %v2146_v42 = vld [vmem:[#allocation5 + $0x1] sm:$0xf]  ;;  %v2592_v38 = vld [vmem:[#allocation20 + $0x98] sm:$0xff] }
 0x3a1   : > { %v2162_v44 = vrot.slane %v2160_v41, 4  ;;  %2147 = vst [vmem:[#allocation10 + $0x8] sm:$0xf] %v2146_v42  ;;  %v2148_v45 = vld [vmem:[#allocation5 + $0x2] sm:$0xf]  ;;  %v2591_v37 = vld [vmem:[#allocation20 + $0x90] sm:$0xff] }
 0x3a2   : > { %2154 = vst [vmem:[#allocation10] sm:$0xf0] %v2152_v39  ;;  %2159 = vst [vmem:[#allocation10 + $0x8] sm:$0xf0] %v2157_v40  ;;  %v3420_v36 = vpop.f32.mrb[32].mxu1  ;;  %v2605_v39 = vld [vmem:[#allocation20 + $0x100] sm:$0xff]  ;;  %v4116_v40 = vpack.c.bf16 %v2592_v38, %v2591_v37 }
 0x3a3   : > { %2149 = vst [vmem:[#allocation10 + $0x10] sm:$0xf] %v2148_v45  ;;  %2164 = vst [vmem:[#allocation10 + $0x10] sm:$0xf0] %v2162_v44  ;;  %v3421_v46 = vpop.f32.mrb[33].mxu1  ;;  %v2606_v41 = vld [vmem:[#allocation20 + $0x108] sm:$0xff] }
 0x3a4   : > { %v2181_v48 = vld [vmem:[#allocation5 + $0x14] sm:$0xf]  ;;  %v3422_v43 = vadd.f32 %v3421_v46, %v3420_v36  ;;  %v2167_v50 = vld [vmem:[#allocation5 + $0xd] sm:$0xf]  ;;  %v4144_v45 = vpack.c.bf16 %v2606_v41, %v2605_v39  ;;  %v2593_v46 = vld [vmem:[#allocation20 + $0xa0] sm:$0xff] }
 0x3a5   : > { %v2176_v51 = vld [vmem:[#allocation5 + $0x13] sm:$0xf]  ;;  %v2183_v52 = vrot.slane %v2181_v48, 4  ;;  %2168 = vst [vmem:[#allocation10 + $0x20] sm:$0xf] %v2167_v50  ;;  %v2575_v42 = vld [vmem:[#allocation20 + $0x10] sm:$0xff]  ;;  %v4120_v48 = vpack.c.bf16 %v2594_v47, %v2593_v46 }
 0x3a6   : > { %v2178_v0 = vrot.slane %v2176_v51, 4  ;;  %v2169_v53 = vld [vmem:[#allocation5 + $0xe] sm:$0xf]  ;;  %v2039_v56 = vadd.f32 %v3422_v43, %v5216_v23  ;;  %v2171_v59 = vld [vmem:[#allocation5 + $0x12] sm:$0xf]  ;;  %4145 = vmatprep.subr.bf16.mxu0 %v4144_v45  ;;  %v2577_v50 = vld [vmem:[#allocation20 + $0x20] sm:$0xff] }
 0x3a7   : > { %v2165_v54 = vld [vmem:[#allocation5 + $0xc] sm:$0xf]  ;;  %v3787_v55 = vpop.f32.mrb[44].mxu0  ;;  %2170 = vst [vmem:[#allocation10 + $0x28] sm:$0xf] %v2169_v53  ;;  %v2173_v62 = vrot.slane %v2171_v59, 4 }
 0x3a8   : > { %2166 = vst [vmem:[#allocation10 + $0x18] sm:$0xf] %v2165_v54  ;;  %2185 = vst [vmem:[#allocation10 + $0x28] sm:$0xf0] %v2183_v52  ;;  %v3423_v60 = vpop.f32.mrb[34].mxu1  ;;  %v2123_v61 = vpop.f32.mrb[45].mxu0 }
 0x3a9   : > { %2180 = vst [vmem:[#allocation10 + $0x20] sm:$0xf0] %v2178_v0  ;;  %v2124_v1 = vadd.f32 %v2123_v61, %v2039_v56  ;;  %v3424_v58 = vpop.f32.mrb[35].mxu1  ;;  %v2229_v2 = vld [vmem:[#allocation10 + $0x8] sm:$0xff]  ;;  %v2228_v3 = vld [vmem:[#allocation10] sm:$0xff]  ;;  %v2576_v44 = vld [vmem:[#allocation20 + $0x18] sm:$0xff] }
 0x3aa   : > { %v3425_v49 = vadd.f32 %v3424_v58, %v3423_v60  ;;  %2359 = vmatprep.mubr.f32.mxu1 %v2229_v2  ;;  %v2230_v57 = vld [vmem:[#allocation10 + $0x10] sm:$0xff]  ;;  %2175 = vst [vmem:[#allocation10 + $0x18] sm:$0xf0] %v2173_v62  ;;  %v4118_v36 = vpack.c.bf16 %v2576_v44, %v2575_v42  ;;  %v2608_v43 = vld [vmem:[#allocation20 + $0x118] sm:$0xff]  ;;  %v2578_v52 = vld [vmem:[#allocation20 + $0x28] sm:$0xff] }
 0x3ab   : > { %v2134_v4 = vmax.f32 %v2124_v1, 0.0  ;;  %3820 = vmatprep.mubr.f32.mxu0 %v2230_v57  ;;  %2360 = vmatmul.mubr.f32.vlgmr.msra.gmra.mrb[36].mxu1 %v2228_v3  ;;  %v4148_v51 = vpack.c.bf16 %v2608_v43, %v2607_v35  ;;  %v4122_v0 = vpack.c.bf16 %v2578_v52, %v2577_v50  ;;  %v2595_v53 = vld [vmem:[#allocation20 + $0xb0] sm:$0xff]  ;;  %v2596_v54 = vld [vmem:[#allocation20 + $0xb8] sm:$0xff]  ;;  %v2610_v59 = vld [vmem:[#allocation20 + $0x128] sm:$0xff] }
 0x3ac   : > { %v2044_v5 = vadd.f32 %v3425_v49, %v5216_v23  ;;  %4115 = vmatpush3.bf16.msra.mxu1 %v4114_v63  ;;  %v4124_v56 = vpack.c.bf16 %v2596_v54, %v2595_v53  ;;  %v2579_v60 = vld [vmem:[#allocation20 + $0x30] sm:$0xff]  ;;  %v2580_v61 = vld [vmem:[#allocation20 + $0x38] sm:$0xff]  ;;  %v2597_v1 = vld [vmem:[#allocation20 + $0xc0] sm:$0xff] }
 0x3ad   : > { %2140 = vst [vmem:[#allocation5 + $0x19] ss:$6 sps:$4 sm:$0xff] %v2134_v4   ;;  %4117 = vmatprep.subr.bf16.mxu1 %v4116_v40  ;;  %v4126_v63 = vpack.c.bf16 %v2580_v61, %v2579_v60  ;;  %v2598_v58 = vld [vmem:[#allocation20 + $0xc8] sm:$0xff]  ;;  %v2611_v2 = vld [vmem:[#allocation20 + $0x130] sm:$0xff]  ;;  %v2612_v49 = vld [vmem:[#allocation20 + $0x138] sm:$0xff] }
 0x3ae   : > { %v2129_v6 = vadd.f32 %v3787_v55, %v2044_v5  ;;  %v2609_v55 = vld [vmem:[#allocation20 + $0x120] sm:$0xff]  ;;  %v4128_v3 = vpack.c.bf16 %v2598_v58, %v2597_v1  ;;  %v2582_v4 = vld [vmem:[#allocation20 + $0x48] sm:$0xff]  ;;  %v4156_v5 = vpack.c.bf16 %v2612_v49, %v2611_v2  ;;  %v2620_v37 = vld [vmem:[#allocation20 + $0x178] sm:$0xff] }
 0x3af   : > { %v2233_v8 = vld [vmem:[#allocation10 + $0x28] sm:$0xff]  ;;  %v4152_v62 = vpack.c.bf16 %v2610_v59, %v2609_v55  ;;  %v2581_v57 = vld [vmem:[#allocation20 + $0x40] sm:$0xff]  ;;  %v3194_v41 = vld [vmem:[%s5478_s8] ss:$0 sm:$0xff] }
 0x3b0   : > { %v2232_v7 = vld [vmem:[#allocation10 + $0x20] sm:$0xff]  ;;  %v2135_v9 = vmax.f32 %v2129_v6, 0.0  ;;  %3821 = vmatmul.mubr.f32.vlgmr.msra.gmra.mrb[46].mxu0 %v2233_v8  ;;  %4119 = vmatpush3.bf16.msra.mxu1 %v4118_v36  ;;  %v4130_v6 = vpack.c.bf16 %v2582_v4, %v2581_v57  ;;  %v2600_v8 = vld [vmem:[#allocation20 + $0xd8] sm:$0xff] }
 0x3b1   : > { %2364 = vmatprep.mubr.f32.mxu1 %v2232_v7  ;;  %v2231_v11 = vld [vmem:[#allocation10 + $0x18] sm:$0xff]  ;;  %4147 = vmatpush3.bf16.msra.mxu0 %v4144_v45  ;;  %v2599_v7 = vld [vmem:[#allocation20 + $0xd0] sm:$0xff] }
 0x3b2   : > { %2142 = vst [vmem:[#allocation5 + $0x25] ss:$6 sps:$4 sm:$0xff] %v2135_v9   ;;  %2365 = vmatmul.mubr.f32.gmra.mrb[38].mxu1 %v2231_v11  ;;  %4121 = vmatprep.subr.bf16.mxu1 %v4120_v48  ;;  %v2613_v9 = vld [vmem:[#allocation20 + $0x140] sm:$0xff]  ;;  %v4132_v11 = vpack.c.bf16 %v2600_v8, %v2599_v7 }
 0x3b3   : > { %4149 = vmatprep.subr.bf16.mxu0 %v4148_v51 }
 0x3b4   : > { %v2192_v12 = vld [vmem:[#allocation5 + $0x1e] sm:$0xf]  ;;  %v2188_v17 = vld [vmem:[#allocation5 + $0x19] sm:$0xf]  ;;  %4123 = vmatpush3.bf16.msra.mxu1 %v4122_v0 }
 0x3b5   : > { %v2197_v13 = vld [vmem:[#allocation5 + $0x1f] sm:$0xf]  ;;  %v2194_v14 = vrot.slane %v2192_v12, 4  ;;  %2189 = vst [vmem:[#allocation10 + $0x38] sm:$0xf] %v2188_v17  ;;  %4151 = vmatpush3.bf16.msra.mxu0 %v4148_v51  ;;  %4125 = vmatprep.subr.bf16.mxu1 %v4124_v56 }
 0x3b6   : > { %v2202_v10 = vld [vmem:[#allocation5 + $0x20] sm:$0xf]  ;;  %v2199_v16 = vrot.slane %v2197_v13, 4  ;;  %v2190_v19 = vld [vmem:[#allocation5 + $0x1a] sm:$0xf]  ;;  %4153 = vmatprep.subr.bf16.mxu0 %v4152_v62  ;;  %v2583_v13 = vld [vmem:[#allocation20 + $0x50] sm:$0xff] }
 0x3b7   : > { %v2204_v18 = vrot.slane %v2202_v10, 4  ;;  %v2186_v20 = vld [vmem:[#allocation5 + $0x18] sm:$0xf]  ;;  %2196 = vst [vmem:[#allocation10 + $0x30] sm:$0xf0] %v2194_v14  ;;  %v2614_v12 = vld [vmem:[#allocation20 + $0x148] sm:$0xff] }
 0x3b8   : > { %2201 = vst [vmem:[#allocation10 + $0x38] sm:$0xf0] %v2199_v16  ;;  %2191 = vst [vmem:[#allocation10 + $0x40] sm:$0xf] %v2190_v19  ;;  %4127 = vmatpush3.bf16.msra.mxu1 %v4126_v63  ;;  %v2584_v10 = vld [vmem:[#allocation20 + $0x58] sm:$0xff]  ;;  %v4160_v14 = vpack.c.bf16 %v2614_v12, %v2613_v9  ;;  %v2602_v17 = vld [vmem:[#allocation20 + $0xe8] sm:$0xff] }
 0x3b9   : > { %2206 = vst [vmem:[#allocation10 + $0x40] sm:$0xf0] %v2204_v18  ;;  %2187 = vst [vmem:[#allocation10 + $0x30] sm:$0xf] %v2186_v20  ;;  %v2209_v21 = vld [vmem:[#allocation5 + $0x25] sm:$0xf]  ;;  %4155 = vmatpush3.bf16.msra.mxu0 %v4152_v62  ;;  %4129 = vmatprep.subr.bf16.mxu1 %v4128_v3  ;;  %v4134_v16 = vpack.c.bf16 %v2584_v10, %v2583_v13 }
 0x3ba   : > { %v2218_v22 = vld [vmem:[#allocation5 + $0x2b] sm:$0xf]  ;;  %v2211_v23 = vld [vmem:[#allocation5 + $0x26] sm:$0xf]  ;;  %2210 = vst [vmem:[#allocation10 + $0x50] sm:$0xf] %v2209_v21  ;;  %4157 = vmatprep.subr.bf16.mxu0 %v4156_v5 }
 0x3bb   : > { %v2220_v24 = vrot.slane %v2218_v22, 4  ;;  %2212 = vst [vmem:[#allocation10 + $0x58] sm:$0xf] %v2211_v23  ;;  %v2223_v25 = vld [vmem:[#allocation5 + $0x2c] sm:$0xf]  ;;  %v2601_v18 = vld [vmem:[#allocation20 + $0xe0] sm:$0xff] }
 0x3bc   : > { %v2207_v27 = vld [vmem:[#allocation5 + $0x24] sm:$0xf]  ;;  %v2225_v26 = vrot.slane %v2223_v25, 4  ;;  %v2213_v28 = vld [vmem:[#allocation5 + $0x2a] sm:$0xf]  ;;  %4131 = vmatpush3.bf16.msra.mxu1 %v4130_v6  ;;  %v4136_v20 = vpack.c.bf16 %v2602_v17, %v2601_v18  ;;  %v2616_v21 = vld [vmem:[#allocation20 + $0x158] sm:$0xff] }
 0x3bd   : > { %2208 = vst [vmem:[#allocation10 + $0x48] sm:$0xf] %v2207_v27  ;;  %2222 = vst [vmem:[#allocation10 + $0x50] sm:$0xf0] %v2220_v24  ;;  %v2215_v29 = vrot.slane %v2213_v28, 4  ;;  %4159 = vmatpush3.bf16.msra.mxu0 %v4156_v5  ;;  %4133 = vmatprep.subr.bf16.mxu1 %v4132_v11  ;;  %v2615_v19 = vld [vmem:[#allocation20 + $0x150] sm:$0xff] }
 0x3be   : > { %2227 = vst [vmem:[#allocation10 + $0x58] sm:$0xf0] %v2225_v26  ;;  %4161 = vmatprep.subr.bf16.mxu0 %v4160_v14  ;;  %v2585_v22 = vld [vmem:[#allocation20 + $0x60] sm:$0xff]  ;;  %v2586_v23 = vld [vmem:[#allocation20 + $0x68] sm:$0xff]  ;;  %v4164_v24 = vpack.c.bf16 %v2616_v21, %v2615_v19  ;;  %v2603_v27 = vld [vmem:[#allocation20 + $0xf0] sm:$0xff] }
 0x3bf   : > { %v2235_v31 = vld [vmem:[#allocation10 + $0x38] sm:$0xff]  ;;  %2217 = vst [vmem:[#allocation10 + $0x48] sm:$0xf0] %v2215_v29  ;;  %v4138_v25 = vpack.c.bf16 %v2586_v23, %v2585_v22  ;;  %v2617_v28 = vld [vmem:[#allocation20 + $0x160] sm:$0xff] }
 0x3c0   : > { %v2236_v32 = vld [vmem:[#allocation10 + $0x40] sm:$0xff]  ;;  %v2234_v15 = vld [vmem:[#allocation10 + $0x30] sm:$0xff]  ;;  %2369 = vmatprep.mubr.f32.mxu1 %v2235_v31  ;;  %4135 = vmatpush3.bf16.msra.mxu1 %v4134_v16  ;;  %v2604_v26 = vld [vmem:[#allocation20 + $0xf8] sm:$0xff] }
 0x3c1   : > { %3823 = vmatprep.mubr.f32.mxu0 %v2236_v32  ;;  %2370 = vmatmul.mubr.f32.gmra.mrb[40].mxu1 %v2234_v15  ;;  %v4140_v29 = vpack.c.bf16 %v2604_v26, %v2603_v27  ;;  %v2618_v31 = vld [vmem:[#allocation20 + $0x168] sm:$0xff]  ;;  %v2587_v32 = vld [vmem:[#allocation20 + $0x70] sm:$0xff]  ;;  %v2588_v15 = vld [vmem:[#allocation20 + $0x78] sm:$0xff] }
 0x3c2   : > { %4163 = vmatpush3.bf16.msra.mxu0 %v4160_v14  ;;  %4137 = vmatprep.subr.bf16.mxu1 %v4136_v20 }
 0x3c3   : > { %4165 = vmatprep.subr.bf16.mxu0 %v4164_v24 }
 0x3c4   : > { %v2238_v33 = vld [vmem:[#allocation10 + $0x50] sm:$0xff]  ;;  %4139 = vmatpush3.bf16.msra.mxu1 %v4138_v25 }
 0x3c5   : > { %2374 = vmatprep.mubr.f32.mxu1 %v2238_v33  ;;  %v2239_v34 = vld [vmem:[#allocation10 + $0x58] sm:$0xff]  ;;  %v4168_v33 = vpack.c.bf16 %v2618_v31, %v2617_v28  ;;  %4141 = vmatprep.subr.bf16.mxu1 %v4140_v29 }
 0x3c6   : > { %3824 = vmatmul.mubr.f32.gmra.mrb[48].mxu0 %v2239_v34  ;;  %v2237_v30 = vld [vmem:[#allocation10 + $0x48] sm:$0xff]  ;;  %v4142_v34 = vpack.c.bf16 %v2588_v15, %v2587_v32 }
 0x3c7   : > { %2375 = vmatmul.mubr.f32.gmra.mrb[42].mxu1 %v2237_v30  ;;  %4167 = vmatpush3.bf16.msra.mxu0 %v4164_v24  ;;  %v2619_v30 = vld [vmem:[#allocation20 + $0x170] sm:$0xff] }
 0x3c8   : > { %4169 = vmatprep.subr.bf16.mxu0 %v4168_v33  ;;  %4143 = vmatpush3.bf16.msra.mxu1 %v4142_v34  ;;  %v4172_v38 = vpack.c.bf16 %v2620_v37, %v2619_v30 }
 0x3cb   : > { %4171 = vmatpush3.bf16.msra.mxu0 %v4168_v33 }
 0x3cc   : > { %4173 = vmatprep.subr.bf16.mxu0 %v4172_v38 }
 0x3cf   : > { %4175 = vmatpush3.bf16.msra.mxu0 %v4172_v38 }
 0x47e   : > { %v3478_v39 = vpop.f32.mrb[36].mxu1 }
 0x47f   : > { %v3479_v40 = vpop.f32.mrb[37].mxu1 }
 0x480   : > { %v3480_v42 = vadd.f32 %v3479_v40, %v3478_v39 }
 0x482   : > { %v2362_v44 = vadd.f32 %v3480_v42, %v3194_v41 }
 0x483   : > { %v3822_v45 = vpop.f32.mrb[46].mxu0 }
 0x484   : > { %v2446_v36 = vpop.f32.mrb[47].mxu0 }
 0x485   : > { %v3481_v46 = vpop.f32.mrb[38].mxu1  ;;  %v2447_v47 = vadd.f32 %v2446_v36, %v2362_v44 }
 0x486   : > { %v3482_v35 = vpop.f32.mrb[39].mxu1 }
 0x487   : > { %v2465_v48 = vmax.f32 %v2447_v47, 0.0  ;;  %v3483_v43 = vadd.f32 %v3482_v35, %v3481_v46 }
 0x489   : > { %2469 = vst [vmem:[#allocation6 + $0x1] ss:$6 sps:$4 sm:$0xff] %v2465_v48   ;;  %v2367_v50 = vadd.f32 %v3483_v43, %v3194_v41 }
 0x48b   : > { %v2452_v51 = vadd.f32 %v3822_v45, %v2367_v50 }
 0x48d   : > { %v2466_v52 = vmax.f32 %v2452_v51, 0.0  ;;  %v2837_v51 = vld [vmem:[%s5481_s11 + $0x80] sm:$0xff] }
 0x48f   : > { %2471 = vst [vmem:[#allocation6 + $0xd] ss:$6 sps:$4 sm:$0xff] %v2466_v52   ;;  %v2838_v52 = vld [vmem:[%s5481_s11 + $0x88] sm:$0xff] }
 0x490   : > { %v2477_v0 = vld [vmem:[#allocation6] sm:$0xf]  ;;  %v2483_v53 = vld [vmem:[#allocation6 + $0x6] sm:$0xf] }
 0x491   : > { %v2488_v54 = vld [vmem:[#allocation6 + $0x7] sm:$0xf]  ;;  %2478 = vst [vmem:[#allocation11] sm:$0xf] %v2477_v0  ;;  %v2485_v55 = vrot.slane %v2483_v53, 4  ;;  %v2869_v0 = vld [vmem:[%s5481_s11 + $0x180] sm:$0xff]  ;;  %v4176_v53 = vpack.c.bf16 %v2838_v52, %v2837_v51 }
 0x492   : > { %v2490_v56 = vrot.slane %v2488_v54, 4  ;;  %v2493_v59 = vld [vmem:[#allocation6 + $0x8] sm:$0xf]  ;;  %v2479_v60 = vld [vmem:[#allocation6 + $0x1] sm:$0xf]  ;;  %v2880_v51 = vld [vmem:[%s5481_s11 + $0x1d8] sm:$0xff] }
 0x493   : > { %v2495_v61 = vrot.slane %v2493_v59, 4  ;;  %2480 = vst [vmem:[#allocation11 + $0x8] sm:$0xf] %v2479_v60  ;;  %v2481_v62 = vld [vmem:[#allocation6 + $0x2] sm:$0xf]  ;;  %4177 = vmatprep.subr.bf16.mxu1 %v4176_v53  ;;  %v2831_v52 = vld [vmem:[%s5481_s11 + $0x50] sm:$0xff] }
 0x494   : > { %2487 = vst [vmem:[#allocation11] sm:$0xf0] %v2485_v55  ;;  %2492 = vst [vmem:[#allocation11 + $0x8] sm:$0xf0] %v2490_v56  ;;  %v3484_v63 = vpop.f32.mrb[40].mxu1  ;;  %v2870_v54 = vld [vmem:[%s5481_s11 + $0x188] sm:$0xff] }
 0x495   : > { %2482 = vst [vmem:[#allocation11 + $0x10] sm:$0xf] %v2481_v62  ;;  %2497 = vst [vmem:[#allocation11 + $0x10] sm:$0xf0] %v2495_v61  ;;  %v3485_v1 = vpop.f32.mrb[41].mxu1  ;;  %v2821_v55 = vld [vmem:[%s5481_s11] sm:$0xff]  ;;  %v4208_v59 = vpack.c.bf16 %v2870_v54, %v2869_v0 }
 0x496   : > { %v3486_v58 = vadd.f32 %v3485_v1, %v3484_v63  ;;  %v2514_v2 = vld [vmem:[#allocation6 + $0x14] sm:$0xf]  ;;  %v2500_v3 = vld [vmem:[#allocation6 + $0xd] sm:$0xf]  ;;  %v2822_v56 = vld [vmem:[%s5481_s11 + $0x8] sm:$0xff] }
 0x497   : > { %v2509_v49 = vld [vmem:[#allocation6 + $0x13] sm:$0xf]  ;;  %v2516_v57 = vrot.slane %v2514_v2, 4  ;;  %2501 = vst [vmem:[#allocation11 + $0x20] sm:$0xf] %v2500_v3  ;;  %v4178_v60 = vpack.c.bf16 %v2822_v56, %v2821_v55  ;;  %v2853_v61 = vld [vmem:[%s5481_s11 + $0x100] sm:$0xff]  ;;  %4209 = vmatprep.subr.bf16.mxu0 %v4208_v59 }
 0x498   : > { %v2372_v4 = vadd.f32 %v3486_v58, %v3194_v41  ;;  %v2511_v5 = vrot.slane %v2509_v49, 4  ;;  %v2502_v6 = vld [vmem:[#allocation6 + $0xe] sm:$0xf]  ;;  %v2504_v9 = vld [vmem:[#allocation6 + $0x12] sm:$0xf]  ;;  %v2854_v62 = vld [vmem:[%s5481_s11 + $0x108] sm:$0xff] }
 0x499   : > { %v2498_v7 = vld [vmem:[#allocation6 + $0xc] sm:$0xf]  ;;  %v3825_v8 = vpop.f32.mrb[48].mxu0  ;;  %2503 = vst [vmem:[#allocation11 + $0x28] sm:$0xf] %v2502_v6  ;;  %v2506_v13 = vrot.slane %v2504_v9, 4  ;;  %v4210_v63 = vpack.c.bf16 %v2854_v62, %v2853_v61 }
 0x49a   : > { %2499 = vst [vmem:[#allocation11 + $0x18] sm:$0xf] %v2498_v7  ;;  %2518 = vst [vmem:[#allocation11 + $0x28] sm:$0xf0] %v2516_v57  ;;  %v3487_v11 = vpop.f32.mrb[42].mxu1  ;;  %v2456_v12 = vpop.f32.mrb[49].mxu0 }
 0x49b   : > { %2513 = vst [vmem:[#allocation11 + $0x20] sm:$0xf0] %v2511_v5  ;;  %v2457_v10 = vadd.f32 %v2456_v12, %v2372_v4  ;;  %v3488_v14 = vpop.f32.mrb[43].mxu1  ;;  %v2562_v16 = vld [vmem:[#allocation11 + $0x8] sm:$0xff]  ;;  %v2561_v18 = vld [vmem:[#allocation11] sm:$0xff]  ;;  %v2841_v9 = vld [vmem:[%s5481_s11 + $0xa0] sm:$0xff] }
 0x49c   : > { %v3489_v17 = vadd.f32 %v3488_v14, %v3487_v11  ;;  %2692 = vmatprep.mubr.f32.mxu1 %v2562_v16  ;;  %v2563_v19 = vld [vmem:[#allocation11 + $0x10] sm:$0xff]  ;;  %2508 = vst [vmem:[#allocation11 + $0x18] sm:$0xf0] %v2506_v13  ;;  %v2839_v1 = vld [vmem:[%s5481_s11 + $0x90] sm:$0xff]  ;;  %v2840_v58 = vld [vmem:[%s5481_s11 + $0x98] sm:$0xff] }
 0x49d   : > { %v2467_v20 = vmax.f32 %v2457_v10, 0.0  ;;  %3858 = vmatprep.mubr.f32.mxu0 %v2563_v19  ;;  %2693 = vmatmul.mubr.f32.vlgmr.msra.gmra.mrb[44].mxu1 %v2561_v18  ;;  %v2871_v2 = vld [vmem:[%s5481_s11 + $0x190] sm:$0xff]  ;;  %v4180_v3 = vpack.c.bf16 %v2840_v58, %v2839_v1  ;;  %v2872_v49 = vld [vmem:[%s5481_s11 + $0x198] sm:$0xff]  ;;  %v2842_v12 = vld [vmem:[%s5481_s11 + $0xa8] sm:$0xff] }
 0x49e   : > { %v2377_v21 = vadd.f32 %v3489_v17, %v3194_v41  ;;  %4179 = vmatpush3.bf16.msra.mxu1 %v4178_v60  ;;  %v2823_v57 = vld [vmem:[%s5481_s11 + $0x10] sm:$0xff]  ;;  %v2824_v4 = vld [vmem:[%s5481_s11 + $0x18] sm:$0xff]  ;;  %v4212_v5 = vpack.c.bf16 %v2872_v49, %v2871_v2  ;;  %v2873_v13 = vld [vmem:[%s5481_s11 + $0x1a0] sm:$0xff]  ;;  %v4184_v14 = vpack.c.bf16 %v2842_v12, %v2841_v9 }
 0x49f   : > { %2473 = vst [vmem:[#allocation6 + $0x19] ss:$6 sps:$4 sm:$0xff] %v2467_v20   ;;  %v4182_v6 = vpack.c.bf16 %v2824_v4, %v2823_v57  ;;  %v2855_v7 = vld [vmem:[%s5481_s11 + $0x110] sm:$0xff]  ;;  %4181 = vmatprep.subr.bf16.mxu1 %v4180_v3  ;;  %v2874_v10 = vld [vmem:[%s5481_s11 + $0x1a8] sm:$0xff]  ;;  %v2825_v18 = vld [vmem:[%s5481_s11 + $0x20] sm:$0xff] }
 0x4a0   : > { %v2462_v22 = vadd.f32 %v3825_v8, %v2377_v21  ;;  %v2856_v8 = vld [vmem:[%s5481_s11 + $0x118] sm:$0xff]  ;;  %v4216_v16 = vpack.c.bf16 %v2874_v10, %v2873_v13  ;;  %v2826_v17 = vld [vmem:[%s5481_s11 + $0x28] sm:$0xff]  ;;  %v2857_v19 = vld [vmem:[%s5481_s11 + $0x120] sm:$0xff] }
 0x4a1   : > { %v2566_v24 = vld [vmem:[#allocation11 + $0x28] sm:$0xff]  ;;  %v4214_v11 = vpack.c.bf16 %v2856_v8, %v2855_v7  ;;  %v4186_v20 = vpack.c.bf16 %v2826_v17, %v2825_v18  ;;  %v2858_v21 = vld [vmem:[%s5481_s11 + $0x128] sm:$0xff]  ;;  %v2863_v55 = vld [vmem:[%s5481_s11 + $0x150] sm:$0xff] }
 0x4a2   : > { %v2565_v23 = vld [vmem:[#allocation11 + $0x20] sm:$0xff]  ;;  %v2468_v25 = vmax.f32 %v2462_v22, 0.0  ;;  %3859 = vmatmul.mubr.f32.vlgmr.msra.gmra.mrb[50].mxu0 %v2566_v24  ;;  %4183 = vmatpush3.bf16.msra.mxu1 %v4182_v6  ;;  %v4218_v22 = vpack.c.bf16 %v2858_v21, %v2857_v19  ;;  %v2844_v24 = vld [vmem:[%s5481_s11 + $0xb8] sm:$0xff]  ;;  %v2849_v60 = vld [vmem:[%s5481_s11 + $0xe0] sm:$0xff] }
 0x4a3   : > { %2697 = vmatprep.mubr.f32.mxu1 %v2565_v23  ;;  %v2564_v27 = vld [vmem:[#allocation11 + $0x18] sm:$0xff]  ;;  %4211 = vmatpush3.bf16.msra.mxu0 %v4210_v63  ;;  %v2843_v23 = vld [vmem:[%s5481_s11 + $0xb0] sm:$0xff]  ;;  %v2832_v0 = vld [vmem:[%s5481_s11 + $0x58] sm:$0xff] }
 0x4a4   : > { %2475 = vst [vmem:[#allocation6 + $0x25] ss:$6 sps:$4 sm:$0xff] %v2468_v25   ;;  %2698 = vmatmul.mubr.f32.gmra.mrb[46].mxu1 %v2564_v27  ;;  %4213 = vmatprep.subr.bf16.mxu0 %v4212_v5  ;;  %v2875_v25 = vld [vmem:[%s5481_s11 + $0x1b0] sm:$0xff]  ;;  %v4188_v27 = vpack.c.bf16 %v2844_v24, %v2843_v23  ;;  %v4198_v54 = vpack.c.bf16 %v2832_v0, %v2831_v52  ;;  %v2864_v56 = vld [vmem:[%s5481_s11 + $0x158] sm:$0xff]  ;;  %v2850_v61 = vld [vmem:[%s5481_s11 + $0xe8] sm:$0xff] }
 0x4a5   : > { %4185 = vmatprep.subr.bf16.mxu1 %v4184_v14  ;;  %v4230_v59 = vpack.c.bf16 %v2864_v56, %v2863_v55  ;;  %v2881_v62 = vld [vmem:[%s5481_s11 + $0x1e0] sm:$0xff]  ;;  %v4200_v63 = vpack.c.bf16 %v2850_v61, %v2849_v60  ;;  %v2882_v1 = vld [vmem:[%s5481_s11 + $0x1e8] sm:$0xff]  ;;  %v2851_v5 = vld [vmem:[%s5481_s11 + $0xf0] sm:$0xff] }
 0x4a6   : > { %v2525_v26 = vld [vmem:[#allocation6 + $0x1e] sm:$0xf]  ;;  %v2521_v33 = vld [vmem:[#allocation6 + $0x19] sm:$0xf]  ;;  %4187 = vmatpush3.bf16.msra.mxu1 %v4186_v20  ;;  %v4232_v3 = vpack.c.bf16 %v2882_v1, %v2881_v62  ;;  %v2852_v7 = vld [vmem:[%s5481_s11 + $0xf8] sm:$0xff] }
 0x4a7   : > { %v2530_v28 = vld [vmem:[#allocation6 + $0x1f] sm:$0xf]  ;;  %v2527_v31 = vrot.slane %v2525_v26, 4  ;;  %2522 = vst [vmem:[#allocation11 + $0x38] sm:$0xf] %v2521_v33  ;;  %4215 = vmatpush3.bf16.msra.mxu0 %v4214_v11  ;;  %v2876_v26 = vld [vmem:[%s5481_s11 + $0x1b8] sm:$0xff]  ;;  %4189 = vmatprep.subr.bf16.mxu1 %v4188_v27  ;;  %v4204_v11 = vpack.c.bf16 %v2852_v7, %v2851_v5 }
 0x4a8   : > { %v2535_v29 = vld [vmem:[#allocation6 + $0x20] sm:$0xf]  ;;  %v2532_v32 = vrot.slane %v2530_v28, 4  ;;  %v2523_v34 = vld [vmem:[#allocation6 + $0x1a] sm:$0xf]  ;;  %4217 = vmatprep.subr.bf16.mxu0 %v4216_v16  ;;  %v2827_v28 = vld [vmem:[%s5481_s11 + $0x30] sm:$0xff] }
 0x4a9   : > { %v2537_v15 = vrot.slane %v2535_v29, 4  ;;  %v2519_v30 = vld [vmem:[#allocation6 + $0x18] sm:$0xf]  ;;  %2529 = vst [vmem:[#allocation11 + $0x30] sm:$0xf0] %v2527_v31  ;;  %v2828_v29 = vld [vmem:[%s5481_s11 + $0x38] sm:$0xff]  ;;  %v4220_v31 = vpack.c.bf16 %v2876_v26, %v2875_v25 }
 0x4aa   : > { %2534 = vst [vmem:[#allocation11 + $0x38] sm:$0xf0] %v2532_v32  ;;  %2524 = vst [vmem:[#allocation11 + $0x40] sm:$0xf] %v2523_v34  ;;  %v4190_v32 = vpack.c.bf16 %v2828_v29, %v2827_v28  ;;  %v2860_v33 = vld [vmem:[%s5481_s11 + $0x138] sm:$0xff]  ;;  %v2833_v58 = vld [vmem:[%s5481_s11 + $0x60] sm:$0xff] }
 0x4ab   : > { %2539 = vst [vmem:[#allocation11 + $0x40] sm:$0xf0] %v2537_v15  ;;  %2520 = vst [vmem:[#allocation11 + $0x30] sm:$0xf] %v2519_v30  ;;  %v2542_v37 = vld [vmem:[#allocation6 + $0x25] sm:$0xf]  ;;  %4219 = vmatpush3.bf16.msra.mxu0 %v4218_v22 }
 0x4ac   : > { %v2551_v38 = vld [vmem:[#allocation6 + $0x2b] sm:$0xf]  ;;  %v2544_v39 = vld [vmem:[#allocation6 + $0x26] sm:$0xf]  ;;  %2543 = vst [vmem:[#allocation11 + $0x50] sm:$0xf] %v2542_v37  ;;  %4221 = vmatprep.subr.bf16.mxu0 %v4220_v31  ;;  %4191 = vmatpush3.bf16.msra.mxu1 %v4190_v32 }
 0x4ad   : > { %v2553_v40 = vrot.slane %v2551_v38, 4  ;;  %2545 = vst [vmem:[#allocation11 + $0x58] sm:$0xf] %v2544_v39  ;;  %v2556_v41 = vld [vmem:[#allocation6 + $0x2c] sm:$0xf]  ;;  %v2845_v30 = vld [vmem:[%s5481_s11 + $0xc0] sm:$0xff] }
 0x4ae   : > { %v2540_v42 = vld [vmem:[#allocation6 + $0x24] sm:$0xf]  ;;  %v2558_v44 = vrot.slane %v2556_v41, 4  ;;  %v2546_v45 = vld [vmem:[#allocation6 + $0x2a] sm:$0xf]  ;;  %v2877_v38 = vld [vmem:[%s5481_s11 + $0x1c0] sm:$0xff] }
 0x4af   : > { %2541 = vst [vmem:[#allocation11 + $0x48] sm:$0xf] %v2540_v42  ;;  %2555 = vst [vmem:[#allocation11 + $0x50] sm:$0xf0] %v2553_v40  ;;  %v2548_v36 = vrot.slane %v2546_v45, 4  ;;  %v2859_v15 = vld [vmem:[%s5481_s11 + $0x130] sm:$0xff] }
 0x4b0   : > { %2560 = vst [vmem:[#allocation11 + $0x58] sm:$0xf0] %v2558_v44  ;;  %v4222_v34 = vpack.c.bf16 %v2860_v33, %v2859_v15  ;;  %v2846_v37 = vld [vmem:[%s5481_s11 + $0xc8] sm:$0xff]  ;;  %v2829_v41 = vld [vmem:[%s5481_s11 + $0x40] sm:$0xff]  ;;  %v2883_v8 = vld [vmem:[%s5481_s11 + $0x1f0] sm:$0xff] }
 0x4b1   : > { %v2568_v46 = vld [vmem:[#allocation11 + $0x38] sm:$0xff]  ;;  %2550 = vst [vmem:[#allocation11 + $0x48] sm:$0xf0] %v2548_v36  ;;  %v4192_v39 = vpack.c.bf16 %v2846_v37, %v2845_v30  ;;  %v2861_v36 = vld [vmem:[%s5481_s11 + $0x140] sm:$0xff]  ;;  %v2884_v9 = vld [vmem:[%s5481_s11 + $0x1f8] sm:$0xff] }
 0x4b2   : > { %v2569_v47 = vld [vmem:[#allocation11 + $0x40] sm:$0xff]  ;;  %v2567_v35 = vld [vmem:[#allocation11 + $0x30] sm:$0xff]  ;;  %2702 = vmatprep.mubr.f32.mxu1 %v2568_v46  ;;  %4223 = vmatpush3.bf16.msra.mxu0 %v4222_v34  ;;  %v2878_v40 = vld [vmem:[%s5481_s11 + $0x1c8] sm:$0xff]  ;;  %v4236_v12 = vpack.c.bf16 %v2884_v9, %v2883_v8 }
 0x4b3   : > { %3861 = vmatprep.mubr.f32.mxu0 %v2569_v47  ;;  %2703 = vmatmul.mubr.f32.gmra.mrb[48].mxu1 %v2567_v35  ;;  %v2830_v42 = vld [vmem:[%s5481_s11 + $0x48] sm:$0xff]  ;;  %v4224_v44 = vpack.c.bf16 %v2878_v40, %v2877_v38  ;;  %v2847_v35 = vld [vmem:[%s5481_s11 + $0xd0] sm:$0xff]  ;;  %v2865_v57 = vld [vmem:[%s5481_s11 + $0x160] sm:$0xff] }
 0x4b4   : > { %v4194_v45 = vpack.c.bf16 %v2830_v42, %v2829_v41  ;;  %v2862_v46 = vld [vmem:[%s5481_s11 + $0x148] sm:$0xff]  ;;  %4193 = vmatprep.subr.bf16.mxu1 %v4192_v39  ;;  %v2835_v13 = vld [vmem:[%s5481_s11 + $0x70] sm:$0xff]  ;;  %v2836_v10 = vld [vmem:[%s5481_s11 + $0x78] sm:$0xff] }
 0x4b5   : > { %v4226_v47 = vpack.c.bf16 %v2862_v46, %v2861_v36  ;;  %4225 = vmatprep.subr.bf16.mxu0 %v4224_v44  ;;  %v2834_v2 = vld [vmem:[%s5481_s11 + $0x68] sm:$0xff]  ;;  %v2867_v14 = vld [vmem:[%s5481_s11 + $0x170] sm:$0xff]  ;;  %v4206_v16 = vpack.c.bf16 %v2836_v10, %v2835_v13  ;;  %v2868_v18 = vld [vmem:[%s5481_s11 + $0x178] sm:$0xff] }
 0x4b6   : > { %v2571_v48 = vld [vmem:[#allocation11 + $0x50] sm:$0xff]  ;;  %4195 = vmatpush3.bf16.msra.mxu1 %v4194_v45  ;;  %v4202_v49 = vpack.c.bf16 %v2834_v2, %v2833_v58  ;;  %v2866_v4 = vld [vmem:[%s5481_s11 + $0x168] sm:$0xff]  ;;  %v4238_v17 = vpack.c.bf16 %v2868_v18, %v2867_v14 }
 0x4b7   : > { %2707 = vmatprep.mubr.f32.mxu1 %v2571_v48  ;;  %v2572_v43 = vld [vmem:[#allocation11 + $0x58] sm:$0xff]  ;;  %v2848_v48 = vld [vmem:[%s5481_s11 + $0xd8] sm:$0xff]  ;;  %4227 = vmatpush3.bf16.msra.mxu0 %v4226_v47  ;;  %v4234_v6 = vpack.c.bf16 %v2866_v4, %v2865_v57  ;;  %v3195_v21 = vld [vmem:[%s5480_s10] ss:$0 sm:$0xff] }
 0x4b8   : > { %3862 = vmatmul.mubr.f32.gmra.mrb[52].mxu0 %v2572_v43  ;;  %v2570_v50 = vld [vmem:[#allocation11 + $0x48] sm:$0xff]  ;;  %v2879_v43 = vld [vmem:[%s5481_s11 + $0x1d0] sm:$0xff] }
 0x4b9   : > { %2708 = vmatmul.mubr.f32.gmra.mrb[50].mxu1 %v2570_v50  ;;  %v4196_v50 = vpack.c.bf16 %v2848_v48, %v2847_v35  ;;  %v4228_v53 = vpack.c.bf16 %v2880_v51, %v2879_v43 }
 0x4bb   : > { %4197 = vmatprep.subr.bf16.mxu1 %v4196_v50  ;;  %4229 = vmatprep.subr.bf16.mxu0 %v4228_v53  ;;  %v3196_v53 = vld [vmem:[%s5518_s15] ss:$0 sm:$0xff] }
 0x4bc   : > { %4199 = vmatpush3.bf16.msra.mxu1 %v4198_v54  ;;  %4231 = vmatpush3.bf16.msra.mxu0 %v4230_v59 }
 0x4bd   : > { %4201 = vmatprep.subr.bf16.mxu1 %v4200_v63  ;;  %4233 = vmatprep.subr.bf16.mxu0 %v4232_v3 }
 0x4c0   : > { %4203 = vmatpush3.bf16.msra.mxu1 %v4202_v49  ;;  %4235 = vmatpush3.bf16.msra.mxu0 %v4234_v6 }
 0x4c1   : > { %4205 = vmatprep.subr.bf16.mxu1 %v4204_v11  ;;  %4237 = vmatprep.subr.bf16.mxu0 %v4236_v12 }
 0x4c4   : > { %4207 = vmatpush3.bf16.msra.mxu1 %v4206_v16  ;;  %4239 = vmatpush3.bf16.msra.mxu0 %v4238_v17 }
 0x570   : > { %v3542_v19 = vpop.f32.mrb[44].mxu1 }
 0x571   : > { %v3543_v20 = vpop.f32.mrb[45].mxu1 }
 0x572   : > { %v3544_v22 = vadd.f32 %v3543_v20, %v3542_v19 }
 0x574   : > { %v2695_v23 = vadd.f32 %v3544_v22, %v3195_v21 }
 0x575   : > { %v3860_v24 = vpop.f32.mrb[50].mxu0 }
 0x576   : > { %v2779_v25 = vpop.f32.mrb[51].mxu0 }
 0x577   : > { %v3545_v27 = vpop.f32.mrb[46].mxu1  ;;  %v2780_v26 = vadd.f32 %v2779_v25, %v2695_v23 }
 0x578   : > { %v3546_v28 = vpop.f32.mrb[47].mxu1 }
 0x579   : > { %v2798_v29 = vmax.f32 %v2780_v26, 0.0  ;;  %v3547_v31 = vadd.f32 %v3546_v28, %v3545_v27 }
 0x57b   : > { %2802 = vst [vmem:[#allocation12] sm:$0xff] %v2798_v29  ;;  %v2700_v32 = vadd.f32 %v3547_v31, %v3195_v21 }
 0x57d   : > { %v2785_v15 = vadd.f32 %v3860_v24, %v2700_v32 }
 0x57f   : > { %v2799_v33 = vmax.f32 %v2785_v15, 0.0 }
 0x581   : > { %2803 = vst [vmem:[#allocation12 + $0x8] sm:$0xff] %v2799_v33 }
 0x586   : > { %v3548_v34 = vpop.f32.mrb[48].mxu1 }
 0x587   : > { %v3549_v30 = vpop.f32.mrb[49].mxu1 }
 0x588   : > { %v3550_v37 = vadd.f32 %v3549_v30, %v3548_v34 }
 0x58a   : > { %v2705_v38 = vadd.f32 %v3550_v37, %v3195_v21 }
 0x58b   : > { %v3863_v39 = vpop.f32.mrb[52].mxu0 }
 0x58c   : > { %v3551_v40 = vpop.f32.mrb[50].mxu1  ;;  %v2789_v41 = vpop.f32.mrb[53].mxu0 }
 0x58d   : > { %v2790_v42 = vadd.f32 %v2789_v41, %v2705_v38  ;;  %v3552_v44 = vpop.f32.mrb[51].mxu1 }
 0x58e   : > { %v3553_v45 = vadd.f32 %v3552_v44, %v3551_v40 }
 0x58f   : > { %v2800_v36 = vmax.f32 %v2790_v42, 0.0 }
 0x590   : > { %v2710_v46 = vadd.f32 %v3553_v45, %v3195_v21 }
 0x591   : > { %2804 = vst [vmem:[#allocation12 + $0x10] sm:$0xff] %v2800_v36 }
 0x592   : > { %v2795_v47 = vadd.f32 %v3863_v39, %v2710_v46 }
 0x594   : > { %v2801_v35 = vmax.f32 %v2795_v47, 0.0 }
 0x596   : > { %2805 = vst [vmem:[#allocation12 + $0x18] sm:$0xff] %v2801_v35 }
 0x59d   : > { %v2809_v48 = vld [vmem:[#allocation12 + $0x1] ss:$4 sm:$0xff]  ;;  %v2815_v43 = vld [vmem:[#allocation12 + $0x3] ss:$4 sm:$0xff]  ;;  %v2806_v50 = vld [vmem:[#allocation12] ss:$4 sm:$0xff] }
 0x59e   : > { %2956 = vmatprep.mubr.f32.mxu1 %v2809_v48  ;;  %3026 = vmatprep.mubr.f32.mxu0 %v2815_v43  ;;  %v2812_v51 = vld [vmem:[#allocation12 + $0x2] ss:$4 sm:$0xff] }
 0x59f   : > { %2957 = vmatmul.mubr.f32.vlgmr.msra.gmra.mrb[52].mxu1 %v2806_v50  ;;  %3027 = vmatmul.mubr.f32.vlgmr.msra.gmra.mrb[54].mxu0 %v2812_v51 }
 0x672   : > { %v3606_v52 = vpop.f32.mrb[52].mxu1  ;;  %v3641_v0 = vpop.f32.mrb[54].mxu0 }
 0x673   : > { %v3607_v54 = vpop.f32.mrb[53].mxu1  ;;  %v3642_v55 = vpop.f32.mrb[55].mxu0 }
 0x674   : > { %v3608_v56 = vadd.f32 %v3607_v54, %v3606_v52  ;;  %v3643_v59 = vadd.f32 %v3642_v55, %v3641_v0 }
 0x676   : > { %v2959_v60 = vadd.f32 %v3608_v56, %v3196_v53 }
 0x678   : > { %v3029_v61 = vadd.f32 %v3643_v59, %v2959_v60 }
 0x67a   : > { %3032 = vst [vmem:[%s495_s16] sm:$0xff] %v3029_v61 }
 0x67b   : > { %4450 = shalt.err (!%p4447_p0)
}
 0x67c   : > { %s4451_s18 = scalar_lea.hbm %s5428_s21, 128  ;;  %s4455_s15 = scalar_lea.hbm %s5521_s20, 256 }
 0x67d   : > { %p4452_p10 = scmp.ne.s32.totalorder %s5428_s21, %s4451_s18  ;;  %p4456_p4 = scmp.lt.u32.totalorder %s5428_s21, %s5521_s20 }
 0x67e   : > { %p4457_p12 = scmp.lt.u32.totalorder %s4455_s15, %s4451_s18  ;;  %p4459_p8 = scmp.lt.u32.totalorder %s4451_s18, %s5428_s21 }
 0x67f   : > { %p4453_p2 = pnand %p4452_p10, %p5522_p11 }
 0x680   : > { %p4458_p7 = por %p4457_p12, %p4456_p4 }
 0x681   : > { %p4454_p3 = pneg %p4453_p2 }
 0x682   : > { %p4460_p13 = por %p4459_p8, %p4458_p7 }
 0x684   : > { %p4461_p1 = pnand %p4460_p13, %p4454_p3 }
 0x686   : > { %4464 = shalt.err (!%p4461_p1)
}
 0x687   : > { %4256 = dma.vmem_to_hbm [thread:$0]  (%p5522_p11), %s5430_s30, 128, %s5428_s21, %s3034_s23  }
 0x688 PF: > { %s5523_s28 = sld [smem:[#allocation29_spill]]  ;;  %s5524_s12 = sld [smem:[#allocation27_spill]] }
 0x689   : > { %s5525_s25 = sld [smem:[#allocation33_spill]] }
 0x68e   : > { %p4283_p6 = scmp.ge.s32.totalorder %s5523_s28, 2  ;;  %s3059_s17 = sand.u32 1, %s5524_s12  }
 0x68f   : > { %p5526_p9 = scmp.ne.s32.totalorder %s5525_s25, 0  ;;  %s3060_s29 = scalar_lea.sflag [#allocation16], %s3059_s17 }
 0x691   : > { %p4272_p5 = pnand %p4283_p6, %p5526_p9 }
 0x693   : > { %4494 = dma.done.wait (!%p4272_p5), %s3060_s29, 128  }
 0x694   : > { %4496 = vsyncadd (!%p4272_p5), %s3060_s29, 4294967168  ;;  %s5527_s28 = sld [smem:[#allocation30_spill]]  ;;  %s5528_s14 = sld [smem:[#allocation28_spill]] }
 0x695   : > { %s5529_s27 = sld [smem:[#allocation31_spill]]  ;;  %s5530_s25 = smov %s4503_s26 }
 0x69a   : > { %p26_p0 = scmp.ge.s32.totalorder %s5527_s28, 4   ;;  %s5531_s26 = smov %s5528_s14 }
 0x69c   :  { %28 = sbr.rel (!%p26_p0) target bundleno = 9 (0x9), region = 227 }
 0x6a3   :  { %3065 = vsyncpa [#allocation15], 1 }
 0x6a4   :  { %3067 = vsyncpa [#allocation15 + $0x1], 1 }
 0x6a5   :  { %3068 = vsyncpa [#allocation18], 1 }
 0x6a6   :  { %3069 = vsyncpa [#allocation21], 1 }
 0x6a7   :  { %3070 = vsyncpa [#allocation16], 1 }
 0x6a8   :  { %3072 = vsyncpa [#allocation16 + $0x1], 1 }

</bundles_post_ra>
